<compile_context>
chip_gen: v7x
topology: tpu7x:2x2x1
jax: 0.10.0
libtpu: 0.0.40
codegen_flags: <defaults>
</compile_context>

<pallas_src>
import functools

import jax
import jax.numpy as jnp
from jax.experimental import pallas as pl
from jax.experimental.pallas import tpu as pltpu

KH = KW = 7
PAD = 3
SUBLANE = 8  # f32 sublane packing


def _pick_tb(hw, *, max_live_vregs=40, n_live_values=16, cap=32):
    """Largest multiple of 8 batch tile whose conv working set stays in vregs.

    ~n_live_values live (TB, HW) f32 values are alive during the conv
    (7 dx accumulators + base + avg/max + masks + temporaries); each one is
    TB*HW/1024 vregs.  Keep that under max_live_vregs to avoid spills.
    """
    tb = SUBLANE
    while True:
        nxt = tb + SUBLANE
        if nxt > cap:
            break
        if n_live_values * nxt * hw // 1024 > max_live_vregs:
            break
        tb = nxt
    return tb


def _spatial_attn_kernel(x_ref, w_ref, o_ref, pad_ref, *, C, H, W, TB):
    # x_ref  : (TB, C*HW)            VMEM  lane-dense input block
    # w_ref  : (2*KH*KW,)            SMEM  flattened conv weight (OIHW, O=1)
    # o_ref  : (TB, HW)              VMEM  lane-dense output block
    # pad_ref: (2, TB, HW + 2*LPAD)  VMEM  flat zero-padded [avg; max] rows
    HW = H * W
    LPAD = PAD * W + PAD  # flat padding covering 3 rows + 3 cols of zeros

    # ---- fused channel reduction: one pass computes running sum and max ----
    # Each channel is a 128-aligned lane slice of the 2D block (dense vld).
    x0 = x_ref[:, 0:HW].astype(jnp.float32)
    ssum = x0
    mmax = x0
    for c in range(1, C):
        xc = x_ref[:, c * HW:(c + 1) * HW].astype(jnp.float32)
        ssum = ssum + xc
        mmax = jnp.maximum(mmax, xc)
    avg = ssum * (1.0 / C)

    # ---- refresh only the zero border of the flat padded buffer ----------
    zpad = jnp.zeros((2, TB, LPAD), jnp.float32)
    pad_ref[:, :, 0:LPAD] = zpad
    pad_ref[:, :, LPAD + HW:HW + 2 * LPAD] = zpad

    # ---- write the [avg; max] interiors (lane-dense slabs, no reshape) ----
    pad_ref[0, :, LPAD:LPAD + HW] = avg
    pad_ref[1, :, LPAD:LPAD + HW] = mmax

    # ---- 7x7 "same" conv in the flat layout -------------------------------
    # Output pixel f = y*W + x accumulates w[c,dy,dx] * pad[c, f + dy*W + dx];
    # vertical zero-padding comes from the LPAD zero borders, horizontal
    # zero-padding from a per-dx column mask applied once after the (c, dy)
    # partial sums (6 selects total instead of 98).
    accs = [jnp.zeros((TB, HW), jnp.float32) for _ in range(KW)]
    for c in range(2):
        for dy in range(KH):
            # One base row read per (c, dy); the 7 dx taps are lane slices.
            base = pad_ref[c, :, dy * W:dy * W + HW + (KW - 1)]  # (TB, HW+6)
            for dx in range(KW):
                w = w_ref[c * KH * KW + dy * KW + dx]
                accs[dx] = accs[dx] + w * base[:, dx:dx + HW]

    col = jax.lax.broadcasted_iota(jnp.int32, (TB, HW), 1) % W
    acc = accs[PAD]  # dx == PAD: never masked
    for dx in range(KW):
        if dx == PAD:
            continue
        shift = dx - PAD
        valid = jnp.logical_and(col + shift >= 0, col + shift < W)
        acc = acc + jnp.where(valid, accs[dx], 0.0)

    o_ref[:, :] = jax.nn.sigmoid(acc).astype(o_ref.dtype)


def spatial_attention(x, conv_weight):
    """x: (N, C, H, W); conv_weight: (1, 2, 7, 7). Returns (N, 1, H, W)."""
    N, C, H, W = x.shape
    HW = H * W
    lpad = PAD * W + PAD

    TB = _pick_tb(HW)
    n_pad = -(-N // TB) * TB  # round N up to a multiple of TB

    x_flat = x.reshape(N, C * HW)  # lane-dense 2D layout
    if n_pad != N:
        # Pad the batch instead of dropping to a 1-sublane tile; padded rows
        # produce garbage outputs that are sliced off below.
        x_flat = jnp.pad(x_flat, ((0, n_pad - N), (0, 0)))

    w_flat = conv_weight.reshape(-1).astype(jnp.float32)

    kernel = functools.partial(_spatial_attn_kernel, C=C, H=H, W=W, TB=TB)

    # Explicit VMEM budget (double-buffered in/out blocks + scratch), so the
    # same sizing logic holds on v7x's 64 MiB VMEM as on v5e/v6e's 128 MiB.
    itemsize = jnp.dtype(x.dtype).itemsize
    vmem_need = (2 * TB * C * HW * itemsize      # input block, double-buffered
                 + 2 * TB * HW * itemsize        # output block, double-buffered
                 + 2 * TB * (HW + 2 * lpad) * 4)  # f32 pad scratch
    vmem_limit = int(min(100 << 20, max(2 * vmem_need, 16 << 20)))

    out_flat = pl.pallas_call(
        kernel,
        out_shape=jax.ShapeDtypeStruct((n_pad, HW), x.dtype),
        grid=(n_pad // TB,),
        in_specs=[
            pl.BlockSpec((TB, C * HW), lambda n: (n, 0)),
            pl.BlockSpec(memory_space=pltpu.MemorySpace.SMEM),
        ],
        out_specs=pl.BlockSpec((TB, HW), lambda n: (n, 0)),
        scratch_shapes=[pltpu.VMEM((2, TB, HW + 2 * lpad), jnp.float32)],
        compiler_params=pltpu.CompilerParams(
            dimension_semantics=("parallel",),
            vmem_limit_bytes=vmem_limit),
    )(x_flat, w_flat)

    return out_flat[:N].reshape(N, 1, H, W)


def _reference(x, w):
    avg = jnp.mean(x, axis=1, keepdims=True)
    mx = jnp.max(x, axis=1, keepdims=True)
    out = jnp.concatenate([avg, mx], axis=1)
    out = jax.lax.conv_general_dilated(
        out, w, window_strides=(1, 1), padding=((PAD, PAD), (PAD, PAD)),
        dimension_numbers=("NCHW", "OIHW", "NCHW"))
    return jax.nn.sigmoid(out)


if __name__ == "__main__":
    key = jax.random.PRNGKey(0)
    k_x, k_w = jax.random.split(key)

    N, C, H, W = 2, 4, 16, 16
    x = jax.random.normal(k_x, (N, C, H, W), dtype=jnp.float32)

    # Deterministic init matching nn.Conv2d default (kaiming_uniform, a=sqrt(5)):
    # uniform(-1/sqrt(fan_in), 1/sqrt(fan_in)), fan_in = 2*7*7 = 98.
    fan_in = 2 * KH * KW
    bound = 1.0 / (fan_in ** 0.5)
    conv_weight = jax.random.uniform(
        k_w, (1, 2, KH, KW), dtype=jnp.float32, minval=-bound, maxval=bound)

    out = spatial_attention(x, conv_weight)
    out = jax.block_until_ready(out)

    ref = _reference(x, conv_weight)
    assert out.shape == (N, 1, H, W)
    assert jnp.allclose(out, ref, atol=1e-5, rtol=1e-5), (
        f"max abs err {jnp.max(jnp.abs(out - ref))}")

    print("KERNEL_OK")
</pallas_src>

<mosaic_0001>
module attributes {stable_mosaic.version = 11 : i64} {
  func.func @_spatial_attn_kernel(%arg0: i32, %arg1: memref<8x1024xf32, #tpu.memory_space<vmem>>, %arg2: memref<98xf32, #tpu.memory_space<smem>>, %arg3: memref<8x256xf32, #tpu.memory_space<vmem>>, %arg4: memref<2x8x358xf32, #tpu.memory_space<vmem>>) attributes {dimension_semantics = [#tpu.dimension_semantics<parallel>], iteration_bounds = array<i64: 1>, scalar_prefetch = 0 : i64, scratch_operands = 1 : i64, tpu.core_type = #tpu.core_type<tc>, window_params = [{transform_indices = @transform_0, window_bounds = array<i64: 8, 1024>}, {transform_indices = @transform_1, window_bounds = array<i64: 98>}, {transform_indices = @transform_2, window_bounds = array<i64: 8, 256>}]} {
    %c0 = arith.constant 0 : index
    %c0_0 = arith.constant 0 : index
    %0 = vector.load %arg1[%c0, %c0_0] : memref<8x1024xf32, #tpu.memory_space<vmem>>, vector<8x256xf32>
    %c0_1 = arith.constant 0 : index
    %c256 = arith.constant 256 : index
    %1 = vector.load %arg1[%c0_1, %c256] : memref<8x1024xf32, #tpu.memory_space<vmem>>, vector<8x256xf32>
    %2 = arith.addf %0, %1 : vector<8x256xf32>
    %3 = arith.maximumf %0, %1 : vector<8x256xf32>
    %c0_2 = arith.constant 0 : index
    %c512 = arith.constant 512 : index
    %4 = vector.load %arg1[%c0_2, %c512] : memref<8x1024xf32, #tpu.memory_space<vmem>>, vector<8x256xf32>
    %5 = arith.addf %2, %4 : vector<8x256xf32>
    %6 = arith.maximumf %3, %4 : vector<8x256xf32>
    %c0_3 = arith.constant 0 : index
    %c768 = arith.constant 768 : index
    %7 = vector.load %arg1[%c0_3, %c768] : memref<8x1024xf32, #tpu.memory_space<vmem>>, vector<8x256xf32>
    %8 = arith.addf %5, %7 : vector<8x256xf32>
    %9 = arith.maximumf %6, %7 : vector<8x256xf32>
    %cst = arith.constant 2.500000e-01 : f32
    %10 = vector.broadcast %cst : f32 to vector<8x256xf32>
    %11 = arith.mulf %8, %10 : vector<8x256xf32>
    %cst_4 = arith.constant 0.000000e+00 : f32
    %12 = vector.broadcast %cst_4 : f32 to vector<2x8x51xf32>
    %c0_5 = arith.constant 0 : index
    %c0_6 = arith.constant 0 : index
    %c0_7 = arith.constant 0 : index
    %13 = vector.load %arg4[%c0_5, %c0_6, %c0_7] : memref<2x8x358xf32, #tpu.memory_space<vmem>>, vector<2x8x51xf32>
    tpu.vector_store %arg4[%c0_5, %c0_6, %c0_7], %12 {strides = array<i32>} : memref<2x8x358xf32, #tpu.memory_space<vmem>>, vector<2x8x51xf32>,
    %c0_8 = arith.constant 0 : index
    %c0_9 = arith.constant 0 : index
    %c307 = arith.constant 307 : index
    %14 = vector.load %arg4[%c0_8, %c0_9, %c307] : memref<2x8x358xf32, #tpu.memory_space<vmem>>, vector<2x8x51xf32>
    tpu.vector_store %arg4[%c0_8, %c0_9, %c307], %12 {strides = array<i32>} : memref<2x8x358xf32, #tpu.memory_space<vmem>>, vector<2x8x51xf32>,
    %c0_10 = arith.constant 0 : index
    %c0_11 = arith.constant 0 : index
    %c51 = arith.constant 51 : index
    %15 = vector.load %arg4[%c0_10, %c0_11, %c51] : memref<2x8x358xf32, #tpu.memory_space<vmem>>, vector<1x8x256xf32>
    %16 = vector.shape_cast %15 : vector<1x8x256xf32> to vector<8x256xf32>
    %17 = vector.shape_cast %11 : vector<8x256xf32> to vector<1x8x256xf32>
    tpu.vector_store %arg4[%c0_10, %c0_11, %c51], %17 {strides = array<i32>} : memref<2x8x358xf32, #tpu.memory_space<vmem>>, vector<1x8x256xf32>,
    %c1 = arith.constant 1 : index
    %c0_12 = arith.constant 0 : index
    %c51_13 = arith.constant 51 : index
    %18 = vector.load %arg4[%c1, %c0_12, %c51_13] : memref<2x8x358xf32, #tpu.memory_space<vmem>>, vector<1x8x256xf32>
    %19 = vector.shape_cast %18 : vector<1x8x256xf32> to vector<8x256xf32>
    %20 = vector.shape_cast %9 : vector<8x256xf32> to vector<1x8x256xf32>
    tpu.vector_store %arg4[%c1, %c0_12, %c51_13], %20 {strides = array<i32>} : memref<2x8x358xf32, #tpu.memory_space<vmem>>, vector<1x8x256xf32>,
    %cst_14 = arith.constant 0.000000e+00 : f32
    %21 = vector.broadcast %cst_14 : f32 to vector<8x256xf32>
    %cst_15 = arith.constant 0.000000e+00 : f32
    %22 = vector.broadcast %cst_15 : f32 to vector<8x256xf32>
    %cst_16 = arith.constant 0.000000e+00 : f32
    %23 = vector.broadcast %cst_16 : f32 to vector<8x256xf32>
    %cst_17 = arith.constant 0.000000e+00 : f32
    %24 = vector.broadcast %cst_17 : f32 to vector<8x256xf32>
    %cst_18 = arith.constant 0.000000e+00 : f32
    %25 = vector.broadcast %cst_18 : f32 to vector<8x256xf32>
    %cst_19 = arith.constant 0.000000e+00 : f32
    %26 = vector.broadcast %cst_19 : f32 to vector<8x256xf32>
    %cst_20 = arith.constant 0.000000e+00 : f32
    %27 = vector.broadcast %cst_20 : f32 to vector<8x256xf32>
    %c0_21 = arith.constant 0 : index
    %c0_22 = arith.constant 0 : index
    %c0_23 = arith.constant 0 : index
    %28 = vector.load %arg4[%c0_21, %c0_22, %c0_23] : memref<2x8x358xf32, #tpu.memory_space<vmem>>, vector<1x8x262xf32>
    %29 = vector.shape_cast %28 : vector<1x8x262xf32> to vector<8x262xf32>
    %c0_24 = arith.constant 0 : index
    %30 = memref.load %arg2[%c0_24] : memref<98xf32, #tpu.memory_space<smem>>
    %31 = vector.extract_strided_slice %29 {offsets = [0, 0], sizes = [8, 256], strides = [1, 1]} : vector<8x262xf32> to vector<8x256xf32>
    %32 = vector.broadcast %30 : f32 to vector<8x256xf32>
    %33 = arith.mulf %32, %31 : vector<8x256xf32>
    %34 = arith.addf %21, %33 : vector<8x256xf32>
    %c1_25 = arith.constant 1 : index
    %35 = memref.load %arg2[%c1_25] : memref<98xf32, #tpu.memory_space<smem>>
    %36 = vector.extract_strided_slice %29 {offsets = [0, 1], sizes = [8, 256], strides = [1, 1]} : vector<8x262xf32> to vector<8x256xf32>
    %37 = vector.broadcast %35 : f32 to vector<8x256xf32>
    %38 = arith.mulf %37, %36 : vector<8x256xf32>
    %39 = arith.addf %22, %38 : vector<8x256xf32>
    %c2 = arith.constant 2 : index
    %40 = memref.load %arg2[%c2] : memref<98xf32, #tpu.memory_space<smem>>
    %41 = vector.extract_strided_slice %29 {offsets = [0, 2], sizes = [8, 256], strides = [1, 1]} : vector<8x262xf32> to vector<8x256xf32>
    %42 = vector.broadcast %40 : f32 to vector<8x256xf32>
    %43 = arith.mulf %42, %41 : vector<8x256xf32>
    %44 = arith.addf %23, %43 : vector<8x256xf32>
    %c3 = arith.constant 3 : index
    %45 = memref.load %arg2[%c3] : memref<98xf32, #tpu.memory_space<smem>>
    %46 = vector.extract_strided_slice %29 {offsets = [0, 3], sizes = [8, 256], strides = [1, 1]} : vector<8x262xf32> to vector<8x256xf32>
    %47 = vector.broadcast %45 : f32 to vector<8x256xf32>
    %48 = arith.mulf %47, %46 : vector<8x256xf32>
    %49 = arith.addf %24, %48 : vector<8x256xf32>
    %c4 = arith.constant 4 : index
    %50 = memref.load %arg2[%c4] : memref<98xf32, #tpu.memory_space<smem>>
    %51 = vector.extract_strided_slice %29 {offsets = [0, 4], sizes = [8, 256], strides = [1, 1]} : vector<8x262xf32> to vector<8x256xf32>
    %52 = vector.broadcast %50 : f32 to vector<8x256xf32>
    %53 = arith.mulf %52, %51 : vector<8x256xf32>
    %54 = arith.addf %25, %53 : vector<8x256xf32>
    %c5 = arith.constant 5 : index
    %55 = memref.load %arg2[%c5] : memref<98xf32, #tpu.memory_space<smem>>
    %56 = vector.extract_strided_slice %29 {offsets = [0, 5], sizes = [8, 256], strides = [1, 1]} : vector<8x262xf32> to vector<8x256xf32>
    %57 = vector.broadcast %55 : f32 to vector<8x256xf32>
    %58 = arith.mulf %57, %56 : vector<8x256xf32>
    %59 = arith.addf %26, %58 : vector<8x256xf32>
    %c6 = arith.constant 6 : index
    %60 = memref.load %arg2[%c6] : memref<98xf32, #tpu.memory_space<smem>>
    %61 = vector.extract_strided_slice %29 {offsets = [0, 6], sizes = [8, 256], strides = [1, 1]} : vector<8x262xf32> to vector<8x256xf32>
    %62 = vector.broadcast %60 : f32 to vector<8x256xf32>
    %63 = arith.mulf %62, %61 : vector<8x256xf32>
    %64 = arith.addf %27, %63 : vector<8x256xf32>
    %c0_26 = arith.constant 0 : index
    %c0_27 = arith.constant 0 : index
    %c16 = arith.constant 16 : index
    %65 = vector.load %arg4[%c0_26, %c0_27, %c16] : memref<2x8x358xf32, #tpu.memory_space<vmem>>, vector<1x8x262xf32>
    %66 = vector.shape_cast %65 : vector<1x8x262xf32> to vector<8x262xf32>
    %c7 = arith.constant 7 : index
    %67 = memref.load %arg2[%c7] : memref<98xf32, #tpu.memory_space<smem>>
    %68 = vector.extract_strided_slice %66 {offsets = [0, 0], sizes = [8, 256], strides = [1, 1]} : vector<8x262xf32> to vector<8x256xf32>
    %69 = vector.broadcast %67 : f32 to vector<8x256xf32>
    %70 = arith.mulf %69, %68 : vector<8x256xf32>
    %71 = arith.addf %34, %70 : vector<8x256xf32>
    %c8 = arith.constant 8 : index
    %72 = memref.load %arg2[%c8] : memref<98xf32, #tpu.memory_space<smem>>
    %73 = vector.extract_strided_slice %66 {offsets = [0, 1], sizes = [8, 256], strides = [1, 1]} : vector<8x262xf32> to vector<8x256xf32>
    %74 = vector.broadcast %72 : f32 to vector<8x256xf32>
    %75 = arith.mulf %74, %73 : vector<8x256xf32>
    %76 = arith.addf %39, %75 : vector<8x256xf32>
    %c9 = arith.constant 9 : index
    %77 = memref.load %arg2[%c9] : memref<98xf32, #tpu.memory_space<smem>>
    %78 = vector.extract_strided_slice %66 {offsets = [0, 2], sizes = [8, 256], strides = [1, 1]} : vector<8x262xf32> to vector<8x256xf32>
    %79 = vector.broadcast %77 : f32 to vector<8x256xf32>
    %80 = arith.mulf %79, %78 : vector<8x256xf32>
    %81 = arith.addf %44, %80 : vector<8x256xf32>
    %c10 = arith.constant 10 : index
    %82 = memref.load %arg2[%c10] : memref<98xf32, #tpu.memory_space<smem>>
    %83 = vector.extract_strided_slice %66 {offsets = [0, 3], sizes = [8, 256], strides = [1, 1]} : vector<8x262xf32> to vector<8x256xf32>
    %84 = vector.broadcast %82 : f32 to vector<8x256xf32>
    %85 = arith.mulf %84, %83 : vector<8x256xf32>
    %86 = arith.addf %49, %85 : vector<8x256xf32>
    %c11 = arith.constant 11 : index
    %87 = memref.load %arg2[%c11] : memref<98xf32, #tpu.memory_space<smem>>
    %88 = vector.extract_strided_slice %66 {offsets = [0, 4], sizes = [8, 256], strides = [1, 1]} : vector<8x262xf32> to vector<8x256xf32>
    %89 = vector.broadcast %87 : f32 to vector<8x256xf32>
    %90 = arith.mulf %89, %88 : vector<8x256xf32>
    %91 = arith.addf %54, %90 : vector<8x256xf32>
    %c12 = arith.constant 12 : index
    %92 = memref.load %arg2[%c12] : memref<98xf32, #tpu.memory_space<smem>>
    %93 = vector.extract_strided_slice %66 {offsets = [0, 5], sizes = [8, 256], strides = [1, 1]} : vector<8x262xf32> to vector<8x256xf32>
    %94 = vector.broadcast %92 : f32 to vector<8x256xf32>
    %95 = arith.mulf %94, %93 : vector<8x256xf32>
    %96 = arith.addf %59, %95 : vector<8x256xf32>
    %c13 = arith.constant 13 : index
    %97 = memref.load %arg2[%c13] : memref<98xf32, #tpu.memory_space<smem>>
    %98 = vector.extract_strided_slice %66 {offsets = [0, 6], sizes = [8, 256], strides = [1, 1]} : vector<8x262xf32> to vector<8x256xf32>
    %99 = vector.broadcast %97 : f32 to vector<8x256xf32>
    %100 = arith.mulf %99, %98 : vector<8x256xf32>
    %101 = arith.addf %64, %100 : vector<8x256xf32>
    %c0_28 = arith.constant 0 : index
    %c0_29 = arith.constant 0 : index
    %c32 = arith.constant 32 : index
    %102 = vector.load %arg4[%c0_28, %c0_29, %c32] : memref<2x8x358xf32, #tpu.memory_space<vmem>>, vector<1x8x262xf32>
    %103 = vector.shape_cast %102 : vector<1x8x262xf32> to vector<8x262xf32>
    %c14 = arith.constant 14 : index
    %104 = memref.load %arg2[%c14] : memref<98xf32, #tpu.memory_space<smem>>
    %105 = vector.extract_strided_slice %103 {offsets = [0, 0], sizes = [8, 256], strides = [1, 1]} : vector<8x262xf32> to vector<8x256xf32>
    %106 = vector.broadcast %104 : f32 to vector<8x256xf32>
    %107 = arith.mulf %106, %105 : vector<8x256xf32>
    %108 = arith.addf %71, %107 : vector<8x256xf32>
    %c15 = arith.constant 15 : index
    %109 = memref.load %arg2[%c15] : memref<98xf32, #tpu.memory_space<smem>>
    %110 = vector.extract_strided_slice %103 {offsets = [0, 1], sizes = [8, 256], strides = [1, 1]} : vector<8x262xf32> to vector<8x256xf32>
    %111 = vector.broadcast %109 : f32 to vector<8x256xf32>
    %112 = arith.mulf %111, %110 : vector<8x256xf32>
    %113 = arith.addf %76, %112 : vector<8x256xf32>
    %c16_30 = arith.constant 16 : index
    %114 = memref.load %arg2[%c16_30] : memref<98xf32, #tpu.memory_space<smem>>
    %115 = vector.extract_strided_slice %103 {offsets = [0, 2], sizes = [8, 256], strides = [1, 1]} : vector<8x262xf32> to vector<8x256xf32>
    %116 = vector.broadcast %114 : f32 to vector<8x256xf32>
    %117 = arith.mulf %116, %115 : vector<8x256xf32>
    %118 = arith.addf %81, %117 : vector<8x256xf32>
    %c17 = arith.constant 17 : index
    %119 = memref.load %arg2[%c17] : memref<98xf32, #tpu.memory_space<smem>>
    %120 = vector.extract_strided_slice %103 {offsets = [0, 3], sizes = [8, 256], strides = [1, 1]} : vector<8x262xf32> to vector<8x256xf32>
    %121 = vector.broadcast %119 : f32 to vector<8x256xf32>
    %122 = arith.mulf %121, %120 : vector<8x256xf32>
    %123 = arith.addf %86, %122 : vector<8x256xf32>
    %c18 = arith.constant 18 : index
    %124 = memref.load %arg2[%c18] : memref<98xf32, #tpu.memory_space<smem>>
    %125 = vector.extract_strided_slice %103 {offsets = [0, 4], sizes = [8, 256], strides = [1, 1]} : vector<8x262xf32> to vector<8x256xf32>
    %126 = vector.broadcast %124 : f32 to vector<8x256xf32>
    %127 = arith.mulf %126, %125 : vector<8x256xf32>
    %128 = arith.addf %91, %127 : vector<8x256xf32>
    %c19 = arith.constant 19 : index
    %129 = memref.load %arg2[%c19] : memref<98xf32, #tpu.memory_space<smem>>
    %130 = vector.extract_strided_slice %103 {offsets = [0, 5], sizes = [8, 256], strides = [1, 1]} : vector<8x262xf32> to vector<8x256xf32>
    %131 = vector.broadcast %129 : f32 to vector<8x256xf32>
    %132 = arith.mulf %131, %130 : vector<8x256xf32>
    %133 = arith.addf %96, %132 : vector<8x256xf32>
    %c20 = arith.constant 20 : index
    %134 = memref.load %arg2[%c20] : memref<98xf32, #tpu.memory_space<smem>>
    %135 = vector.extract_strided_slice %103 {offsets = [0, 6], sizes = [8, 256], strides = [1, 1]} : vector<8x262xf32> to vector<8x256xf32>
    %136 = vector.broadcast %134 : f32 to vector<8x256xf32>
    %137 = arith.mulf %136, %135 : vector<8x256xf32>
    %138 = arith.addf %101, %137 : vector<8x256xf32>
    %c0_31 = arith.constant 0 : index
    %c0_32 = arith.constant 0 : index
    %c48 = arith.constant 48 : index
    %139 = vector.load %arg4[%c0_31, %c0_32, %c48] : memref<2x8x358xf32, #tpu.memory_space<vmem>>, vector<1x8x262xf32>
    %140 = vector.shape_cast %139 : vector<1x8x262xf32> to vector<8x262xf32>
    %c21 = arith.constant 21 : index
    %141 = memref.load %arg2[%c21] : memref<98xf32, #tpu.memory_space<smem>>
    %142 = vector.extract_strided_slice %140 {offsets = [0, 0], sizes = [8, 256], strides = [1, 1]} : vector<8x262xf32> to vector<8x256xf32>
    %143 = vector.broadcast %141 : f32 to vector<8x256xf32>
    %144 = arith.mulf %143, %142 : vector<8x256xf32>
    %145 = arith.addf %108, %144 : vector<8x256xf32>
    %c22 = arith.constant 22 : index
    %146 = memref.load %arg2[%c22] : memref<98xf32, #tpu.memory_space<smem>>
    %147 = vector.extract_strided_slice %140 {offsets = [0, 1], sizes = [8, 256], strides = [1, 1]} : vector<8x262xf32> to vector<8x256xf32>
    %148 = vector.broadcast %146 : f32 to vector<8x256xf32>
    %149 = arith.mulf %148, %147 : vector<8x256xf32>
    %150 = arith.addf %113, %149 : vector<8x256xf32>
    %c23 = arith.constant 23 : index
    %151 = memref.load %arg2[%c23] : memref<98xf32, #tpu.memory_space<smem>>
    %152 = vector.extract_strided_slice %140 {offsets = [0, 2], sizes = [8, 256], strides = [1, 1]} : vector<8x262xf32> to vector<8x256xf32>
    %153 = vector.broadcast %151 : f32 to vector<8x256xf32>
    %154 = arith.mulf %153, %152 : vector<8x256xf32>
    %155 = arith.addf %118, %154 : vector<8x256xf32>
    %c24 = arith.constant 24 : index
    %156 = memref.load %arg2[%c24] : memref<98xf32, #tpu.memory_space<smem>>
    %157 = vector.extract_strided_slice %140 {offsets = [0, 3], sizes = [8, 256], strides = [1, 1]} : vector<8x262xf32> to vector<8x256xf32>
    %158 = vector.broadcast %156 : f32 to vector<8x256xf32>
    %159 = arith.mulf %158, %157 : vector<8x256xf32>
    %160 = arith.addf %123, %159 : vector<8x256xf32>
    %c25 = arith.constant 25 : index
    %161 = memref.load %arg2[%c25] : memref<98xf32, #tpu.memory_space<smem>>
    %162 = vector.extract_strided_slice %140 {offsets = [0, 4], sizes = [8, 256], strides = [1, 1]} : vector<8x262xf32> to vector<8x256xf32>
    %163 = vector.broadcast %161 : f32 to vector<8x256xf32>
    %164 = arith.mulf %163, %162 : vector<8x256xf32>
    %165 = arith.addf %128, %164 : vector<8x256xf32>
    %c26 = arith.constant 26 : index
    %166 = memref.load %arg2[%c26] : memref<98xf32, #tpu.memory_space<smem>>
    %167 = vector.extract_strided_slice %140 {offsets = [0, 5], sizes = [8, 256], strides = [1, 1]} : vector<8x262xf32> to vector<8x256xf32>
    %168 = vector.broadcast %166 : f32 to vector<8x256xf32>
    %169 = arith.mulf %168, %167 : vector<8x256xf32>
    %170 = arith.addf %133, %169 : vector<8x256xf32>
    %c27 = arith.constant 27 : index
    %171 = memref.load %arg2[%c27] : memref<98xf32, #tpu.memory_space<smem>>
    %172 = vector.extract_strided_slice %140 {offsets = [0, 6], sizes = [8, 256], strides = [1, 1]} : vector<8x262xf32> to vector<8x256xf32>
    %173 = vector.broadcast %171 : f32 to vector<8x256xf32>
    %174 = arith.mulf %173, %172 : vector<8x256xf32>
    %175 = arith.addf %138, %174 : vector<8x256xf32>
    %c0_33 = arith.constant 0 : index
    %c0_34 = arith.constant 0 : index
    %c64 = arith.constant 64 : index
    %176 = vector.load %arg4[%c0_33, %c0_34, %c64] : memref<2x8x358xf32, #tpu.memory_space<vmem>>, vector<1x8x262xf32>
    %177 = vector.shape_cast %176 : vector<1x8x262xf32> to vector<8x262xf32>
    %c28 = arith.constant 28 : index
    %178 = memref.load %arg2[%c28] : memref<98xf32, #tpu.memory_space<smem>>
    %179 = vector.extract_strided_slice %177 {offsets = [0, 0], sizes = [8, 256], strides = [1, 1]} : vector<8x262xf32> to vector<8x256xf32>
    %180 = vector.broadcast %178 : f32 to vector<8x256xf32>
    %181 = arith.mulf %180, %179 : vector<8x256xf32>
    %182 = arith.addf %145, %181 : vector<8x256xf32>
    %c29 = arith.constant 29 : index
    %183 = memref.load %arg2[%c29] : memref<98xf32, #tpu.memory_space<smem>>
    %184 = vector.extract_strided_slice %177 {offsets = [0, 1], sizes = [8, 256], strides = [1, 1]} : vector<8x262xf32> to vector<8x256xf32>
    %185 = vector.broadcast %183 : f32 to vector<8x256xf32>
    %186 = arith.mulf %185, %184 : vector<8x256xf32>
    %187 = arith.addf %150, %186 : vector<8x256xf32>
    %c30 = arith.constant 30 : index
    %188 = memref.load %arg2[%c30] : memref<98xf32, #tpu.memory_space<smem>>
    %189 = vector.extract_strided_slice %177 {offsets = [0, 2], sizes = [8, 256], strides = [1, 1]} : vector<8x262xf32> to vector<8x256xf32>
    %190 = vector.broadcast %188 : f32 to vector<8x256xf32>
    %191 = arith.mulf %190, %189 : vector<8x256xf32>
    %192 = arith.addf %155, %191 : vector<8x256xf32>
    %c31 = arith.constant 31 : index
    %193 = memref.load %arg2[%c31] : memref<98xf32, #tpu.memory_space<smem>>
    %194 = vector.extract_strided_slice %177 {offsets = [0, 3], sizes = [8, 256], strides = [1, 1]} : vector<8x262xf32> to vector<8x256xf32>
    %195 = vector.broadcast %193 : f32 to vector<8x256xf32>
    %196 = arith.mulf %195, %194 : vector<8x256xf32>
    %197 = arith.addf %160, %196 : vector<8x256xf32>
    %c32_35 = arith.constant 32 : index
    %198 = memref.load %arg2[%c32_35] : memref<98xf32, #tpu.memory_space<smem>>
    %199 = vector.extract_strided_slice %177 {offsets = [0, 4], sizes = [8, 256], strides = [1, 1]} : vector<8x262xf32> to vector<8x256xf32>
    %200 = vector.broadcast %198 : f32 to vector<8x256xf32>
    %201 = arith.mulf %200, %199 : vector<8x256xf32>
    %202 = arith.addf %165, %201 : vector<8x256xf32>
    %c33 = arith.constant 33 : index
    %203 = memref.load %arg2[%c33] : memref<98xf32, #tpu.memory_space<smem>>
    %204 = vector.extract_strided_slice %177 {offsets = [0, 5], sizes = [8, 256], strides = [1, 1]} : vector<8x262xf32> to vector<8x256xf32>
    %205 = vector.broadcast %203 : f32 to vector<8x256xf32>
    %206 = arith.mulf %205, %204 : vector<8x256xf32>
    %207 = arith.addf %170, %206 : vector<8x256xf32>
    %c34 = arith.constant 34 : index
    %208 = memref.load %arg2[%c34] : memref<98xf32, #tpu.memory_space<smem>>
    %209 = vector.extract_strided_slice %177 {offsets = [0, 6], sizes = [8, 256], strides = [1, 1]} : vector<8x262xf32> to vector<8x256xf32>
    %210 = vector.broadcast %208 : f32 to vector<8x256xf32>
    %211 = arith.mulf %210, %209 : vector<8x256xf32>
    %212 = arith.addf %175, %211 : vector<8x256xf32>
    %c0_36 = arith.constant 0 : index
    %c0_37 = arith.constant 0 : index
    %c80 = arith.constant 80 : index
    %213 = vector.load %arg4[%c0_36, %c0_37, %c80] : memref<2x8x358xf32, #tpu.memory_space<vmem>>, vector<1x8x262xf32>
    %214 = vector.shape_cast %213 : vector<1x8x262xf32> to vector<8x262xf32>
    %c35 = arith.constant 35 : index
    %215 = memref.load %arg2[%c35] : memref<98xf32, #tpu.memory_space<smem>>
    %216 = vector.extract_strided_slice %214 {offsets = [0, 0], sizes = [8, 256], strides = [1, 1]} : vector<8x262xf32> to vector<8x256xf32>
    %217 = vector.broadcast %215 : f32 to vector<8x256xf32>
    %218 = arith.mulf %217, %216 : vector<8x256xf32>
    %219 = arith.addf %182, %218 : vector<8x256xf32>
    %c36 = arith.constant 36 : index
    %220 = memref.load %arg2[%c36] : memref<98xf32, #tpu.memory_space<smem>>
    %221 = vector.extract_strided_slice %214 {offsets = [0, 1], sizes = [8, 256], strides = [1, 1]} : vector<8x262xf32> to vector<8x256xf32>
    %222 = vector.broadcast %220 : f32 to vector<8x256xf32>
    %223 = arith.mulf %222, %221 : vector<8x256xf32>
    %224 = arith.addf %187, %223 : vector<8x256xf32>
    %c37 = arith.constant 37 : index
    %225 = memref.load %arg2[%c37] : memref<98xf32, #tpu.memory_space<smem>>
    %226 = vector.extract_strided_slice %214 {offsets = [0, 2], sizes = [8, 256], strides = [1, 1]} : vector<8x262xf32> to vector<8x256xf32>
    %227 = vector.broadcast %225 : f32 to vector<8x256xf32>
    %228 = arith.mulf %227, %226 : vector<8x256xf32>
    %229 = arith.addf %192, %228 : vector<8x256xf32>
    %c38 = arith.constant 38 : index
    %230 = memref.load %arg2[%c38] : memref<98xf32, #tpu.memory_space<smem>>
    %231 = vector.extract_strided_slice %214 {offsets = [0, 3], sizes = [8, 256], strides = [1, 1]} : vector<8x262xf32> to vector<8x256xf32>
    %232 = vector.broadcast %230 : f32 to vector<8x256xf32>
    %233 = arith.mulf %232, %231 : vector<8x256xf32>
    %234 = arith.addf %197, %233 : vector<8x256xf32>
    %c39 = arith.constant 39 : index
    %235 = memref.load %arg2[%c39] : memref<98xf32, #tpu.memory_space<smem>>
    %236 = vector.extract_strided_slice %214 {offsets = [0, 4], sizes = [8, 256], strides = [1, 1]} : vector<8x262xf32> to vector<8x256xf32>
    %237 = vector.broadcast %235 : f32 to vector<8x256xf32>
    %238 = arith.mulf %237, %236 : vector<8x256xf32>
    %239 = arith.addf %202, %238 : vector<8x256xf32>
    %c40 = arith.constant 40 : index
    %240 = memref.load %arg2[%c40] : memref<98xf32, #tpu.memory_space<smem>>
    %241 = vector.extract_strided_slice %214 {offsets = [0, 5], sizes = [8, 256], strides = [1, 1]} : vector<8x262xf32> to vector<8x256xf32>
    %242 = vector.broadcast %240 : f32 to vector<8x256xf32>
    %243 = arith.mulf %242, %241 : vector<8x256xf32>
    %244 = arith.addf %207, %243 : vector<8x256xf32>
    %c41 = arith.constant 41 : index
    %245 = memref.load %arg2[%c41] : memref<98xf32, #tpu.memory_space<smem>>
    %246 = vector.extract_strided_slice %214 {offsets = [0, 6], sizes = [8, 256], strides = [1, 1]} : vector<8x262xf32> to vector<8x256xf32>
    %247 = vector.broadcast %245 : f32 to vector<8x256xf32>
    %248 = arith.mulf %247, %246 : vector<8x256xf32>
    %249 = arith.addf %212, %248 : vector<8x256xf32>
    %c0_38 = arith.constant 0 : index
    %c0_39 = arith.constant 0 : index
    %c96 = arith.constant 96 : index
    %250 = vector.load %arg4[%c0_38, %c0_39, %c96] : memref<2x8x358xf32, #tpu.memory_space<vmem>>, vector<1x8x262xf32>
    %251 = vector.shape_cast %250 : vector<1x8x262xf32> to vector<8x262xf32>
    %c42 = arith.constant 42 : index
    %252 = memref.load %arg2[%c42] : memref<98xf32, #tpu.memory_space<smem>>
    %253 = vector.extract_strided_slice %251 {offsets = [0, 0], sizes = [8, 256], strides = [1, 1]} : vector<8x262xf32> to vector<8x256xf32>
    %254 = vector.broadcast %252 : f32 to vector<8x256xf32>
    %255 = arith.mulf %254, %253 : vector<8x256xf32>
    %256 = arith.addf %219, %255 : vector<8x256xf32>
    %c43 = arith.constant 43 : index
    %257 = memref.load %arg2[%c43] : memref<98xf32, #tpu.memory_space<smem>>
    %258 = vector.extract_strided_slice %251 {offsets = [0, 1], sizes = [8, 256], strides = [1, 1]} : vector<8x262xf32> to vector<8x256xf32>
    %259 = vector.broadcast %257 : f32 to vector<8x256xf32>
    %260 = arith.mulf %259, %258 : vector<8x256xf32>
    %261 = arith.addf %224, %260 : vector<8x256xf32>
    %c44 = arith.constant 44 : index
    %262 = memref.load %arg2[%c44] : memref<98xf32, #tpu.memory_space<smem>>
    %263 = vector.extract_strided_slice %251 {offsets = [0, 2], sizes = [8, 256], strides = [1, 1]} : vector<8x262xf32> to vector<8x256xf32>
    %264 = vector.broadcast %262 : f32 to vector<8x256xf32>
    %265 = arith.mulf %264, %263 : vector<8x256xf32>
    %266 = arith.addf %229, %265 : vector<8x256xf32>
    %c45 = arith.constant 45 : index
    %267 = memref.load %arg2[%c45] : memref<98xf32, #tpu.memory_space<smem>>
    %268 = vector.extract_strided_slice %251 {offsets = [0, 3], sizes = [8, 256], strides = [1, 1]} : vector<8x262xf32> to vector<8x256xf32>
    %269 = vector.broadcast %267 : f32 to vector<8x256xf32>
    %270 = arith.mulf %269, %268 : vector<8x256xf32>
    %271 = arith.addf %234, %270 : vector<8x256xf32>
    %c46 = arith.constant 46 : index
    %272 = memref.load %arg2[%c46] : memref<98xf32, #tpu.memory_space<smem>>
    %273 = vector.extract_strided_slice %251 {offsets = [0, 4], sizes = [8, 256], strides = [1, 1]} : vector<8x262xf32> to vector<8x256xf32>
    %274 = vector.broadcast %272 : f32 to vector<8x256xf32>
    %275 = arith.mulf %274, %273 : vector<8x256xf32>
    %276 = arith.addf %239, %275 : vector<8x256xf32>
    %c47 = arith.constant 47 : index
    %277 = memref.load %arg2[%c47] : memref<98xf32, #tpu.memory_space<smem>>
    %278 = vector.extract_strided_slice %251 {offsets = [0, 5], sizes = [8, 256], strides = [1, 1]} : vector<8x262xf32> to vector<8x256xf32>
    %279 = vector.broadcast %277 : f32 to vector<8x256xf32>
    %280 = arith.mulf %279, %278 : vector<8x256xf32>
    %281 = arith.addf %244, %280 : vector<8x256xf32>
    %c48_40 = arith.constant 48 : index
    %282 = memref.load %arg2[%c48_40] : memref<98xf32, #tpu.memory_space<smem>>
    %283 = vector.extract_strided_slice %251 {offsets = [0, 6], sizes = [8, 256], strides = [1, 1]} : vector<8x262xf32> to vector<8x256xf32>
    %284 = vector.broadcast %282 : f32 to vector<8x256xf32>
    %285 = arith.mulf %284, %283 : vector<8x256xf32>
    %286 = arith.addf %249, %285 : vector<8x256xf32>
    %c1_41 = arith.constant 1 : index
    %c0_42 = arith.constant 0 : index
    %c0_43 = arith.constant 0 : index
    %287 = vector.load %arg4[%c1_41, %c0_42, %c0_43] : memref<2x8x358xf32, #tpu.memory_space<vmem>>, vector<1x8x262xf32>
    %288 = vector.shape_cast %287 : vector<1x8x262xf32> to vector<8x262xf32>
    %c49 = arith.constant 49 : index
    %289 = memref.load %arg2[%c49] : memref<98xf32, #tpu.memory_space<smem>>
    %290 = vector.extract_strided_slice %288 {offsets = [0, 0], sizes = [8, 256], strides = [1, 1]} : vector<8x262xf32> to vector<8x256xf32>
    %291 = vector.broadcast %289 : f32 to vector<8x256xf32>
    %292 = arith.mulf %291, %290 : vector<8x256xf32>
    %293 = arith.addf %256, %292 : vector<8x256xf32>
    %c50 = arith.constant 50 : index
    %294 = memref.load %arg2[%c50] : memref<98xf32, #tpu.memory_space<smem>>
    %295 = vector.extract_strided_slice %288 {offsets = [0, 1], sizes = [8, 256], strides = [1, 1]} : vector<8x262xf32> to vector<8x256xf32>
    %296 = vector.broadcast %294 : f32 to vector<8x256xf32>
    %297 = arith.mulf %296, %295 : vector<8x256xf32>
    %298 = arith.addf %261, %297 : vector<8x256xf32>
    %c51_44 = arith.constant 51 : index
    %299 = memref.load %arg2[%c51_44] : memref<98xf32, #tpu.memory_space<smem>>
    %300 = vector.extract_strided_slice %288 {offsets = [0, 2], sizes = [8, 256], strides = [1, 1]} : vector<8x262xf32> to vector<8x256xf32>
    %301 = vector.broadcast %299 : f32 to vector<8x256xf32>
    %302 = arith.mulf %301, %300 : vector<8x256xf32>
    %303 = arith.addf %266, %302 : vector<8x256xf32>
    %c52 = arith.constant 52 : index
    %304 = memref.load %arg2[%c52] : memref<98xf32, #tpu.memory_space<smem>>
    %305 = vector.extract_strided_slice %288 {offsets = [0, 3], sizes = [8, 256], strides = [1, 1]} : vector<8x262xf32> to vector<8x256xf32>
    %306 = vector.broadcast %304 : f32 to vector<8x256xf32>
    %307 = arith.mulf %306, %305 : vector<8x256xf32>
    %308 = arith.addf %271, %307 : vector<8x256xf32>
    %c53 = arith.constant 53 : index
    %309 = memref.load %arg2[%c53] : memref<98xf32, #tpu.memory_space<smem>>
    %310 = vector.extract_strided_slice %288 {offsets = [0, 4], sizes = [8, 256], strides = [1, 1]} : vector<8x262xf32> to vector<8x256xf32>
    %311 = vector.broadcast %309 : f32 to vector<8x256xf32>
    %312 = arith.mulf %311, %310 : vector<8x256xf32>
    %313 = arith.addf %276, %312 : vector<8x256xf32>
    %c54 = arith.constant 54 : index
    %314 = memref.load %arg2[%c54] : memref<98xf32, #tpu.memory_space<smem>>
    %315 = vector.extract_strided_slice %288 {offsets = [0, 5], sizes = [8, 256], strides = [1, 1]} : vector<8x262xf32> to vector<8x256xf32>
    %316 = vector.broadcast %314 : f32 to vector<8x256xf32>
    %317 = arith.mulf %316, %315 : vector<8x256xf32>
    %318 = arith.addf %281, %317 : vector<8x256xf32>
    %c55 = arith.constant 55 : index
    %319 = memref.load %arg2[%c55] : memref<98xf32, #tpu.memory_space<smem>>
    %320 = vector.extract_strided_slice %288 {offsets = [0, 6], sizes = [8, 256], strides = [1, 1]} : vector<8x262xf32> to vector<8x256xf32>
    %321 = vector.broadcast %319 : f32 to vector<8x256xf32>
    %322 = arith.mulf %321, %320 : vector<8x256xf32>
    %323 = arith.addf %286, %322 : vector<8x256xf32>
    %c1_45 = arith.constant 1 : index
    %c0_46 = arith.constant 0 : index
    %c16_47 = arith.constant 16 : index
    %324 = vector.load %arg4[%c1_45, %c0_46, %c16_47] : memref<2x8x358xf32, #tpu.memory_space<vmem>>, vector<1x8x262xf32>
    %325 = vector.shape_cast %324 : vector<1x8x262xf32> to vector<8x262xf32>
    %c56 = arith.constant 56 : index
    %326 = memref.load %arg2[%c56] : memref<98xf32, #tpu.memory_space<smem>>
    %327 = vector.extract_strided_slice %325 {offsets = [0, 0], sizes = [8, 256], strides = [1, 1]} : vector<8x262xf32> to vector<8x256xf32>
    %328 = vector.broadcast %326 : f32 to vector<8x256xf32>
    %329 = arith.mulf %328, %327 : vector<8x256xf32>
    %330 = arith.addf %293, %329 : vector<8x256xf32>
    %c57 = arith.constant 57 : index
    %331 = memref.load %arg2[%c57] : memref<98xf32, #tpu.memory_space<smem>>
    %332 = vector.extract_strided_slice %325 {offsets = [0, 1], sizes = [8, 256], strides = [1, 1]} : vector<8x262xf32> to vector<8x256xf32>
    %333 = vector.broadcast %331 : f32 to vector<8x256xf32>
    %334 = arith.mulf %333, %332 : vector<8x256xf32>
    %335 = arith.addf %298, %334 : vector<8x256xf32>
    %c58 = arith.constant 58 : index
    %336 = memref.load %arg2[%c58] : memref<98xf32, #tpu.memory_space<smem>>
    %337 = vector.extract_strided_slice %325 {offsets = [0, 2], sizes = [8, 256], strides = [1, 1]} : vector<8x262xf32> to vector<8x256xf32>
    %338 = vector.broadcast %336 : f32 to vector<8x256xf32>
    %339 = arith.mulf %338, %337 : vector<8x256xf32>
    %340 = arith.addf %303, %339 : vector<8x256xf32>
    %c59 = arith.constant 59 : index
    %341 = memref.load %arg2[%c59] : memref<98xf32, #tpu.memory_space<smem>>
    %342 = vector.extract_strided_slice %325 {offsets = [0, 3], sizes = [8, 256], strides = [1, 1]} : vector<8x262xf32> to vector<8x256xf32>
    %343 = vector.broadcast %341 : f32 to vector<8x256xf32>
    %344 = arith.mulf %343, %342 : vector<8x256xf32>
    %345 = arith.addf %308, %344 : vector<8x256xf32>
    %c60 = arith.constant 60 : index
    %346 = memref.load %arg2[%c60] : memref<98xf32, #tpu.memory_space<smem>>
    %347 = vector.extract_strided_slice %325 {offsets = [0, 4], sizes = [8, 256], strides = [1, 1]} : vector<8x262xf32> to vector<8x256xf32>
    %348 = vector.broadcast %346 : f32 to vector<8x256xf32>
    %349 = arith.mulf %348, %347 : vector<8x256xf32>
    %350 = arith.addf %313, %349 : vector<8x256xf32>
    %c61 = arith.constant 61 : index
    %351 = memref.load %arg2[%c61] : memref<98xf32, #tpu.memory_space<smem>>
    %352 = vector.extract_strided_slice %325 {offsets = [0, 5], sizes = [8, 256], strides = [1, 1]} : vector<8x262xf32> to vector<8x256xf32>
    %353 = vector.broadcast %351 : f32 to vector<8x256xf32>
    %354 = arith.mulf %353, %352 : vector<8x256xf32>
    %355 = arith.addf %318, %354 : vector<8x256xf32>
    %c62 = arith.constant 62 : index
    %356 = memref.load %arg2[%c62] : memref<98xf32, #tpu.memory_space<smem>>
    %357 = vector.extract_strided_slice %325 {offsets = [0, 6], sizes = [8, 256], strides = [1, 1]} : vector<8x262xf32> to vector<8x256xf32>
    %358 = vector.broadcast %356 : f32 to vector<8x256xf32>
    %359 = arith.mulf %358, %357 : vector<8x256xf32>
    %360 = arith.addf %323, %359 : vector<8x256xf32>
    %c1_48 = arith.constant 1 : index
    %c0_49 = arith.constant 0 : index
    %c32_50 = arith.constant 32 : index
    %361 = vector.load %arg4[%c1_48, %c0_49, %c32_50] : memref<2x8x358xf32, #tpu.memory_space<vmem>>, vector<1x8x262xf32>
    %362 = vector.shape_cast %361 : vector<1x8x262xf32> to vector<8x262xf32>
    %c63 = arith.constant 63 : index
    %363 = memref.load %arg2[%c63] : memref<98xf32, #tpu.memory_space<smem>>
    %364 = vector.extract_strided_slice %362 {offsets = [0, 0], sizes = [8, 256], strides = [1, 1]} : vector<8x262xf32> to vector<8x256xf32>
    %365 = vector.broadcast %363 : f32 to vector<8x256xf32>
    %366 = arith.mulf %365, %364 : vector<8x256xf32>
    %367 = arith.addf %330, %366 : vector<8x256xf32>
    %c64_51 = arith.constant 64 : index
    %368 = memref.load %arg2[%c64_51] : memref<98xf32, #tpu.memory_space<smem>>
    %369 = vector.extract_strided_slice %362 {offsets = [0, 1], sizes = [8, 256], strides = [1, 1]} : vector<8x262xf32> to vector<8x256xf32>
    %370 = vector.broadcast %368 : f32 to vector<8x256xf32>
    %371 = arith.mulf %370, %369 : vector<8x256xf32>
    %372 = arith.addf %335, %371 : vector<8x256xf32>
    %c65 = arith.constant 65 : index
    %373 = memref.load %arg2[%c65] : memref<98xf32, #tpu.memory_space<smem>>
    %374 = vector.extract_strided_slice %362 {offsets = [0, 2], sizes = [8, 256], strides = [1, 1]} : vector<8x262xf32> to vector<8x256xf32>
    %375 = vector.broadcast %373 : f32 to vector<8x256xf32>
    %376 = arith.mulf %375, %374 : vector<8x256xf32>
    %377 = arith.addf %340, %376 : vector<8x256xf32>
    %c66 = arith.constant 66 : index
    %378 = memref.load %arg2[%c66] : memref<98xf32, #tpu.memory_space<smem>>
    %379 = vector.extract_strided_slice %362 {offsets = [0, 3], sizes = [8, 256], strides = [1, 1]} : vector<8x262xf32> to vector<8x256xf32>
    %380 = vector.broadcast %378 : f32 to vector<8x256xf32>
    %381 = arith.mulf %380, %379 : vector<8x256xf32>
    %382 = arith.addf %345, %381 : vector<8x256xf32>
    %c67 = arith.constant 67 : index
    %383 = memref.load %arg2[%c67] : memref<98xf32, #tpu.memory_space<smem>>
    %384 = vector.extract_strided_slice %362 {offsets = [0, 4], sizes = [8, 256], strides = [1, 1]} : vector<8x262xf32> to vector<8x256xf32>
    %385 = vector.broadcast %383 : f32 to vector<8x256xf32>
    %386 = arith.mulf %385, %384 : vector<8x256xf32>
    %387 = arith.addf %350, %386 : vector<8x256xf32>
    %c68 = arith.constant 68 : index
    %388 = memref.load %arg2[%c68] : memref<98xf32, #tpu.memory_space<smem>>
    %389 = vector.extract_strided_slice %362 {offsets = [0, 5], sizes = [8, 256], strides = [1, 1]} : vector<8x262xf32> to vector<8x256xf32>
    %390 = vector.broadcast %388 : f32 to vector<8x256xf32>
    %391 = arith.mulf %390, %389 : vector<8x256xf32>
    %392 = arith.addf %355, %391 : vector<8x256xf32>
    %c69 = arith.constant 69 : index
    %393 = memref.load %arg2[%c69] : memref<98xf32, #tpu.memory_space<smem>>
    %394 = vector.extract_strided_slice %362 {offsets = [0, 6], sizes = [8, 256], strides = [1, 1]} : vector<8x262xf32> to vector<8x256xf32>
    %395 = vector.broadcast %393 : f32 to vector<8x256xf32>
    %396 = arith.mulf %395, %394 : vector<8x256xf32>
    %397 = arith.addf %360, %396 : vector<8x256xf32>
    %c1_52 = arith.constant 1 : index
    %c0_53 = arith.constant 0 : index
    %c48_54 = arith.constant 48 : index
    %398 = vector.load %arg4[%c1_52, %c0_53, %c48_54] : memref<2x8x358xf32, #tpu.memory_space<vmem>>, vector<1x8x262xf32>
    %399 = vector.shape_cast %398 : vector<1x8x262xf32> to vector<8x262xf32>
    %c70 = arith.constant 70 : index
    %400 = memref.load %arg2[%c70] : memref<98xf32, #tpu.memory_space<smem>>
    %401 = vector.extract_strided_slice %399 {offsets = [0, 0], sizes = [8, 256], strides = [1, 1]} : vector<8x262xf32> to vector<8x256xf32>
    %402 = vector.broadcast %400 : f32 to vector<8x256xf32>
    %403 = arith.mulf %402, %401 : vector<8x256xf32>
    %404 = arith.addf %367, %403 : vector<8x256xf32>
    %c71 = arith.constant 71 : index
    %405 = memref.load %arg2[%c71] : memref<98xf32, #tpu.memory_space<smem>>
    %406 = vector.extract_strided_slice %399 {offsets = [0, 1], sizes = [8, 256], strides = [1, 1]} : vector<8x262xf32> to vector<8x256xf32>
    %407 = vector.broadcast %405 : f32 to vector<8x256xf32>
    %408 = arith.mulf %407, %406 : vector<8x256xf32>
    %409 = arith.addf %372, %408 : vector<8x256xf32>
    %c72 = arith.constant 72 : index
    %410 = memref.load %arg2[%c72] : memref<98xf32, #tpu.memory_space<smem>>
    %411 = vector.extract_strided_slice %399 {offsets = [0, 2], sizes = [8, 256], strides = [1, 1]} : vector<8x262xf32> to vector<8x256xf32>
    %412 = vector.broadcast %410 : f32 to vector<8x256xf32>
    %413 = arith.mulf %412, %411 : vector<8x256xf32>
    %414 = arith.addf %377, %413 : vector<8x256xf32>
    %c73 = arith.constant 73 : index
    %415 = memref.load %arg2[%c73] : memref<98xf32, #tpu.memory_space<smem>>
    %416 = vector.extract_strided_slice %399 {offsets = [0, 3], sizes = [8, 256], strides = [1, 1]} : vector<8x262xf32> to vector<8x256xf32>
    %417 = vector.broadcast %415 : f32 to vector<8x256xf32>
    %418 = arith.mulf %417, %416 : vector<8x256xf32>
    %419 = arith.addf %382, %418 : vector<8x256xf32>
    %c74 = arith.constant 74 : index
    %420 = memref.load %arg2[%c74] : memref<98xf32, #tpu.memory_space<smem>>
    %421 = vector.extract_strided_slice %399 {offsets = [0, 4], sizes = [8, 256], strides = [1, 1]} : vector<8x262xf32> to vector<8x256xf32>
    %422 = vector.broadcast %420 : f32 to vector<8x256xf32>
    %423 = arith.mulf %422, %421 : vector<8x256xf32>
    %424 = arith.addf %387, %423 : vector<8x256xf32>
    %c75 = arith.constant 75 : index
    %425 = memref.load %arg2[%c75] : memref<98xf32, #tpu.memory_space<smem>>
    %426 = vector.extract_strided_slice %399 {offsets = [0, 5], sizes = [8, 256], strides = [1, 1]} : vector<8x262xf32> to vector<8x256xf32>
    %427 = vector.broadcast %425 : f32 to vector<8x256xf32>
    %428 = arith.mulf %427, %426 : vector<8x256xf32>
    %429 = arith.addf %392, %428 : vector<8x256xf32>
    %c76 = arith.constant 76 : index
    %430 = memref.load %arg2[%c76] : memref<98xf32, #tpu.memory_space<smem>>
    %431 = vector.extract_strided_slice %399 {offsets = [0, 6], sizes = [8, 256], strides = [1, 1]} : vector<8x262xf32> to vector<8x256xf32>
    %432 = vector.broadcast %430 : f32 to vector<8x256xf32>
    %433 = arith.mulf %432, %431 : vector<8x256xf32>
    %434 = arith.addf %397, %433 : vector<8x256xf32>
    %c1_55 = arith.constant 1 : index
    %c0_56 = arith.constant 0 : index
    %c64_57 = arith.constant 64 : index
    %435 = vector.load %arg4[%c1_55, %c0_56, %c64_57] : memref<2x8x358xf32, #tpu.memory_space<vmem>>, vector<1x8x262xf32>
    %436 = vector.shape_cast %435 : vector<1x8x262xf32> to vector<8x262xf32>
    %c77 = arith.constant 77 : index
    %437 = memref.load %arg2[%c77] : memref<98xf32, #tpu.memory_space<smem>>
    %438 = vector.extract_strided_slice %436 {offsets = [0, 0], sizes = [8, 256], strides = [1, 1]} : vector<8x262xf32> to vector<8x256xf32>
    %439 = vector.broadcast %437 : f32 to vector<8x256xf32>
    %440 = arith.mulf %439, %438 : vector<8x256xf32>
    %441 = arith.addf %404, %440 : vector<8x256xf32>
    %c78 = arith.constant 78 : index
    %442 = memref.load %arg2[%c78] : memref<98xf32, #tpu.memory_space<smem>>
    %443 = vector.extract_strided_slice %436 {offsets = [0, 1], sizes = [8, 256], strides = [1, 1]} : vector<8x262xf32> to vector<8x256xf32>
    %444 = vector.broadcast %442 : f32 to vector<8x256xf32>
    %445 = arith.mulf %444, %443 : vector<8x256xf32>
    %446 = arith.addf %409, %445 : vector<8x256xf32>
    %c79 = arith.constant 79 : index
    %447 = memref.load %arg2[%c79] : memref<98xf32, #tpu.memory_space<smem>>
    %448 = vector.extract_strided_slice %436 {offsets = [0, 2], sizes = [8, 256], strides = [1, 1]} : vector<8x262xf32> to vector<8x256xf32>
    %449 = vector.broadcast %447 : f32 to vector<8x256xf32>
    %450 = arith.mulf %449, %448 : vector<8x256xf32>
    %451 = arith.addf %414, %450 : vector<8x256xf32>
    %c80_58 = arith.constant 80 : index
    %452 = memref.load %arg2[%c80_58] : memref<98xf32, #tpu.memory_space<smem>>
    %453 = vector.extract_strided_slice %436 {offsets = [0, 3], sizes = [8, 256], strides = [1, 1]} : vector<8x262xf32> to vector<8x256xf32>
    %454 = vector.broadcast %452 : f32 to vector<8x256xf32>
    %455 = arith.mulf %454, %453 : vector<8x256xf32>
    %456 = arith.addf %419, %455 : vector<8x256xf32>
    %c81 = arith.constant 81 : index
    %457 = memref.load %arg2[%c81] : memref<98xf32, #tpu.memory_space<smem>>
    %458 = vector.extract_strided_slice %436 {offsets = [0, 4], sizes = [8, 256], strides = [1, 1]} : vector<8x262xf32> to vector<8x256xf32>
    %459 = vector.broadcast %457 : f32 to vector<8x256xf32>
    %460 = arith.mulf %459, %458 : vector<8x256xf32>
    %461 = arith.addf %424, %460 : vector<8x256xf32>
    %c82 = arith.constant 82 : index
    %462 = memref.load %arg2[%c82] : memref<98xf32, #tpu.memory_space<smem>>
    %463 = vector.extract_strided_slice %436 {offsets = [0, 5], sizes = [8, 256], strides = [1, 1]} : vector<8x262xf32> to vector<8x256xf32>
    %464 = vector.broadcast %462 : f32 to vector<8x256xf32>
    %465 = arith.mulf %464, %463 : vector<8x256xf32>
    %466 = arith.addf %429, %465 : vector<8x256xf32>
    %c83 = arith.constant 83 : index
    %467 = memref.load %arg2[%c83] : memref<98xf32, #tpu.memory_space<smem>>
    %468 = vector.extract_strided_slice %436 {offsets = [0, 6], sizes = [8, 256], strides = [1, 1]} : vector<8x262xf32> to vector<8x256xf32>
    %469 = vector.broadcast %467 : f32 to vector<8x256xf32>
    %470 = arith.mulf %469, %468 : vector<8x256xf32>
    %471 = arith.addf %434, %470 : vector<8x256xf32>
    %c1_59 = arith.constant 1 : index
    %c0_60 = arith.constant 0 : index
    %c80_61 = arith.constant 80 : index
    %472 = vector.load %arg4[%c1_59, %c0_60, %c80_61] : memref<2x8x358xf32, #tpu.memory_space<vmem>>, vector<1x8x262xf32>
    %473 = vector.shape_cast %472 : vector<1x8x262xf32> to vector<8x262xf32>
    %c84 = arith.constant 84 : index
    %474 = memref.load %arg2[%c84] : memref<98xf32, #tpu.memory_space<smem>>
    %475 = vector.extract_strided_slice %473 {offsets = [0, 0], sizes = [8, 256], strides = [1, 1]} : vector<8x262xf32> to vector<8x256xf32>
    %476 = vector.broadcast %474 : f32 to vector<8x256xf32>
    %477 = arith.mulf %476, %475 : vector<8x256xf32>
    %478 = arith.addf %441, %477 : vector<8x256xf32>
    %c85 = arith.constant 85 : index
    %479 = memref.load %arg2[%c85] : memref<98xf32, #tpu.memory_space<smem>>
    %480 = vector.extract_strided_slice %473 {offsets = [0, 1], sizes = [8, 256], strides = [1, 1]} : vector<8x262xf32> to vector<8x256xf32>
    %481 = vector.broadcast %479 : f32 to vector<8x256xf32>
    %482 = arith.mulf %481, %480 : vector<8x256xf32>
    %483 = arith.addf %446, %482 : vector<8x256xf32>
    %c86 = arith.constant 86 : index
    %484 = memref.load %arg2[%c86] : memref<98xf32, #tpu.memory_space<smem>>
    %485 = vector.extract_strided_slice %473 {offsets = [0, 2], sizes = [8, 256], strides = [1, 1]} : vector<8x262xf32> to vector<8x256xf32>
    %486 = vector.broadcast %484 : f32 to vector<8x256xf32>
    %487 = arith.mulf %486, %485 : vector<8x256xf32>
    %488 = arith.addf %451, %487 : vector<8x256xf32>
    %c87 = arith.constant 87 : index
    %489 = memref.load %arg2[%c87] : memref<98xf32, #tpu.memory_space<smem>>
    %490 = vector.extract_strided_slice %473 {offsets = [0, 3], sizes = [8, 256], strides = [1, 1]} : vector<8x262xf32> to vector<8x256xf32>
    %491 = vector.broadcast %489 : f32 to vector<8x256xf32>
    %492 = arith.mulf %491, %490 : vector<8x256xf32>
    %493 = arith.addf %456, %492 : vector<8x256xf32>
    %c88 = arith.constant 88 : index
    %494 = memref.load %arg2[%c88] : memref<98xf32, #tpu.memory_space<smem>>
    %495 = vector.extract_strided_slice %473 {offsets = [0, 4], sizes = [8, 256], strides = [1, 1]} : vector<8x262xf32> to vector<8x256xf32>
    %496 = vector.broadcast %494 : f32 to vector<8x256xf32>
    %497 = arith.mulf %496, %495 : vector<8x256xf32>
    %498 = arith.addf %461, %497 : vector<8x256xf32>
    %c89 = arith.constant 89 : index
    %499 = memref.load %arg2[%c89] : memref<98xf32, #tpu.memory_space<smem>>
    %500 = vector.extract_strided_slice %473 {offsets = [0, 5], sizes = [8, 256], strides = [1, 1]} : vector<8x262xf32> to vector<8x256xf32>
    %501 = vector.broadcast %499 : f32 to vector<8x256xf32>
    %502 = arith.mulf %501, %500 : vector<8x256xf32>
    %503 = arith.addf %466, %502 : vector<8x256xf32>
    %c90 = arith.constant 90 : index
    %504 = memref.load %arg2[%c90] : memref<98xf32, #tpu.memory_space<smem>>
    %505 = vector.extract_strided_slice %473 {offsets = [0, 6], sizes = [8, 256], strides = [1, 1]} : vector<8x262xf32> to vector<8x256xf32>
    %506 = vector.broadcast %504 : f32 to vector<8x256xf32>
    %507 = arith.mulf %506, %505 : vector<8x256xf32>
    %508 = arith.addf %471, %507 : vector<8x256xf32>
    %c1_62 = arith.constant 1 : index
    %c0_63 = arith.constant 0 : index
    %c96_64 = arith.constant 96 : index
    %509 = vector.load %arg4[%c1_62, %c0_63, %c96_64] : memref<2x8x358xf32, #tpu.memory_space<vmem>>, vector<1x8x262xf32>
    %510 = vector.shape_cast %509 : vector<1x8x262xf32> to vector<8x262xf32>
    %c91 = arith.constant 91 : index
    %511 = memref.load %arg2[%c91] : memref<98xf32, #tpu.memory_space<smem>>
    %512 = vector.extract_strided_slice %510 {offsets = [0, 0], sizes = [8, 256], strides = [1, 1]} : vector<8x262xf32> to vector<8x256xf32>
    %513 = vector.broadcast %511 : f32 to vector<8x256xf32>
    %514 = arith.mulf %513, %512 : vector<8x256xf32>
    %515 = arith.addf %478, %514 : vector<8x256xf32>
    %c92 = arith.constant 92 : index
    %516 = memref.load %arg2[%c92] : memref<98xf32, #tpu.memory_space<smem>>
    %517 = vector.extract_strided_slice %510 {offsets = [0, 1], sizes = [8, 256], strides = [1, 1]} : vector<8x262xf32> to vector<8x256xf32>
    %518 = vector.broadcast %516 : f32 to vector<8x256xf32>
    %519 = arith.mulf %518, %517 : vector<8x256xf32>
    %520 = arith.addf %483, %519 : vector<8x256xf32>
    %c93 = arith.constant 93 : index
    %521 = memref.load %arg2[%c93] : memref<98xf32, #tpu.memory_space<smem>>
    %522 = vector.extract_strided_slice %510 {offsets = [0, 2], sizes = [8, 256], strides = [1, 1]} : vector<8x262xf32> to vector<8x256xf32>
    %523 = vector.broadcast %521 : f32 to vector<8x256xf32>
    %524 = arith.mulf %523, %522 : vector<8x256xf32>
    %525 = arith.addf %488, %524 : vector<8x256xf32>
    %c94 = arith.constant 94 : index
    %526 = memref.load %arg2[%c94] : memref<98xf32, #tpu.memory_space<smem>>
    %527 = vector.extract_strided_slice %510 {offsets = [0, 3], sizes = [8, 256], strides = [1, 1]} : vector<8x262xf32> to vector<8x256xf32>
    %528 = vector.broadcast %526 : f32 to vector<8x256xf32>
    %529 = arith.mulf %528, %527 : vector<8x256xf32>
    %530 = arith.addf %493, %529 : vector<8x256xf32>
    %c95 = arith.constant 95 : index
    %531 = memref.load %arg2[%c95] : memref<98xf32, #tpu.memory_space<smem>>
    %532 = vector.extract_strided_slice %510 {offsets = [0, 4], sizes = [8, 256], strides = [1, 1]} : vector<8x262xf32> to vector<8x256xf32>
    %533 = vector.broadcast %531 : f32 to vector<8x256xf32>
    %534 = arith.mulf %533, %532 : vector<8x256xf32>
    %535 = arith.addf %498, %534 : vector<8x256xf32>
    %c96_65 = arith.constant 96 : index
    %536 = memref.load %arg2[%c96_65] : memref<98xf32, #tpu.memory_space<smem>>
    %537 = vector.extract_strided_slice %510 {offsets = [0, 5], sizes = [8, 256], strides = [1, 1]} : vector<8x262xf32> to vector<8x256xf32>
    %538 = vector.broadcast %536 : f32 to vector<8x256xf32>
    %539 = arith.mulf %538, %537 : vector<8x256xf32>
    %540 = arith.addf %503, %539 : vector<8x256xf32>
    %c97 = arith.constant 97 : index
    %541 = memref.load %arg2[%c97] : memref<98xf32, #tpu.memory_space<smem>>
    %542 = vector.extract_strided_slice %510 {offsets = [0, 6], sizes = [8, 256], strides = [1, 1]} : vector<8x262xf32> to vector<8x256xf32>
    %543 = vector.broadcast %541 : f32 to vector<8x256xf32>
    %544 = arith.mulf %543, %542 : vector<8x256xf32>
    %545 = arith.addf %508, %544 : vector<8x256xf32>
    %546 = tpu.iota {dimensions = array<i32: 1>} : vector<8x256xi32>
    %c16_i32 = arith.constant 16 : i32
    %c0_i32 = arith.constant 0 : i32
    %547 = arith.cmpi eq, %c16_i32, %c0_i32 : i32
    %c1_i32 = arith.constant 1 : i32
    %548 = arith.select %547, %c1_i32, %c16_i32 : i32
    %549 = vector.broadcast %548 : i32 to vector<8x256xi32>
    %550 = arith.remsi %546, %549 : vector<8x256xi32>
    %c0_i32_66 = arith.constant 0 : i32
    %551 = vector.broadcast %c0_i32_66 : i32 to vector<8x256xi32>
    %552 = arith.cmpi ne, %550, %551 : vector<8x256xi32>
    %c0_i32_67 = arith.constant 0 : i32
    %553 = vector.broadcast %c0_i32_67 : i32 to vector<8x256xi32>
    %554 = arith.cmpi slt, %550, %553 : vector<8x256xi32>
    %c0_i32_68 = arith.constant 0 : i32
    %555 = arith.cmpi slt, %548, %c0_i32_68 : i32
    %556 = vector.broadcast %555 : i1 to vector<8x256xi1>
    %557 = vector.broadcast %556 : vector<8x256xi1> to vector<8x256xi1>
    %558 = arith.xori %554, %557 : vector<8x256xi1>
    %559 = arith.andi %558, %552 : vector<8x256xi1>
    %560 = vector.broadcast %548 : i32 to vector<8x256xi32>
    %561 = arith.addi %550, %560 : vector<8x256xi32>
    %562 = arith.select %559, %561, %550 : vector<8x256xi1>, vector<8x256xi32>
    %c-3_i32 = arith.constant -3 : i32
    %563 = vector.broadcast %c-3_i32 : i32 to vector<8x256xi32>
    %564 = arith.addi %562, %563 : vector<8x256xi32>
    %c0_i32_69 = arith.constant 0 : i32
    %565 = vector.broadcast %c0_i32_69 : i32 to vector<8x256xi32>
    %566 = arith.cmpi sge, %564, %565 : vector<8x256xi32>
    %c-3_i32_70 = arith.constant -3 : i32
    %567 = vector.broadcast %c-3_i32_70 : i32 to vector<8x256xi32>
    %568 = arith.addi %562, %567 : vector<8x256xi32>
    %c16_i32_71 = arith.constant 16 : i32
    %569 = vector.broadcast %c16_i32_71 : i32 to vector<8x256xi32>
    %570 = arith.cmpi slt, %568, %569 : vector<8x256xi32>
    %571 = arith.andi %566, %570 : vector<8x256xi1>
    %cst_72 = arith.constant 0.000000e+00 : f32
    %572 = vector.broadcast %cst_72 : f32 to vector<8x256xf32>
    %573 = arith.select %571, %515, %572 : vector<8x256xi1>, vector<8x256xf32>
    %574 = arith.addf %530, %573 : vector<8x256xf32>
    %c-2_i32 = arith.constant -2 : i32
    %575 = vector.broadcast %c-2_i32 : i32 to vector<8x256xi32>
    %576 = arith.addi %562, %575 : vector<8x256xi32>
    %c0_i32_73 = arith.constant 0 : i32
    %577 = vector.broadcast %c0_i32_73 : i32 to vector<8x256xi32>
    %578 = arith.cmpi sge, %576, %577 : vector<8x256xi32>
    %c-2_i32_74 = arith.constant -2 : i32
    %579 = vector.broadcast %c-2_i32_74 : i32 to vector<8x256xi32>
    %580 = arith.addi %562, %579 : vector<8x256xi32>
    %c16_i32_75 = arith.constant 16 : i32
    %581 = vector.broadcast %c16_i32_75 : i32 to vector<8x256xi32>
    %582 = arith.cmpi slt, %580, %581 : vector<8x256xi32>
    %583 = arith.andi %578, %582 : vector<8x256xi1>
    %cst_76 = arith.constant 0.000000e+00 : f32
    %584 = vector.broadcast %cst_76 : f32 to vector<8x256xf32>
    %585 = arith.select %583, %520, %584 : vector<8x256xi1>, vector<8x256xf32>
    %586 = arith.addf %574, %585 : vector<8x256xf32>
    %c-1_i32 = arith.constant -1 : i32
    %587 = vector.broadcast %c-1_i32 : i32 to vector<8x256xi32>
    %588 = arith.addi %562, %587 : vector<8x256xi32>
    %c0_i32_77 = arith.constant 0 : i32
    %589 = vector.broadcast %c0_i32_77 : i32 to vector<8x256xi32>
    %590 = arith.cmpi sge, %588, %589 : vector<8x256xi32>
    %c-1_i32_78 = arith.constant -1 : i32
    %591 = vector.broadcast %c-1_i32_78 : i32 to vector<8x256xi32>
    %592 = arith.addi %562, %591 : vector<8x256xi32>
    %c16_i32_79 = arith.constant 16 : i32
    %593 = vector.broadcast %c16_i32_79 : i32 to vector<8x256xi32>
    %594 = arith.cmpi slt, %592, %593 : vector<8x256xi32>
    %595 = arith.andi %590, %594 : vector<8x256xi1>
    %cst_80 = arith.constant 0.000000e+00 : f32
    %596 = vector.broadcast %cst_80 : f32 to vector<8x256xf32>
    %597 = arith.select %595, %525, %596 : vector<8x256xi1>, vector<8x256xf32>
    %598 = arith.addf %586, %597 : vector<8x256xf32>
    %c1_i32_81 = arith.constant 1 : i32
    %599 = vector.broadcast %c1_i32_81 : i32 to vector<8x256xi32>
    %600 = arith.addi %562, %599 : vector<8x256xi32>
    %c0_i32_82 = arith.constant 0 : i32
    %601 = vector.broadcast %c0_i32_82 : i32 to vector<8x256xi32>
    %602 = arith.cmpi sge, %600, %601 : vector<8x256xi32>
    %c1_i32_83 = arith.constant 1 : i32
    %603 = vector.broadcast %c1_i32_83 : i32 to vector<8x256xi32>
    %604 = arith.addi %562, %603 : vector<8x256xi32>
    %c16_i32_84 = arith.constant 16 : i32
    %605 = vector.broadcast %c16_i32_84 : i32 to vector<8x256xi32>
    %606 = arith.cmpi slt, %604, %605 : vector<8x256xi32>
    %607 = arith.andi %602, %606 : vector<8x256xi1>
    %cst_85 = arith.constant 0.000000e+00 : f32
    %608 = vector.broadcast %cst_85 : f32 to vector<8x256xf32>
    %609 = arith.select %607, %535, %608 : vector<8x256xi1>, vector<8x256xf32>
    %610 = arith.addf %598, %609 : vector<8x256xf32>
    %c2_i32 = arith.constant 2 : i32
    %611 = vector.broadcast %c2_i32 : i32 to vector<8x256xi32>
    %612 = arith.addi %562, %611 : vector<8x256xi32>
    %c0_i32_86 = arith.constant 0 : i32
    %613 = vector.broadcast %c0_i32_86 : i32 to vector<8x256xi32>
    %614 = arith.cmpi sge, %612, %613 : vector<8x256xi32>
    %c2_i32_87 = arith.constant 2 : i32
    %615 = vector.broadcast %c2_i32_87 : i32 to vector<8x256xi32>
    %616 = arith.addi %562, %615 : vector<8x256xi32>
    %c16_i32_88 = arith.constant 16 : i32
    %617 = vector.broadcast %c16_i32_88 : i32 to vector<8x256xi32>
    %618 = arith.cmpi slt, %616, %617 : vector<8x256xi32>
    %619 = arith.andi %614, %618 : vector<8x256xi1>
    %cst_89 = arith.constant 0.000000e+00 : f32
    %620 = vector.broadcast %cst_89 : f32 to vector<8x256xf32>
    %621 = arith.select %619, %540, %620 : vector<8x256xi1>, vector<8x256xf32>
    %622 = arith.addf %610, %621 : vector<8x256xf32>
    %c3_i32 = arith.constant 3 : i32
    %623 = vector.broadcast %c3_i32 : i32 to vector<8x256xi32>
    %624 = arith.addi %562, %623 : vector<8x256xi32>
    %c0_i32_90 = arith.constant 0 : i32
    %625 = vector.broadcast %c0_i32_90 : i32 to vector<8x256xi32>
    %626 = arith.cmpi sge, %624, %625 : vector<8x256xi32>
    %c3_i32_91 = arith.constant 3 : i32
    %627 = vector.broadcast %c3_i32_91 : i32 to vector<8x256xi32>
    %628 = arith.addi %562, %627 : vector<8x256xi32>
    %c16_i32_92 = arith.constant 16 : i32
    %629 = vector.broadcast %c16_i32_92 : i32 to vector<8x256xi32>
    %630 = arith.cmpi slt, %628, %629 : vector<8x256xi32>
    %631 = arith.andi %626, %630 : vector<8x256xi1>
    %cst_93 = arith.constant 0.000000e+00 : f32
    %632 = vector.broadcast %cst_93 : f32 to vector<8x256xf32>
    %633 = arith.select %631, %545, %632 : vector<8x256xi1>, vector<8x256xf32>
    %634 = arith.addf %622, %633 : vector<8x256xf32>
    %635 = arith.negf %634 : vector<8x256xf32>
    %636 = math.exp %635 : vector<8x256xf32>
    %cst_94 = arith.constant 1.000000e+00 : f32
    %637 = vector.broadcast %cst_94 : f32 to vector<8x256xf32>
    %638 = arith.addf %637, %636 : vector<8x256xf32>
    %639 = arith.divf %637, %638 : vector<8x256xf32>
    %c0_95 = arith.constant 0 : index
    %c0_96 = arith.constant 0 : index
    %640 = vector.load %arg3[%c0_95, %c0_96] : memref<8x256xf32, #tpu.memory_space<vmem>>, vector<8x256xf32>
    tpu.vector_store %arg3[%c0_95, %c0_96], %639 {strides = array<i32>} : memref<8x256xf32, #tpu.memory_space<vmem>>, vector<8x256xf32>,
    return
  }
  func.func @transform_0(%arg0: i32) -> (i32, i32) {
    %c0_i32 = arith.constant 0 : i32
    %c0_i32_0 = arith.constant 0 : i32
    return %arg0, %c0_i32 : i32, i32
  }
  func.func @transform_1(%arg0: i32) -> i32 {
    %c0_i32 = arith.constant 0 : i32
    %c0_i32_0 = arith.constant 0 : i32
    return %c0_i32 : i32
  }
  func.func @transform_2(%arg0: i32) -> (i32, i32) {
    %c0_i32 = arith.constant 0 : i32
    %c0_i32_0 = arith.constant 0 : i32
    return %arg0, %c0_i32 : i32, i32
  }
}

</mosaic_0001>

<bundles_post_ra>
// kernel: tpu_custom_call.1
= control target key start
LH: loop header
LB: loop body
LE: loop exit
PB: predicated region body
PF: predicated region fallthrough
CT: control target
= control target key end

     0   :  { %7 = vsyncpa [#allocation4], 0  ;;  %s4364_s0 = inlined_call_operand.hbm [shape: f32[8,1024], index: 0, kind: input, shape index: {}]   ;;  %s4365_s1 = inlined_call_operand.vmem [shape: f32[98], index: 1, kind: input, shape index: {}]   ;;  %s4366_s2 = inlined_call_operand.hbm [shape: f32[8,256], index: 2, kind: output, shape index: {}]  }
   0x1   :  { %8 = vsyncpa [#allocation6], 0 }
   0x2   :  { %9 = vsyncpa [#allocation5], 0  ;;  %s26_s11 = sshll.u32 %s4365_s1, 4  ;;  %s2522_s12 = smov [#allocation3]   ;;  %s27_s11 = int_to_ptr.vmem [resolvable:$true] %s26_s11 }
   0x3   :  { %s16_s13 = sshll.u32 %s2522_s12, 4  ;;  %s2460_s16 = scalar_lea.hbm %s4364_s0, 1024  ;;  %s17_s13 = int_to_ptr.vmem [resolvable:$true] %s16_s13 }
   0x4   :  { %p2461_p0 = scmp.ne.s32.totalorder %s4364_s0, %s2460_s16  ;;  %p2464_p1 = scmp.lt.u32.totalorder %s2460_s16, %s4364_s0 }
   0x6   :  { %p2466_p2 = pnand %p2464_p1, %p2461_p0 }
   0x8   :  { %2469 = shalt.err (!%p2466_p2)
}
   0x9   :  { %s2470_s21 = scalar_lea.vmem %s17_s13, 1024  ;;  %p2475_p4 = scmp.lt.s32.totalorder %s17_s13, %s17_s13 }
   0xa   :  { %p2471_p3 = scmp.ne.s32.totalorder %s17_s13, %s2470_s21  ;;  %p2476_p5 = scmp.lt.s32.totalorder %s2470_s21, %s2470_s21 }
   0xc   :  { %p2477_p6 = por %p2476_p5, %p2475_p4 }
   0xe   :  { %p2478_p7 = pnand %p2477_p6, %p2471_p3 }
  0x10   :  { %2481 = shalt.err (!%p2478_p7)
}
  0x11   :  { %19 = dma.hbm_to_vmem [thread:$0]  %s4364_s0, 1024, %s17_s13, [#allocation4]  }
  0x12   :  { %s2482_s23 = scalar_lea.vmem %s27_s11, 16  ;;  %p2487_p9 = scmp.lt.s32.totalorder %s27_s11, %s27_s11 }
  0x13   :  { %p2483_p8 = scmp.ne.s32.totalorder %s27_s11, %s2482_s23  ;;  %p2488_p10 = scmp.lt.s32.totalorder %s2482_s23, %s2482_s23 }
  0x15   :  { %p2489_p11 = por %p2488_p10, %p2487_p9 }
  0x17   :  { %p2490_p12 = pnand %p2489_p11, %p2483_p8 }
  0x19   :  { %2493 = shalt.err (!%p2490_p12)
}
  0x1a   :  { %s2523_s24 = smov [#allocation7]  }
  0x1b   :  { %29 = dma.vmem_to_smem %s27_s11, 16, %s2523_s24, [#allocation6]  }
  0x1c   :  { %2516 = dma.done.wait [#allocation4], 1024  }
  0x1d   :  { %2517 = vsyncadd [#allocation4], 4294966272 }
  0x1e   :  { %2518 = dma.done.wait [#allocation6], 16  }
  0x1f   :  { %2519 = vsyncadd [#allocation6], 4294967280 }
  0x20   :  { %36 = sfence }
  0x21   :  { %v37_v0 = vld [vmem:[#allocation3] sm:$0xff]  ;;  %v39_v1 = vld [vmem:[#allocation3 + $0x10] sm:$0xff]  ;;  %vm59_vm0 = vcmask 416768   ;;  %v38_v4 = vld [vmem:[#allocation3 + $0x8] sm:$0xff]  ;;  %v2524_v7 = vmov 0.0   ;;  %vm62_vm1 = vcmask 834968  }
  0x22   :  { %v45_v2 = vld [vmem:[#allocation3 + $0x20] sm:$0xff]  ;;  %v41_v3 = vadd.f32 %v39_v1, %v37_v0  ;;  %v40_v5 = vld [vmem:[#allocation3 + $0x18] sm:$0xff]  ;;  %v43_v6 = vmax.f32 %v37_v0, %v39_v1  ;;  %60 = vst.msk [vmem:[#allocation2] sm:$0xff] %vm59_vm0, %v2524_v7  ;;  %61 = vst.msk [vmem:[#allocation2 + $0x18] sm:$0xff] %vm59_vm0, %v2524_v7  ;;  %s2525_s0 = smov 51   ;;  %s2330_s25 = sld [smem:[#allocation7 + $0x8]] }
  0x23   :  { %v51_v8 = vld [vmem:[#allocation3 + $0x30] sm:$0xff]  ;;  %v42_v9 = vadd.f32 %v40_v5, %v38_v4  ;;  %v46_v10 = vld [vmem:[#allocation3 + $0x28] sm:$0xff]  ;;  %v44_v11 = vmax.f32 %v38_v4, %v40_v5  ;;  %63 = vst.msk [vmem:[#allocation2 + $0x10] sm:$0xff] %vm62_vm1, %v2524_v7  ;;  %64 = vst.msk [vmem:[#allocation2 + $0x28] sm:$0xff] %vm62_vm1, %v2524_v7  ;;  %s2329_s26 = sld [smem:[#allocation7 + $0x7]]  ;;  %s2332_s27 = sld [smem:[#allocation7 + $0xa]] }
  0x24   :  { %v47_v12 = vadd.f32 %v45_v2, %v41_v3  ;;  %v52_v13 = vld [vmem:[#allocation3 + $0x38] sm:$0xff]  ;;  %v49_v14 = vmax.f32 %v43_v6, %v45_v2  ;;  %s2331_s28 = sld [smem:[#allocation7 + $0x9]]  ;;  %s2334_s29 = sld [smem:[#allocation7 + $0xc]]  ;;  %vm75_vm2 = vcmask 1047960   ;;  %vm164_vm3 = vcmask 916480  }
  0x25   :  { %v48_v15 = vadd.f32 %v46_v10, %v42_v9  ;;  %v50_v16 = vmax.f32 %v44_v11, %v46_v10  ;;  %s2333_s30 = sld [smem:[#allocation7 + $0xb]]  ;;  %s2336_s3 = sld [smem:[#allocation7 + $0xe]]  ;;  %vm317_vm4 = vcmask 785408   ;;  %vm470_vm5 = vcmask 654336  }
  0x26   :  { %v53_v17 = vadd.f32 %v51_v8, %v47_v12  ;;  %v55_v18 = vmax.f32 %v49_v14, %v51_v8  ;;  %s2335_s4 = sld [smem:[#allocation7 + $0xd]]  ;;  %s2338_s5 = sld [smem:[#allocation7 + $0x10]]  ;;  %vm623_vm6 = vcmask 523264   ;;  %vm776_vm7 = vcmask 392192  }
  0x27   :  { %v54_v19 = vadd.f32 %v52_v13, %v48_v15  ;;  %v56_v21 = vmax.f32 %v50_v16, %v52_v13  ;;  %s2337_s6 = sld [smem:[#allocation7 + $0xf]]  ;;  %s2340_s7 = sld [smem:[#allocation7 + $0x12]]  ;;  %vm929_vm8 = vcmask 261120   ;;  %vm2105_vm11 = vcmask 1039360  }
  0x28   :  { %v57_v20 = vmul.f32 0.25, %v53_v17  ;;  %81 = vrot.lane.b32.xlu1 %v55_v18, %s2525_s0  ;;  %s2339_s8 = sld [smem:[#allocation7 + $0x11]]  ;;  %v172_v25 = vstv %s2330_s25  ;;  %s2342_s9 = sld [smem:[#allocation7 + $0x14]]  ;;  %vm2142_vm14 = vcmask 1031168   ;;  %vm2179_vm1 = vcmask 1014784  }
  0x29   :  { %v58_v22 = vmul.f32 0.25, %v54_v19  ;;  %v151_v26 = vstv %s2329_s26  ;;  %v216_v28 = vstv %s2332_s27  ;;  %s2526_s10 = smov 112   ;;  %s2527_s11 = smov 96  }
  0x2a   :  { %67 = vrot.lane.b32.xlu0 %v57_v20, %s2525_s0  ;;  %v194_v29 = vstv %s2331_s28  ;;  %v260_v30 = vstv %s2334_s29  ;;  %s2341_s12 = sld [smem:[#allocation7 + $0x13]]  ;;  %s2344_s13 = sld [smem:[#allocation7 + $0x16]] }
  0x2b   :  { %v238_v33 = vstv %s2333_s30  ;;  %v304_v34 = vstv %s2336_s3  ;;  %s2343_s14 = sld [smem:[#allocation7 + $0x15]]  ;;  %s2346_s15 = sld [smem:[#allocation7 + $0x18]] }
  0x2c   :  { %83 = vrot.lane.b32.xlu1 %v56_v21, %s2525_s0  ;;  %v282_v35 = vstv %s2335_s4  ;;  %v2576_v36 = vstv %s2338_s5  ;;  %s2345_s16 = sld [smem:[#allocation7 + $0x17]]  ;;  %s2528_s17 = smov 80  }
  0x2d   :  { %v325_v38 = vstv %s2337_s6  ;;  %v2583_v39 = vstv %s2340_s7  ;;  %s2348_s18 = sld [smem:[#allocation7 + $0x1a]]  ;;  %s2347_s19 = sld [smem:[#allocation7 + $0x19]] }
  0x2e   :  { %69 = vrot.lane.b32.xlu0 %v58_v22, %s2525_s0  ;;  %v2585_v40 = vstv %s2339_s8  ;;  %v435_v61 = vstv %s2342_s9  ;;  %s2350_s20 = sld [smem:[#allocation7 + $0x1c]]  ;;  %s2349_s21 = sld [smem:[#allocation7 + $0x1b]] }
  0x2f   :  { %s2529_s1 = smov 64   ;;  %s2351_s22 = sld [smem:[#allocation7 + $0x1d]] }
  0x30   :  { %v2688_v17 = vstv %s2341_s12  ;;  %v2700_v22 = vstv %s2344_s13  ;;  %s2352_s23 = sld [smem:[#allocation7 + $0x1e]]  ;;  %s2353_s24 = sld [smem:[#allocation7 + $0x1f]] }
  0x31   :  { %s2354_s0 = sld [smem:[#allocation7 + $0x20]]  ;;  %s2355_s25 = sld [smem:[#allocation7 + $0x21]] }
  0x32   :  { %s2356_s26 = sld [smem:[#allocation7 + $0x22]]  ;;  %s2357_s27 = sld [smem:[#allocation7 + $0x23]] }
  0x33   :  { %s2358_s28 = sld [smem:[#allocation7 + $0x24]]  ;;  %s2359_s29 = sld [smem:[#allocation7 + $0x25]] }
  0x34   :  { %s2530_s30 = smov 48   ;;  %s2360_s3 = sld [smem:[#allocation7 + $0x26]] }
  0x35   :  { %s2361_s4 = sld [smem:[#allocation7 + $0x27]]  ;;  %s2362_s5 = sld [smem:[#allocation7 + $0x28]] }
  0x36   :  { %s2363_s6 = sld [smem:[#allocation7 + $0x29]]  ;;  %s2364_s7 = sld [smem:[#allocation7 + $0x2a]] }
  0x37   :  { %s2365_s8 = sld [smem:[#allocation7 + $0x2b]]  ;;  %s2531_s9 = smov 32  }
  0x38   :  { %s2366_s12 = sld [smem:[#allocation7 + $0x2c]]  ;;  %s2367_s13 = sld [smem:[#allocation7 + $0x2d]] }
  0x9a   :  { %v82_v23 = vpop.permute.xlu1 %81 }
  0x9b   :  { %90 = vst.msk [vmem:[#allocation2 + $0x18] sm:$0xff] %vm75_vm2, %v82_v23 }
  0x9c   :  { %v68_v24 = vpop.permute.xlu0 %67 }
  0x9d   :  { %76 = vst.msk [vmem:[#allocation2] sm:$0xff] %vm75_vm2, %v68_v24 }
  0x9e   :  { %v84_v27 = vpop.permute.xlu1 %83 }
  0x9f   :  { %v2573_v31 = vsel %vm59_vm0, %v82_v23, %v84_v27  ;;  %92 = vst.msk [vmem:[#allocation2 + $0x28] sm:$0xff] %vm59_vm0, %v84_v27  ;;  %v457_v23 = vstv %s2343_s14  ;;  %s2368_s14 = sld [smem:[#allocation7 + $0x2e]] }
  0xa0   :  { %v70_v32 = vpop.permute.xlu0 %69  ;;  %91 = vst [vmem:[#allocation2 + $0x20] sm:$0xff] %v2573_v31 }
  0xa1   :  { %v2580_v37 = vsel %vm59_vm0, %v68_v24, %v70_v32  ;;  %78 = vst.msk [vmem:[#allocation2 + $0x10] sm:$0xff] %vm59_vm0, %v70_v32 }
  0xa2   :  { %77 = vst [vmem:[#allocation2 + $0x8] sm:$0xff] %v2580_v37  ;;  %v2589_v41 = vmul.f32 %v151_v26, %v2580_v37  ;;  %v2592_v42 = vmul.f32 %v172_v25, %v2580_v37  ;;  %v2595_v43 = vmul.f32 %v194_v29, %v2580_v37  ;;  %v2598_v44 = vmul.f32 %v216_v28, %v2580_v37 }
  0xa3   :  { %v2601_v45 = vmul.f32 %v238_v33, %v2580_v37  ;;  %v2604_v46 = vmul.f32 %v260_v30, %v2580_v37  ;;  %v2607_v47 = vmul.f32 %v282_v35, %v2580_v37  ;;  %v2610_v48 = vmul.f32 %v304_v34, %v2580_v37 }
  0xa4   :  { %v2612_v49 = vld [vmem:[#allocation2] sm:$0xff]  ;;  %v2615_v50 = vmul.f32 %v325_v38, %v2580_v37  ;;  %v2619_v51 = vmul.f32 %v2576_v36, %v2580_v37  ;;  %v2623_v52 = vmul.f32 %v2585_v40, %v2580_v37  ;;  %v2627_v53 = vmul.f32 %v2583_v39, %v2580_v37 }
  0xa5   :  { %v173_v54 = vmul.f32 %v172_v25, %v2612_v49  ;;  %v152_v55 = vmul.f32 %v151_v26, %v2612_v49  ;;  %v217_v59 = vmul.f32 %v216_v28, %v2612_v49  ;;  %v195_v60 = vmul.f32 %v194_v29, %v2612_v49 }
  0xa6   :  { %v2644_v62 = vmul.f32 %v435_v61, %v2580_v37  ;;  %v261_v1 = vmul.f32 %v260_v30, %v2612_v49  ;;  %v239_v2 = vmul.f32 %v238_v33, %v2612_v49  ;;  %v305_v5 = vmul.f32 %v304_v34, %v2612_v49 }
  0xa7   :  { %179 = vrot.lane.b32.xlu1 %v173_v54, %s2526_s10  ;;  %158 = vrot.lane.b32.xlu0 %v152_v55, %s2526_s10  ;;  %v283_v6 = vmul.f32 %v282_v35, %v2612_v49  ;;  %v348_v9 = vmul.f32 %v2576_v36, %v2612_v49  ;;  %v326_v10 = vmul.f32 %v325_v38, %v2612_v49  ;;  %v610_v55 = vstv %s2350_s20  ;;  %s2380_s20 = sld [smem:[#allocation7 + $0x3a]] }
  0xa8   :  { %v2633_v56 = vld [vmem:[#allocation2 + $0x10] sm:$0xff]  ;;  %v392_v13 = vmul.f32 %v2583_v39, %v2612_v49  ;;  %v370_v14 = vmul.f32 %v2585_v40, %v2612_v49  ;;  %v436_v18 = vmul.f32 %v435_v61, %v2612_v49  ;;  %v414_v19 = vmul.f32 %v2688_v17, %v2612_v49 }
  0xa9   :  { %v175_v57 = vmul.f32 %v172_v25, %v2633_v56  ;;  %v154_v58 = vmul.f32 %v151_v26, %v2633_v56  ;;  %v219_v63 = vmul.f32 %v216_v28, %v2633_v56  ;;  %v197_v0 = vmul.f32 %v194_v29, %v2633_v56 }
  0xaa   :  { %v263_v3 = vmul.f32 %v260_v30, %v2633_v56  ;;  %v241_v4 = vmul.f32 %v238_v33, %v2633_v56  ;;  %v307_v7 = vmul.f32 %v304_v34, %v2633_v56  ;;  %v285_v8 = vmul.f32 %v282_v35, %v2633_v56 }
  0xab   :  { %183 = vrot.lane.b32.xlu1 %v175_v57, %s2526_s10  ;;  %162 = vrot.lane.b32.xlu0 %v154_v58, %s2526_s10  ;;  %v350_v11 = vmul.f32 %v2576_v36, %v2633_v56  ;;  %v328_v12 = vmul.f32 %v325_v38, %v2633_v56  ;;  %v394_v15 = vmul.f32 %v2583_v39, %v2633_v56  ;;  %v522_v28 = vstv %s2346_s15  ;;  %s2369_s15 = sld [smem:[#allocation7 + $0x2f]] }
  0xac   :  { %v372_v16 = vmul.f32 %v2585_v40, %v2633_v56  ;;  %v438_v20 = vmul.f32 %v435_v61, %v2633_v56  ;;  %v416_v21 = vmul.f32 %v2688_v17, %v2633_v56  ;;  %v479_v24 = vmul.f32 %v2700_v22, %v2612_v49 }
  0xad   :  { %v458_v25 = vmul.f32 %v457_v23, %v2612_v49  ;;  %v481_v26 = vmul.f32 %v2700_v22, %v2633_v56  ;;  %v460_v27 = vmul.f32 %v457_v23, %v2633_v56  ;;  %v500_v29 = vstv %s2345_s16  ;;  %s2370_s16 = sld [smem:[#allocation7 + $0x30]] }
  0xae   :  { %v523_v30 = vmul.f32 %v522_v28, %v2612_v49  ;;  %v501_v32 = vmul.f32 %v500_v29, %v2612_v49  ;;  %v525_v33 = vmul.f32 %v522_v28, %v2633_v56  ;;  %v503_v34 = vmul.f32 %v500_v29, %v2633_v56 }
  0xaf   :  { %223 = vrot.lane.b32.xlu1 %v217_v59, %s2526_s10  ;;  %201 = vrot.lane.b32.xlu0 %v195_v60, %s2526_s10  ;;  %v566_v35 = vstv %s2348_s18  ;;  %v544_v36 = vstv %s2347_s19  ;;  %v611_v58 = vmul.f32 %v610_v55, %v2612_v49  ;;  %s2378_s18 = sld [smem:[#allocation7 + $0x38]]  ;;  %s2379_s19 = sld [smem:[#allocation7 + $0x39]] }
  0xb0   :  { %v567_v38 = vmul.f32 %v566_v35, %v2612_v49  ;;  %v545_v39 = vmul.f32 %v544_v36, %v2612_v49  ;;  %v569_v40 = vmul.f32 %v566_v35, %v2633_v56  ;;  %v547_v54 = vmul.f32 %v544_v36, %v2633_v56 }
  0xb1   :  { %v588_v57 = vstv %s2349_s21  ;;  %v568_v61 = vmul.f32 %v566_v35, %v2580_v37  ;;  %s2381_s21 = sld [smem:[#allocation7 + $0x3b]] }
  0xb2   :  { %v589_v59 = vmul.f32 %v588_v57, %v2612_v49  ;;  %v591_v60 = vmul.f32 %v588_v57, %v2633_v56 }
  0xb3   :  { %227 = vrot.lane.b32.xlu1 %v219_v63, %s2526_s10  ;;  %205 = vrot.lane.b32.xlu0 %v197_v0, %s2526_s10 }
  0xb7   :  { %267 = vrot.lane.b32.xlu1 %v261_v1, %s2526_s10  ;;  %245 = vrot.lane.b32.xlu0 %v239_v2, %s2526_s10  ;;  %v612_v1 = vmul.f32 %v610_v55, %v2580_v37  ;;  %v613_v2 = vmul.f32 %v610_v55, %v2633_v56 }
  0xbb   :  { %271 = vrot.lane.b32.xlu1 %v263_v3, %s2526_s10  ;;  %249 = vrot.lane.b32.xlu0 %v241_v4, %s2526_s10  ;;  %v631_v3 = vstv %s2351_s22  ;;  %s2382_s22 = sld [smem:[#allocation7 + $0x3c]] }
  0xbf   :  { %311 = vrot.lane.b32.xlu1 %v305_v5, %s2527_s11  ;;  %289 = vrot.lane.b32.xlu0 %v283_v6, %s2526_s10  ;;  %v632_v6 = vmul.f32 %v631_v3, %v2612_v49 }
  0xc3   :  { %315 = vrot.lane.b32.xlu1 %v307_v7, %s2527_s11  ;;  %293 = vrot.lane.b32.xlu0 %v285_v8, %s2526_s10  ;;  %v633_v7 = vmul.f32 %v631_v3, %v2580_v37  ;;  %v653_v8 = vstv %s2352_s23  ;;  %s2386_s23 = sld [smem:[#allocation7 + $0x40]] }
  0xc7   :  { %354 = vrot.lane.b32.xlu1 %v348_v9, %s2527_s11  ;;  %332 = vrot.lane.b32.xlu0 %v326_v10, %s2527_s11 }
  0xcb   :  { %358 = vrot.lane.b32.xlu1 %v350_v11, %s2527_s11  ;;  %336 = vrot.lane.b32.xlu0 %v328_v12, %s2527_s11  ;;  %v634_v11 = vmul.f32 %v631_v3, %v2633_v56  ;;  %v654_v12 = vmul.f32 %v653_v8, %v2612_v49 }
  0xcf   :  { %398 = vrot.lane.b32.xlu1 %v392_v13, %s2527_s11  ;;  %376 = vrot.lane.b32.xlu0 %v370_v14, %s2527_s11 }
  0xd3   :  { %402 = vrot.lane.b32.xlu1 %v394_v15, %s2527_s11  ;;  %380 = vrot.lane.b32.xlu0 %v372_v16, %s2527_s11  ;;  %v655_v15 = vmul.f32 %v653_v8, %v2580_v37  ;;  %v656_v16 = vmul.f32 %v653_v8, %v2633_v56 }
  0xd7   :  { %442 = vrot.lane.b32.xlu1 %v436_v18, %s2527_s11  ;;  %420 = vrot.lane.b32.xlu0 %v414_v19, %s2527_s11 }
  0xdb   :  { %446 = vrot.lane.b32.xlu1 %v438_v20, %s2527_s11  ;;  %424 = vrot.lane.b32.xlu0 %v416_v21, %s2527_s11 }
  0xdf   :  { %485 = vrot.lane.b32.xlu1 %v479_v24, %s2528_s17  ;;  %464 = vrot.lane.b32.xlu0 %v458_v25, %s2528_s17 }
  0xe3   :  { %489 = vrot.lane.b32.xlu1 %v481_v26, %s2528_s17  ;;  %468 = vrot.lane.b32.xlu0 %v460_v27, %s2528_s17 }
  0xe7   :  { %529 = vrot.lane.b32.xlu1 %v523_v30, %s2528_s17  ;;  %507 = vrot.lane.b32.xlu0 %v501_v32, %s2528_s17  ;;  %v719_v32 = vstv %s2355_s25  ;;  %s2383_s25 = sld [smem:[#allocation7 + $0x3d]] }
  0xe8   :  { %v720_v35 = vmul.f32 %v719_v32, %v2612_v49 }
  0xeb   :  { %533 = vrot.lane.b32.xlu1 %v525_v33, %s2528_s17  ;;  %511 = vrot.lane.b32.xlu0 %v503_v34, %s2528_s17 }
  0xef   :  { %573 = vrot.lane.b32.xlu1 %v567_v38, %s2528_s17  ;;  %551 = vrot.lane.b32.xlu0 %v545_v39, %s2528_s17  ;;  %v741_v38 = vstv %s2356_s26  ;;  %s2389_s26 = sld [smem:[#allocation7 + $0x43]] }
  0xf0   :  { %v742_v55 = vmul.f32 %v741_v38, %v2612_v49 }
  0xf3   :  { %577 = vrot.lane.b32.xlu1 %v569_v40, %s2528_s17  ;;  %555 = vrot.lane.b32.xlu0 %v547_v54, %s2528_s17  ;;  %v722_v54 = vmul.f32 %v719_v32, %v2633_v56 }
  0xf7   :  { %617 = vrot.lane.b32.xlu1 %v611_v58, %s2529_s1  ;;  %595 = vrot.lane.b32.xlu0 %v589_v59, %s2528_s17  ;;  %v743_v59 = vmul.f32 %v741_v38, %v2580_v37 }
  0xfb   :  { %599 = vrot.lane.b32.xlu0 %v591_v60, %s2528_s17  ;;  %160 = vrot.lane.b32.xlu1 %v2589_v41, %s2526_s10  ;;  %v415_v41 = vmul.f32 %v2688_v17, %v2580_v37  ;;  %v675_v17 = vstv %s2353_s24  ;;  %v744_v60 = vmul.f32 %v741_v38, %v2633_v56  ;;  %s2387_s24 = sld [smem:[#allocation7 + $0x41]] }
  0xfc   :  { %v676_v20 = vmul.f32 %v675_v17, %v2612_v49  ;;  %v677_v21 = vmul.f32 %v675_v17, %v2580_v37  ;;  %v678_v25 = vmul.f32 %v675_v17, %v2633_v56 }
  0xff   :  { %181 = vrot.lane.b32.xlu0 %v2592_v42, %s2526_s10  ;;  %203 = vrot.lane.b32.xlu1 %v2595_v43, %s2526_s10  ;;  %v459_v42 = vmul.f32 %v457_v23, %v2580_v37 }
 0x103   :  { %225 = vrot.lane.b32.xlu0 %v2598_v44, %s2526_s10  ;;  %247 = vrot.lane.b32.xlu1 %v2601_v45, %s2526_s10  ;;  %v480_v45 = vmul.f32 %v2700_v22, %v2580_v37  ;;  %v697_v22 = vstv %s2354_s0  ;;  %s2393_s0 = sld [smem:[#allocation7 + $0x47]] }
 0x104   :  { %v698_v26 = vmul.f32 %v697_v22, %v2612_v49  ;;  %v700_v30 = vmul.f32 %v697_v22, %v2633_v56 }
 0x107   :  { %269 = vrot.lane.b32.xlu0 %v2604_v46, %s2526_s10  ;;  %291 = vrot.lane.b32.xlu1 %v2607_v47, %s2526_s10  ;;  %v502_v46 = vmul.f32 %v500_v29, %v2580_v37  ;;  %v699_v29 = vmul.f32 %v697_v22, %v2580_v37 }
 0x10b   :  { %313 = vrot.lane.b32.xlu0 %v2610_v48, %s2527_s11  ;;  %334 = vrot.lane.b32.xlu1 %v2615_v50, %s2527_s11  ;;  %v524_v50 = vmul.f32 %v522_v28, %v2580_v37 }
 0x10f   :  { %356 = vrot.lane.b32.xlu0 %v2619_v51, %s2527_s11  ;;  %378 = vrot.lane.b32.xlu1 %v2623_v52, %s2527_s11  ;;  %v546_v51 = vmul.f32 %v544_v36, %v2580_v37  ;;  %v721_v36 = vmul.f32 %v719_v32, %v2580_v37 }
 0x113   :  { %400 = vrot.lane.b32.xlu0 %v2627_v53, %s2527_s11  ;;  %422 = vrot.lane.b32.xlu1 %v415_v41, %s2527_s11  ;;  %v763_v41 = vstv %s2357_s27  ;;  %s2394_s27 = sld [smem:[#allocation7 + $0x48]] }
 0x117   :  { %444 = vrot.lane.b32.xlu0 %v2644_v62, %s2527_s11  ;;  %466 = vrot.lane.b32.xlu1 %v459_v42, %s2528_s17  ;;  %v590_v62 = vmul.f32 %v588_v57, %v2580_v37 }
 0x119   :  { %v2765_v43 = vpop.permute.xlu1 %179  ;;  %v2767_v44 = vpop.permute.xlu0 %158 }
 0x11b   :  { %487 = vrot.lane.b32.xlu0 %v480_v45, %s2528_s17  ;;  %509 = vrot.lane.b32.xlu1 %v502_v46, %s2528_s17  ;;  %v764_v46 = vmul.f32 %v763_v41, %v2612_v49 }
 0x11d   :  { %v2774_v47 = vpop.permute.xlu1 %183  ;;  %v2776_v48 = vpop.permute.xlu0 %162 }
 0x11e   :  { %4457 = vst [vmem:[#allocation12_spill] sm:$0xff] %v2776_v48  ;;  %v981_v48 = vstv %s2367_s13  ;;  %s3186_s13 = sld [smem:[#allocation7 + $0x44]] }
 0x11f   :  { %531 = vrot.lane.b32.xlu0 %v524_v50, %s2528_s17  ;;  %553 = vrot.lane.b32.xlu1 %v546_v51, %s2528_s17  ;;  %v765_v50 = vmul.f32 %v763_v41, %v2580_v37  ;;  %v784_v51 = vstv %s2358_s28  ;;  %s2323_s28 = sld [smem:[#allocation7 + $0x1]] }
 0x120   :  { %v787_v8 = vmul.f32 %v784_v51, %v2633_v56 }
 0x121   :  { %v2782_v52 = vpop.permute.xlu1 %223  ;;  %v2784_v53 = vpop.permute.xlu0 %201 }
 0x123   :  { %575 = vrot.lane.b32.xlu0 %v568_v61, %s2528_s17  ;;  %597 = vrot.lane.b32.xlu1 %v590_v62, %s2528_s17 }
 0x125   :  { %v2790_v63 = vpop.permute.xlu1 %227  ;;  %v2792_v0 = vpop.permute.xlu0 %205 }
 0x126   :  { %4458 = vst [vmem:[#allocation13_spill] sm:$0xff] %v2790_v63 }
 0x127   :  { %619 = vrot.lane.b32.xlu0 %v612_v1, %s2529_s1  ;;  %621 = vrot.lane.b32.xlu1 %v613_v2, %s2529_s1  ;;  %v766_v1 = vmul.f32 %v763_v41, %v2633_v56  ;;  %v785_v2 = vmul.f32 %v784_v51, %v2612_v49 }
 0x129   :  { %v2798_v4 = vpop.permute.xlu1 %267  ;;  %v2800_v5 = vpop.permute.xlu0 %245 }
 0x12a   :  { %4459 = vst [vmem:[#allocation14_spill] sm:$0xff] %v2798_v4  ;;  %4460 = vst [vmem:[#allocation15_spill] sm:$0xff] %v2800_v5 }
 0x12b   :  { %638 = vrot.lane.b32.xlu0 %v632_v6, %s2529_s1  ;;  %640 = vrot.lane.b32.xlu1 %v633_v7, %s2529_s1  ;;  %v786_v7 = vmul.f32 %v784_v51, %v2580_v37 }
 0x12d   :  { %v2806_v9 = vpop.permute.xlu1 %271  ;;  %v2808_v10 = vpop.permute.xlu0 %249 }
 0x12e   :  { %4461 = vst [vmem:[#allocation16_spill] sm:$0xff] %v2806_v9  ;;  %4462 = vst [vmem:[#allocation17_spill] sm:$0xff] %v2808_v10  ;;  %v3036_v9 = vld [vmem:[#allocation2 + $0x18] sm:$0xff] }
 0x12f   :  { %642 = vrot.lane.b32.xlu0 %v634_v11, %s2529_s1  ;;  %660 = vrot.lane.b32.xlu1 %v654_v12, %s2529_s1  ;;  %v806_v11 = vstv %s2359_s29  ;;  %s2325_s29 = sld [smem:[#allocation7 + $0x3]] }
 0x130   :  { %v808_v17 = vmul.f32 %v806_v11, %v2580_v37 }
 0x131   :  { %v2814_v13 = vpop.permute.xlu1 %311  ;;  %v2816_v14 = vpop.permute.xlu0 %289 }
 0x132   :  { %4463 = vst [vmem:[#allocation18_spill] sm:$0xff] %v2816_v14  ;;  %v1047_v14 = vstv %s2370_s16  ;;  %s3232_s16 = sld [smem:[#allocation7 + $0x4f]] }
 0x133   :  { %662 = vrot.lane.b32.xlu0 %v655_v15, %s2529_s1  ;;  %664 = vrot.lane.b32.xlu1 %v656_v16, %s2529_s1  ;;  %v807_v16 = vmul.f32 %v806_v11, %v2612_v49 }
 0x135   :  { %v2822_v18 = vpop.permute.xlu1 %315  ;;  %v2824_v19 = vpop.permute.xlu0 %293 }
 0x136   :  { %4464 = vst [vmem:[#allocation19_spill] sm:$0xff] %v2822_v18  ;;  %4465 = vst [vmem:[#allocation20_spill] sm:$0xff] %v2824_v19 }
 0x137   :  { %682 = vrot.lane.b32.xlu0 %v676_v20, %s2529_s1  ;;  %684 = vrot.lane.b32.xlu1 %v677_v21, %s2529_s1  ;;  %v828_v20 = vstv %s2360_s3  ;;  %s2324_s3 = sld [smem:[#allocation7 + $0x2]] }
 0x138   :  { %v830_v32 = vmul.f32 %v828_v20, %v2580_v37 }
 0x139   :  { %v2830_v23 = vpop.permute.xlu1 %354  ;;  %v2832_v24 = vpop.permute.xlu0 %332 }
 0x13b   :  { %686 = vrot.lane.b32.xlu0 %v678_v25, %s2529_s1  ;;  %704 = vrot.lane.b32.xlu1 %v698_v26, %s2529_s1  ;;  %v809_v25 = vmul.f32 %v806_v11, %v2633_v56  ;;  %v829_v26 = vmul.f32 %v828_v20, %v2612_v49  ;;  %v894_v11 = vstv %s2363_s6  ;;  %s2328_s6 = sld [smem:[#allocation7 + $0x6]] }
 0x13d   :  { %v2838_v27 = vpop.permute.xlu1 %358  ;;  %v2840_v28 = vpop.permute.xlu0 %336 }
 0x13f   :  { %706 = vrot.lane.b32.xlu0 %v699_v29, %s2529_s1  ;;  %708 = vrot.lane.b32.xlu1 %v700_v30, %s2529_s1 }
 0x141   :  { %v2846_v33 = vpop.permute.xlu1 %398  ;;  %v2848_v34 = vpop.permute.xlu0 %376 }
 0x142   :  { %4466 = vst [vmem:[#allocation21_spill] sm:$0xff] %v2846_v33 }
 0x143   :  { %726 = vrot.lane.b32.xlu0 %v720_v35, %s2529_s1  ;;  %728 = vrot.lane.b32.xlu1 %v721_v36, %s2529_s1  ;;  %v831_v35 = vmul.f32 %v828_v20, %v2633_v56  ;;  %v850_v36 = vstv %s2361_s4  ;;  %v896_v20 = vmul.f32 %v894_v11, %v2580_v37  ;;  %s2327_s4 = sld [smem:[#allocation7 + $0x5]] }
 0x144   :  { %v853_v51 = vmul.f32 %v850_v36, %v2633_v56 }
 0x145   :  { %v2854_v39 = vpop.permute.xlu1 %402  ;;  %v2856_v40 = vpop.permute.xlu0 %380 }
 0x146   :  { %4467 = vst [vmem:[#allocation22_spill] sm:$0xff] %v2854_v39  ;;  %4468 = vst [vmem:[#allocation23_spill] sm:$0xff] %v2856_v40 }
 0x147   :  { %730 = vrot.lane.b32.xlu0 %v722_v54, %s2529_s1  ;;  %748 = vrot.lane.b32.xlu1 %v742_v55, %s2529_s1  ;;  %v851_v55 = vmul.f32 %v850_v36, %v2612_v49 }
 0x149   :  { %v2862_v57 = vpop.permute.xlu1 %442  ;;  %v2864_v58 = vpop.permute.xlu0 %420 }
 0x14a   :  { %4469 = vst [vmem:[#allocation24_spill] sm:$0xff] %v2862_v57  ;;  %4470 = vst [vmem:[#allocation25_spill] sm:$0xff] %v2864_v58 }
 0x14b   :  { %750 = vrot.lane.b32.xlu0 %v743_v59, %s2529_s1  ;;  %752 = vrot.lane.b32.xlu1 %v744_v60, %s2529_s1  ;;  %v852_v59 = vmul.f32 %v850_v36, %v2580_v37  ;;  %v872_v60 = vstv %s2362_s5  ;;  %s2326_s5 = sld [smem:[#allocation7 + $0x4]] }
 0x14d   :  { %v2870_v42 = vpop.permute.xlu1 %446  ;;  %v2872_v45 = vpop.permute.xlu0 %424 }
 0x14e   :  { %4471 = vst [vmem:[#allocation26_spill] sm:$0xff] %v2870_v42  ;;  %4472 = vst [vmem:[#allocation27_spill] sm:$0xff] %v2872_v45 }
 0x14f   :  { %770 = vrot.lane.b32.xlu0 %v764_v46, %s2530_s30  ;;  %772 = vrot.lane.b32.xlu1 %v765_v50, %s2530_s30  ;;  %v873_v50 = vmul.f32 %v872_v60, %v2612_v49 }
 0x151   :  { %v2878_v61 = vpop.permute.xlu1 %485  ;;  %v2880_v62 = vpop.permute.xlu0 %464  ;;  %v3183_v40 = vstv %s2326_s5  ;;  %s2405_s5 = sld [smem:[#allocation7 + $0x53]] }
 0x152   :  { %4530 = vst [vmem:[#allocation85_spill] sm:$0xff] %v3183_v40 }
 0x153   :  { %774 = vrot.lane.b32.xlu0 %v766_v1, %s2530_s30  ;;  %791 = vrot.lane.b32.xlu1 %v785_v2, %s2530_s30 }
 0x155   :  { %v2886_v3 = vpop.permute.xlu1 %489  ;;  %v2888_v6 = vpop.permute.xlu0 %468 }
 0x156   :  { %4473 = vst [vmem:[#allocation28_spill] sm:$0xff] %v2888_v6 }
 0x157   :  { %793 = vrot.lane.b32.xlu0 %v786_v7, %s2530_s30  ;;  %795 = vrot.lane.b32.xlu1 %v787_v8, %s2530_s30  ;;  %v875_v7 = vmul.f32 %v872_v60, %v2633_v56  ;;  %v874_v8 = vmul.f32 %v872_v60, %v2580_v37 }
 0x159   :  { %v2894_v12 = vpop.permute.xlu1 %529  ;;  %v2896_v15 = vpop.permute.xlu0 %507 }
 0x15a   :  { %4474 = vst [vmem:[#allocation29_spill] sm:$0xff] %v2894_v12 }
 0x15b   :  { %813 = vrot.lane.b32.xlu0 %v807_v16, %s2530_s30  ;;  %815 = vrot.lane.b32.xlu1 %v808_v17, %s2530_s30 }
 0x15d   :  { %v2902_v21 = vpop.permute.xlu1 %533  ;;  %v2904_v22 = vpop.permute.xlu0 %511 }
 0x15e   :  { %4475 = vst [vmem:[#allocation30_spill] sm:$0xff] %v2902_v21 }
 0x15f   :  { %817 = vrot.lane.b32.xlu0 %v809_v25, %s2530_s30  ;;  %835 = vrot.lane.b32.xlu1 %v829_v26, %s2530_s30  ;;  %v895_v25 = vmul.f32 %v894_v11, %v2612_v49  ;;  %v916_v26 = vstv %s2364_s7  ;;  %s3152_s7 = sld [smem:[#allocation7]] }
 0x160   :  { %v917_v36 = vmul.f32 %v916_v26, %v2612_v49 }
 0x161   :  { %v2910_v29 = vpop.permute.xlu1 %573  ;;  %v2912_v30 = vpop.permute.xlu0 %551 }
 0x162   :  { %4476 = vst [vmem:[#allocation31_spill] sm:$0xff] %v2910_v29  ;;  %4477 = vst [vmem:[#allocation32_spill] sm:$0xff] %v2912_v30  ;;  %v3046_v29 = vld [vmem:[#allocation2 + $0x28] sm:$0xff] }
 0x163   :  { %837 = vrot.lane.b32.xlu0 %v830_v32, %s2530_s30  ;;  %839 = vrot.lane.b32.xlu1 %v831_v35, %s2530_s30 }
 0x165   :  { %v2918_v38 = vpop.permute.xlu1 %577  ;;  %v2920_v54 = vpop.permute.xlu0 %555 }
 0x166   :  { %4478 = vst [vmem:[#allocation33_spill] sm:$0xff] %v2918_v38  ;;  %4479 = vst [vmem:[#allocation34_spill] sm:$0xff] %v2920_v54  ;;  %v1025_v38 = vstv %s2369_s15  ;;  %v1168_v54 = vstv %s2380_s20  ;;  %s3212_s15 = sld [smem:[#allocation7 + $0x4a]]  ;;  %s3269_s20 = sld [smem:[#allocation7 + $0x31]] }
 0x167   :  { %857 = vrot.lane.b32.xlu0 %v851_v55, %s2530_s30  ;;  %859 = vrot.lane.b32.xlu1 %v852_v59, %s2530_s30  ;;  %v897_v55 = vmul.f32 %v894_v11, %v2633_v56 }
 0x169   :  { %v2926_v41 = vpop.permute.xlu1 %617  ;;  %v2928_v46 = vpop.permute.xlu0 %595 }
 0x16a   :  { %4480 = vst [vmem:[#allocation35_spill] sm:$0xff] %v2928_v46  ;;  %v1003_v46 = vstv %s2368_s14  ;;  %s3200_s14 = sld [smem:[#allocation7 + $0x32]] }
 0x16b   :  { %879 = vrot.lane.b32.xlu1 %v873_v50, %s2530_s30  ;;  %861 = vrot.lane.b32.xlu0 %v853_v51, %s2530_s30  ;;  %v919_v50 = vmul.f32 %v916_v26, %v2633_v56  ;;  %v918_v51 = vmul.f32 %v916_v26, %v2580_v37 }
 0x16d   :  { %v2934_v1 = vpop.permute.xlu1 %160  ;;  %v2936_v2 = vpop.permute.xlu0 %599 }
 0x16e   :  { %4481 = vst [vmem:[#allocation36_spill] sm:$0xff] %v2934_v1  ;;  %4482 = vst [vmem:[#allocation37_spill] sm:$0xff] %v2936_v2 }
 0x16f   :  { %883 = vrot.lane.b32.xlu1 %v875_v7, %s2530_s30  ;;  %881 = vrot.lane.b32.xlu0 %v874_v8, %s2530_s30  ;;  %v937_v7 = vstv %s2365_s8  ;;  %s3156_s8 = sld [smem:[#allocation7 + $0x4e]] }
 0x171   :  { %v2942_v16 = vpop.permute.xlu1 %203  ;;  %v2944_v17 = vpop.permute.xlu0 %181 }
 0x172   :  { %4483 = vst [vmem:[#allocation38_spill] sm:$0xff] %v2944_v17 }
 0x173   :  { %903 = vrot.lane.b32.xlu1 %v896_v20, %s2530_s30  ;;  %901 = vrot.lane.b32.xlu0 %v895_v25, %s2530_s30  ;;  %v939_v20 = vmul.f32 %v937_v7, %v2580_v37  ;;  %v938_v25 = vmul.f32 %v937_v7, %v2612_v49 }
 0x175   :  { %v2950_v32 = vpop.permute.xlu1 %247  ;;  %v2952_v35 = vpop.permute.xlu0 %225 }
 0x176   :  { %4484 = vst [vmem:[#allocation39_spill] sm:$0xff] %v2950_v32  ;;  %4485 = vst [vmem:[#allocation40_spill] sm:$0xff] %v2952_v35  ;;  %v3181_v32 = vstv %s2327_s4  ;;  %s2415_s4 = sld [smem:[#allocation7 + $0x5d]] }
 0x177   :  { %923 = vrot.lane.b32.xlu1 %v917_v36, %s2531_s9  ;;  %905 = vrot.lane.b32.xlu0 %v897_v55, %s2530_s30  ;;  %v959_v36 = vstv %s2366_s12  ;;  %s3166_s12 = sld [smem:[#allocation7 + $0x3e]]  ;;  %4529 = vst [vmem:[#allocation84_spill] sm:$0xff] %v3181_v32  ;;  %v3208_v63 = vmul.f32 %v3181_v32, %v2633_v56 }
 0x179   :  { %v2958_v59 = vpop.permute.xlu1 %291  ;;  %v2960_v60 = vpop.permute.xlu0 %269  ;;  %4533 = vst [vmem:[#allocation88_spill] sm:$0xff] %v3208_v63 }
 0x17a   :  { %4486 = vst [vmem:[#allocation41_spill] sm:$0xff] %v2958_v59  ;;  %4487 = vst [vmem:[#allocation42_spill] sm:$0xff] %v2960_v60 }
 0x17b   :  { %927 = vrot.lane.b32.xlu1 %v919_v50, %s2531_s9  ;;  %925 = vrot.lane.b32.xlu0 %v918_v51, %s2531_s9  ;;  %v960_v50 = vmul.f32 %v959_v36, %v2612_v49  ;;  %v940_v51 = vmul.f32 %v937_v7, %v2633_v56 }
 0x17d   :  { %v2966_v8 = vpop.permute.xlu1 %334  ;;  %v2968_v11 = vpop.permute.xlu0 %313 }
 0x17e   :  { %4488 = vst [vmem:[#allocation43_spill] sm:$0xff] %v2968_v11 }
 0x17f   :  { %946 = vrot.lane.b32.xlu1 %v939_v20, %s2531_s9  ;;  %944 = vrot.lane.b32.xlu0 %v938_v25, %s2531_s9  ;;  %v962_v20 = vmul.f32 %v959_v36, %v2633_v56  ;;  %v961_v25 = vmul.f32 %v959_v36, %v2580_v37 }
 0x181   :  { %v2974_v26 = vpop.permute.xlu1 %378  ;;  %v2976_v55 = vpop.permute.xlu0 %356 }
 0x182   :  { %4489 = vst [vmem:[#allocation44_spill] sm:$0xff] %v2974_v26 }
 0x183   :  { %966 = vrot.lane.b32.xlu1 %v960_v50, %s2531_s9  ;;  %948 = vrot.lane.b32.xlu0 %v940_v51, %s2531_s9  ;;  %v983_v50 = vmul.f32 %v981_v48, %v2580_v37  ;;  %v982_v51 = vmul.f32 %v981_v48, %v2612_v49 }
 0x185   :  { %v2982_v6 = vpop.permute.xlu1 %422  ;;  %v2984_v18 = vpop.permute.xlu0 %400 }
 0x186   :  { %4490 = vst [vmem:[#allocation45_spill] sm:$0xff] %v2982_v6  ;;  %4491 = vst [vmem:[#allocation46_spill] sm:$0xff] %v2984_v18  ;;  %v1234_v18 = vstv %s2383_s25  ;;  %s3568_s25 = sld [smem:[#allocation7 + $0x37]] }
 0x187   :  { %970 = vrot.lane.b32.xlu1 %v962_v20, %s2531_s9  ;;  %968 = vrot.lane.b32.xlu0 %v961_v25, %s2531_s9  ;;  %v1004_v20 = vmul.f32 %v1003_v46, %v2612_v49  ;;  %v984_v25 = vmul.f32 %v981_v48, %v2633_v56 }
 0x189   :  { %v2990_v2 = vpop.permute.xlu1 %466  ;;  %v2992_v7 = vpop.permute.xlu0 %444 }
 0x18a   :  { %4492 = vst [vmem:[#allocation47_spill] sm:$0xff] %v2990_v2  ;;  %4493 = vst [vmem:[#allocation48_spill] sm:$0xff] %v2992_v7 }
 0x18b   :  { %990 = vrot.lane.b32.xlu1 %v983_v50, %s2531_s9  ;;  %988 = vrot.lane.b32.xlu0 %v982_v51, %s2531_s9  ;;  %v1006_v50 = vmul.f32 %v1003_v46, %v2633_v56  ;;  %v1005_v51 = vmul.f32 %v1003_v46, %v2580_v37 }
 0x18d   :  { %v2998_v36 = vpop.permute.xlu1 %509  ;;  %v3000_v42 = vpop.permute.xlu0 %487 }
 0x18f   :  { %1010 = vrot.lane.b32.xlu1 %v1004_v20, %s2531_s9  ;;  %992 = vrot.lane.b32.xlu0 %v984_v25, %s2531_s9  ;;  %v1027_v20 = vmul.f32 %v1025_v38, %v2580_v37  ;;  %v1026_v25 = vmul.f32 %v1025_v38, %v2612_v49 }
 0x191   :  { %v3006_v57 = vpop.permute.xlu1 %553  ;;  %v3008_v7 = vpop.permute.xlu0 %531 }
 0x192   :  { %4494 = vst [vmem:[#allocation49_spill] sm:$0xff] %v3006_v57  ;;  %4495 = vst [vmem:[#allocation50_spill] sm:$0xff] %v3008_v7  ;;  %v1190_v57 = vstv %s2381_s21  ;;  %s3353_s21 = sld [smem:[#allocation7 + $0x33]] }
 0x193   :  { %1014 = vrot.lane.b32.xlu1 %v1006_v50, %s2531_s9  ;;  %1012 = vrot.lane.b32.xlu0 %v1005_v51, %s2531_s9  ;;  %v1048_v50 = vmul.f32 %v1047_v14, %v2612_v49  ;;  %v1028_v51 = vmul.f32 %v1025_v38, %v2633_v56 }
 0x195   :  { %v3014_v19 = vpop.permute.xlu1 %597  ;;  %v3016_v48 = vpop.permute.xlu0 %575 }
 0x196   :  { %4496 = vst [vmem:[#allocation51_spill] sm:$0xff] %v3014_v19  ;;  %4497 = vst [vmem:[#allocation52_spill] sm:$0xff] %v3016_v48 }
 0x197   :  { %1034 = vrot.lane.b32.xlu1 %v1027_v20, %s2531_s9  ;;  %1032 = vrot.lane.b32.xlu0 %v1026_v25, %s2531_s9  ;;  %v1050_v20 = vmul.f32 %v1047_v14, %v2633_v56  ;;  %v1049_v25 = vmul.f32 %v1047_v14, %v2580_v37  ;;  %v1146_v37 = vstv %s2379_s19  ;;  %s3263_s19 = sld [smem:[#allocation7 + $0x55]] }
 0x199   :  { %v3022_v46 = vpop.permute.xlu1 %621  ;;  %v3024_v59 = vpop.permute.xlu0 %619 }
 0x19a   :  { %4498 = vst [vmem:[#allocation53_spill] sm:$0xff] %v3022_v46  ;;  %4499 = vst [vmem:[#allocation54_spill] sm:$0xff] %v3024_v59  ;;  %v1126_v46 = vstv %s2378_s18  ;;  %s3234_s18 = sld [smem:[#allocation7 + $0x34]] }
 0x19b   :  { %1054 = vrot.lane.b32.xlu1 %v1048_v50, %s2531_s9  ;;  %1036 = vrot.lane.b32.xlu0 %v1028_v51, %s2531_s9  ;;  %v1128_v50 = vmul.f32 %v1126_v46, %v2573_v31  ;;  %v1127_v51 = vmul.f32 %v1126_v46, %v3036_v9  ;;  %v1129_v48 = vmul.f32 %v1126_v46, %v3046_v29 }
 0x19d   :  { %v3030_v19 = vpop.permute.xlu1 %640  ;;  %v3032_v45 = vpop.permute.xlu0 %638 }
 0x19f   :  { %1058 = vrot.lane.b32.xlu1 %v1050_v20, %s2531_s9  ;;  %1056 = vrot.lane.b32.xlu0 %v1049_v25, %s2531_s9  ;;  %v1147_v25 = vmul.f32 %v1146_v37, %v3036_v9 }
 0x1a1   :  { %v3040_v49 = vpop.permute.xlu1 %660  ;;  %v3042_v38 = vpop.permute.xlu0 %642 }
 0x1a3   :  { %1135 = vrot.lane.b32.xlu1 %v1128_v50, %s2526_s10  ;;  %1133 = vrot.lane.b32.xlu0 %v1127_v51, %s2526_s10  ;;  %v1149_v50 = vmul.f32 %v1146_v37, %v3046_v29  ;;  %v1148_v51 = vmul.f32 %v1146_v37, %v2573_v31 }
 0x1a5   :  { %v3050_v14 = vpop.permute.xlu1 %664  ;;  %v3052_v20 = vpop.permute.xlu0 %662 }
 0x1a6   :  { %4500 = vst [vmem:[#allocation55_spill] sm:$0xff] %v3050_v14 }
 0x1a7   :  { %1153 = vrot.lane.b32.xlu1 %v1147_v25, %s2526_s10  ;;  %1137 = vrot.lane.b32.xlu0 %v1129_v48, %s2526_s10  ;;  %v1170_v48 = vmul.f32 %v1168_v54, %v2573_v31  ;;  %v1169_v25 = vmul.f32 %v1168_v54, %v3036_v9 }
 0x1a9   :  { %v3058_v58 = vpop.permute.xlu1 %684  ;;  %v3060_v6 = vpop.permute.xlu0 %682 }
 0x1aa   :  { %4501 = vst [vmem:[#allocation56_spill] sm:$0xff] %v3058_v58  ;;  %4502 = vst [vmem:[#allocation57_spill] sm:$0xff] %v3060_v6  ;;  %v2454_v6 = vld [vmem:[#allocation2 + $0x10] sm:$0xff] }
 0x1ab   :  { %1157 = vrot.lane.b32.xlu1 %v1149_v50, %s2526_s10  ;;  %1155 = vrot.lane.b32.xlu0 %v1148_v51, %s2526_s10  ;;  %v1191_v50 = vmul.f32 %v1190_v57, %v3036_v9  ;;  %v1171_v51 = vmul.f32 %v1168_v54, %v3046_v29 }
 0x1ad   :  { %v3066_v30 = vpop.permute.xlu1 %704  ;;  %v3068_v46 = vpop.permute.xlu0 %686 }
 0x1ae   :  { %4503 = vst [vmem:[#allocation58_spill] sm:$0xff] %v3066_v30  ;;  %4504 = vst [vmem:[#allocation59_spill] sm:$0xff] %v3068_v46 }
 0x1af   :  { %1177 = vrot.lane.b32.xlu1 %v1170_v48, %s2526_s10  ;;  %1175 = vrot.lane.b32.xlu0 %v1169_v25, %s2526_s10  ;;  %v1193_v48 = vmul.f32 %v1190_v57, %v3046_v29  ;;  %v1192_v25 = vmul.f32 %v1190_v57, %v2573_v31 }
 0x1b1   :  { %v3074_v37 = vpop.permute.xlu1 %708  ;;  %v3076_v4 = vpop.permute.xlu0 %706 }
 0x1b2   :  { %4505 = vst [vmem:[#allocation60_spill] sm:$0xff] %v3074_v37  ;;  %4506 = vst [vmem:[#allocation61_spill] sm:$0xff] %v3076_v4  ;;  %v1212_v37 = vstv %s2382_s22  ;;  %s3456_s22 = sld [smem:[#allocation7 + $0x35]] }
 0x1b3   :  { %1197 = vrot.lane.b32.xlu1 %v1191_v50, %s2526_s10  ;;  %1179 = vrot.lane.b32.xlu0 %v1171_v51, %s2526_s10  ;;  %v1214_v50 = vmul.f32 %v1212_v37, %v2573_v31  ;;  %v1213_v51 = vmul.f32 %v1212_v37, %v3036_v9 }
 0x1b5   :  { %v3082_v30 = vpop.permute.xlu1 %728  ;;  %v3084_v46 = vpop.permute.xlu0 %726 }
 0x1b6   :  { %4507 = vst [vmem:[#allocation62_spill] sm:$0xff] %v3082_v30  ;;  %4508 = vst [vmem:[#allocation63_spill] sm:$0xff] %v3084_v46  ;;  %v1298_v30 = vstv %s2386_s23  ;;  %s3498_s23 = sld [smem:[#allocation7 + $0x4b]] }
 0x1b7   :  { %1201 = vrot.lane.b32.xlu1 %v1193_v48, %s2526_s10  ;;  %1199 = vrot.lane.b32.xlu0 %v1192_v25, %s2526_s10  ;;  %v1300_v48 = vmul.f32 %v1298_v30, %v2573_v31  ;;  %v1299_v25 = vmul.f32 %v1298_v30, %v3036_v9 }
 0x1b9   :  { %v3090_v4 = vpop.permute.xlu1 %748  ;;  %v3092_v54 = vpop.permute.xlu0 %730 }
 0x1ba   :  { %4509 = vst [vmem:[#allocation64_spill] sm:$0xff] %v3090_v4  ;;  %4510 = vst [vmem:[#allocation65_spill] sm:$0xff] %v3092_v54 }
 0x1bb   :  { %1221 = vrot.lane.b32.xlu1 %v1214_v50, %s2526_s10  ;;  %1219 = vrot.lane.b32.xlu0 %v1213_v51, %s2526_s10  ;;  %v1215_v50 = vmul.f32 %v1212_v37, %v3046_v29  ;;  %v1301_v51 = vmul.f32 %v1298_v30, %v3046_v29  ;;  %v1450_v37 = vstv %s2393_s0  ;;  %s3555_s0 = sld [smem:[#allocation7 + $0x51]] }
 0x1bd   :  { %v3098_v57 = vpop.permute.xlu1 %752  ;;  %v3100_v46 = vpop.permute.xlu0 %750 }
 0x1be   :  { %4511 = vst [vmem:[#allocation66_spill] sm:$0xff] %v3098_v57  ;;  %4512 = vst [vmem:[#allocation67_spill] sm:$0xff] %v3100_v46  ;;  %v1320_v57 = vstv %s2387_s24  ;;  %s3518_s24 = sld [smem:[#allocation7 + $0x36]] }
 0x1bf   :  { %1307 = vrot.lane.b32.xlu1 %v1300_v48, %s2527_s11  ;;  %1305 = vrot.lane.b32.xlu0 %v1299_v25, %s2527_s11  ;;  %v1322_v48 = vmul.f32 %v1320_v57, %v2573_v31  ;;  %v1321_v25 = vmul.f32 %v1320_v57, %v3036_v9 }
 0x1c1   :  { %v3106_v4 = vpop.permute.xlu1 %772  ;;  %v3108_v54 = vpop.permute.xlu0 %770 }
 0x1c2   :  { %4513 = vst [vmem:[#allocation68_spill] sm:$0xff] %v3106_v4 }
 0x1c3   :  { %1223 = vrot.lane.b32.xlu1 %v1215_v50, %s2526_s10  ;;  %1309 = vrot.lane.b32.xlu0 %v1301_v51, %s2527_s11  ;;  %v1451_v50 = vmul.f32 %v1450_v37, %v3036_v9  ;;  %v1323_v51 = vmul.f32 %v1320_v57, %v3046_v29 }
 0x1c5   :  { %v3114_v46 = vpop.permute.xlu1 %791  ;;  %v3116_v60 = vpop.permute.xlu0 %774 }
 0x1c6   :  { %4514 = vst [vmem:[#allocation69_spill] sm:$0xff] %v3116_v60 }
 0x1c7   :  { %1329 = vrot.lane.b32.xlu1 %v1322_v48, %s2527_s11  ;;  %1327 = vrot.lane.b32.xlu0 %v1321_v25, %s2527_s11  ;;  %v1453_v48 = vmul.f32 %v1450_v37, %v3046_v29  ;;  %v1452_v25 = vmul.f32 %v1450_v37, %v2573_v31  ;;  %v1364_v37 = vstv %s2389_s26  ;;  %s2408_s26 = sld [smem:[#allocation7 + $0x56]] }
 0x1c8   :  { %v1365_v10 = vmul.f32 %v1364_v37, %v3036_v9 }
 0x1c9   :  { %v3122_v30 = vpop.permute.xlu1 %795  ;;  %v3124_v39 = vpop.permute.xlu0 %793 }
 0x1ca   :  { %4515 = vst [vmem:[#allocation70_spill] sm:$0xff] %v3122_v30  ;;  %v1256_v30 = vstv %s3166_s12  ;;  %s2412_s12 = sld [smem:[#allocation7 + $0x5a]] }
 0x1cb   :  { %1457 = vrot.lane.b32.xlu1 %v1451_v50, %s2528_s17  ;;  %1331 = vrot.lane.b32.xlu0 %v1323_v51, %s2527_s11  ;;  %v1236_v50 = vmul.f32 %v1234_v18, %v2573_v31  ;;  %v1235_v51 = vmul.f32 %v1234_v18, %v3036_v9  ;;  %v1237_v31 = vmul.f32 %v1234_v18, %v3046_v29  ;;  %v1472_v18 = vstv %s2394_s27  ;;  %s2414_s27 = sld [smem:[#allocation7 + $0x5c]] }
 0x1cc   :  { %v1475_v14 = vmul.f32 %v1472_v18, %v3046_v29 }
 0x1cd   :  { %v3130_v60 = vpop.permute.xlu1 %815  ;;  %v3132_v33 = vpop.permute.xlu0 %813 }
 0x1ce   :  { %4516 = vst [vmem:[#allocation71_spill] sm:$0xff] %v3130_v60  ;;  %4517 = vst [vmem:[#allocation72_spill] sm:$0xff] %v3132_v33  ;;  %v2455_v33 = vld [vmem:[#allocation2] sm:$0xff]  ;;  %v4535_v60 = vstv %s3152_s7 }
 0x1cf   :  { %1461 = vrot.lane.b32.xlu1 %v1453_v48, %s2528_s17  ;;  %1459 = vrot.lane.b32.xlu0 %v1452_v25, %s2528_s17  ;;  %v98_v12 = vmul.f32 %v2455_v33, %v4535_v60 }
 0x1d1   :  { %v3138_v21 = vpop.permute.xlu1 %835  ;;  %v3140_v57 = vpop.permute.xlu0 %817 }
 0x1d2   :  { %4518 = vst [vmem:[#allocation73_spill] sm:$0xff] %v3138_v21  ;;  %4519 = vst [vmem:[#allocation74_spill] sm:$0xff] %v3140_v57  ;;  %v3163_v21 = vld [vmem:[#allocation2 + $0x20] sm:$0xff] }
 0x1d3   :  { %1243 = vrot.lane.b32.xlu1 %v1236_v50, %s2526_s10  ;;  %1241 = vrot.lane.b32.xlu0 %v1235_v51, %s2526_s10  ;;  %v1474_v5 = vmul.f32 %v3163_v21, %v1472_v18 }
 0x1d5   :  { %v3146_v48 = vpop.permute.xlu1 %839  ;;  %v3148_v25 = vpop.permute.xlu0 %837 }
 0x1d6   :  { %4520 = vst [vmem:[#allocation75_spill] sm:$0xff] %v3146_v48  ;;  %4521 = vst [vmem:[#allocation76_spill] sm:$0xff] %v3148_v25  ;;  %v1367_v48 = vmul.f32 %v1364_v37, %v3046_v29  ;;  %v1366_v25 = vmul.f32 %v3163_v21, %v1364_v37  ;;  %v3179_v37 = vstv %s2324_s3  ;;  %s2410_s3 = sld [smem:[#allocation7 + $0x58]] }
 0x1d7   :  { %1371 = vrot.lane.b32.xlu1 %v1365_v10, %s2527_s11  ;;  %1245 = vrot.lane.b32.xlu0 %v1237_v31, %s2526_s10  ;;  %v3170_v10 = vstv %s2323_s28  ;;  %v3172_v31 = vstv %s2325_s29  ;;  %4528 = vst [vmem:[#allocation83_spill] sm:$0xff] %v3179_v37  ;;  %v3204_v58 = vmul.f32 %v3179_v37, %v2633_v56  ;;  %s2398_s28 = sld [smem:[#allocation7 + $0x4c]]  ;;  %s2404_s29 = sld [smem:[#allocation7 + $0x52]] }
 0x1d8   :  { %4524 = vst [vmem:[#allocation79_spill] sm:$0xff] %v3170_v10  ;;  %4525 = vst [vmem:[#allocation80_spill] sm:$0xff] %v3172_v31  ;;  %v104_v60 = vmul.f32 %v2455_v33, %v3170_v10 }
 0x1d9   :  { %v3158_v50 = vpop.permute.xlu1 %859  ;;  %v3160_v51 = vpop.permute.xlu0 %857 }
 0x1da   :  { %4522 = vst [vmem:[#allocation77_spill] sm:$0xff] %v3158_v50  ;;  %4523 = vst [vmem:[#allocation78_spill] sm:$0xff] %v3160_v51 }
 0x1db   :  { %1375 = vrot.lane.b32.xlu1 %v1367_v48, %s2527_s11  ;;  %1373 = vrot.lane.b32.xlu0 %v1366_v25, %s2527_s11  ;;  %v1473_v48 = vmul.f32 %v1472_v18, %v3036_v9  ;;  %v3190_v25 = vmul.f32 %v3170_v10, %v2633_v56  ;;  %v1259_v10 = vmul.f32 %v1256_v30, %v3046_v29 }
 0x1dd   :  { %v3174_v50 = vpop.permute.xlu1 %879  ;;  %v3176_v51 = vpop.permute.xlu0 %861 }
 0x1de   :  { %4526 = vst [vmem:[#allocation81_spill] sm:$0xff] %v3174_v50  ;;  %4527 = vst [vmem:[#allocation82_spill] sm:$0xff] %v3176_v51  ;;  %v3194_v50 = vmul.f32 %v3172_v31, %v2633_v56  ;;  %v3196_v51 = vstv %s2328_s6  ;;  %s2411_s6 = sld [smem:[#allocation7 + $0x59]] }
 0x1df   :  { %4532 = vst [vmem:[#allocation87_spill] sm:$0xff] %v3196_v51  ;;  %1481 = vrot.lane.b32.xlu1 %v1474_v5, %s2528_s17  ;;  %1479 = vrot.lane.b32.xlu0 %v1473_v48, %s2528_s17  ;;  %v3215_v5 = vmul.f32 %v2454_v6, %v3183_v40  ;;  %v3218_v57 = vmul.f32 %v2454_v6, %v3196_v51 }
 0x1e0   :  { %4531 = vst [vmem:[#allocation86_spill] sm:$0xff] %v3194_v50  ;;  %v1602_v50 = vstv %s3156_s8  ;;  %v3228_v48 = vmul.f32 %v2455_v33, %v3179_v37  ;;  %v165_v6 = vsel %vm164_vm3, %v2767_v44, %v2934_v1  ;;  %v3244_v37 = vmul.f32 %v2455_v33, %v3172_v31  ;;  %s2417_s8 = sld [smem:[#allocation7 + $0x5f]] }
 0x1e1   :  { %4534 = vst [vmem:[#allocation89_spill] sm:$0xff] %v3218_v57  ;;  %v3222_v7 = vpop.permute.xlu1 %883  ;;  %v3224_v56 = vpop.permute.xlu0 %881  ;;  %v1603_v63 = vmul.f32 %v1602_v50, %v3036_v9  ;;  %v3248_v18 = vmul.f32 %v2455_v33, %v3196_v51  ;;  %v3251_v57 = vmul.f32 %v2455_v33, %v3181_v32  ;;  %v1605_v44 = vmul.f32 %v1602_v50, %v3046_v29 }
 0x1e2   :  { %4536 = vst [vmem:[#allocation90_spill] sm:$0xff] %v3222_v7  ;;  %4537 = vst [vmem:[#allocation91_spill] sm:$0xff] %v3224_v56  ;;  %v3241_v7 = vmul.f32 %v2455_v33, %v3183_v40  ;;  %v318_v1 = vsel %vm317_vm4, %v2814_v13, %v2968_v11  ;;  %v1258_v51 = vmul.f32 %v3163_v21, %v1256_v30  ;;  %v1386_v32 = vstv %s3186_s13  ;;  %s2418_s13 = sld [smem:[#allocation7 + $0x60]] }
 0x1e3   :  { %1609 = vrot.lane.b32.xlu1 %v1603_v63, %s2529_s1  ;;  %4538 = vst [vmem:[#allocation92_spill] sm:$0xff] %v3248_v18  ;;  %1483 = vrot.lane.b32.xlu0 %v1475_v14, %s2528_s17  ;;  %v1604_v63 = vmul.f32 %v3163_v21, %v1602_v50  ;;  %v1257_v40 = vmul.f32 %v1256_v30, %v3036_v9  ;;  %v3300_v18 = vstv %s3234_s18  ;;  %s2399_s18 = sld [smem:[#allocation7 + $0x4d]] }
 0x1e4   :  { %v169_v33 = vadd.f32 %v165_v6, %v98_v12  ;;  %v185_v13 = vsel %vm164_vm3, %v2765_v43, %v2944_v17  ;;  %v471_v50 = vsel %vm470_vm5, %v2880_v62, %v2990_v2  ;;  %v1387_v12 = vmul.f32 %v1386_v32, %v3036_v9  ;;  %4542 = vst [vmem:[#allocation96_spill] sm:$0xff] %v3300_v18 }
 0x1e5   :  { %v3258_v31 = vpop.permute.xlu1 %903  ;;  %v3265_v14 = vpop.permute.xlu0 %901  ;;  %v3280_v6 = vstv %s3200_s14  ;;  %v1389_v30 = vmul.f32 %v1386_v32, %v3046_v29  ;;  %v338_v43 = vsel %vm317_vm4, %v2832_v24, %v2966_v8  ;;  %v624_v62 = vsel %vm623_vm6, %v2926_v41, %v3024_v59  ;;  %s2419_s14 = sld [smem:[#allocation7 + $0x61]] }
 0x1e6   :  { %4539 = vst [vmem:[#allocation93_spill] sm:$0xff] %v3258_v31  ;;  %4540 = vst [vmem:[#allocation94_spill] sm:$0xff] %v3265_v14  ;;  %v322_v11 = vadd.f32 %v318_v1, %v169_v33  ;;  %v1516_v14 = vstv %s3212_s15  ;;  %v3293_v2 = vmul.f32 %v3280_v6, %v3036_v9  ;;  %v1388_v1 = vmul.f32 %v3163_v21, %v1386_v32  ;;  %s2385_s15 = sld [smem:[#allocation7 + $0x3f]] }
 0x1e7   :  { %1613 = vrot.lane.b32.xlu1 %v1605_v44, %s2529_s1  ;;  %1611 = vrot.lane.b32.xlu0 %v1604_v63, %s2529_s1  ;;  %v190_v33 = vadd.f32 %v185_v13, %v104_v60  ;;  %v1624_v31 = vstv %s3232_s16  ;;  %v491_v24 = vsel %vm470_vm5, %v2878_v61, %v3000_v42  ;;  %v777_v41 = vsel %vm776_vm7, %v3108_v54, %v3106_v4  ;;  %s2392_s16 = sld [smem:[#allocation7 + $0x46]] }
 0x1e8   :  { %v475_v63 = vadd.f32 %v471_v50, %v322_v11  ;;  %v1518_v32 = vmul.f32 %v3163_v21, %v1516_v14  ;;  %v3311_v11 = vmul.f32 %v1516_v14, %v3036_v9  ;;  %v3315_v50 = vmul.f32 %v1624_v31, %v3036_v9 }
 0x1e9   :  { %v924_v44 = vpop.permute.xlu1 %923  ;;  %v3296_v17 = vpop.permute.xlu0 %905  ;;  %v343_v60 = vadd.f32 %v338_v43, %v190_v33  ;;  %v192_v61 = vadd.f32 %v2774_v47, %v3190_v25  ;;  %v644_v54 = vsel %vm623_vm6, %v3032_v45, %v3030_v19  ;;  %v3325_v4 = vmul.f32 %v1516_v14, %v3046_v29 }
 0x1ea   :  { %4541 = vst [vmem:[#allocation95_spill] sm:$0xff] %v3296_v17  ;;  %v628_v13 = vadd.f32 %v624_v62, %v475_v63  ;;  %v3328_v43 = vstv %s3263_s19  ;;  %v3334_v63 = vmul.f32 %v3300_v18, %v3036_v9  ;;  %v4419_v25 = vstv %s3269_s20  ;;  %s2406_s19 = sld [smem:[#allocation7 + $0x54]] }
 0x1eb   :  { %1265 = vrot.lane.b32.xlu1 %v1258_v51, %s2526_s10  ;;  %1263 = vrot.lane.b32.xlu0 %v1257_v40, %s2526_s10  ;;  %v496_v40 = vadd.f32 %v491_v24, %v343_v60  ;;  %v345_v59 = vadd.f32 %v2840_v28, %v192_v61  ;;  %v207_v45 = vsel %vm164_vm3, %v2784_v53, %v2942_v16 }
 0x1ec   :  { %v781_v62 = vadd.f32 %v777_v41, %v628_v13  ;;  %v797_v14 = vsel %vm776_vm7, %v3114_v46, %v3124_v39  ;;  %v214_v41 = vadd.f32 %v2792_v0, %v3204_v58  ;;  %v1073_v61 = vmul.f32 %v4419_v25, %v3036_v9 }
 0x1ed   :  { %v3322_v51 = vpop.permute.xlu1 %927  ;;  %v3330_v33 = vpop.permute.xlu0 %925  ;;  %v649_v60 = vadd.f32 %v644_v54, %v496_v40  ;;  %v498_v53 = vadd.f32 %v2886_v3, %v345_v59  ;;  %v360_v46 = vsel %vm317_vm4, %v2830_v23, %v2976_v55  ;;  %v3365_v58 = vmul.f32 %v3163_v21, %v1624_v31 }
 0x1ee   :  { %4543 = vst [vmem:[#allocation97_spill] sm:$0xff] %v3322_v51  ;;  %4544 = vst [vmem:[#allocation98_spill] sm:$0xff] %v3330_v33  ;;  %v930_v24 = vsel %vm929_vm8, %v924_v44, %v3330_v33  ;;  %v212_v54 = vadd.f32 %v207_v45, %v3228_v48  ;;  %v229_v23 = vsel %vm164_vm3, %v2782_v52, %v2952_v35  ;;  %v4562_v51 = vld [vmem:[#allocation73_spill] sm:$0xff] }
 0x1ef   :  { %1393 = vrot.lane.b32.xlu1 %v1387_v12, %s2527_s11  ;;  %v934_v13 = vadd.f32 %v930_v24, %v781_v62  ;;  %1267 = vrot.lane.b32.xlu0 %v1259_v10, %s2526_s10  ;;  %v3362_v12 = vmul.f32 %v1624_v31, %v3046_v29  ;;  %v367_v10 = vadd.f32 %v2838_v27, %v214_v41  ;;  %s3398_s10 = sld [smem:[#allocation7 + $0x45]] }
 0x1f0   :  { %v802_v40 = vadd.f32 %v797_v14, %v649_v60  ;;  %v513_v59 = vsel %vm470_vm5, %v2896_v15, %v2998_v36  ;;  %v651_v25 = vadd.f32 %v3042_v38, %v498_v53  ;;  %v365_v45 = vadd.f32 %v360_v46, %v212_v54  ;;  %v4546_v60 = vld [vmem:[#allocation70_spill] sm:$0xff]  ;;  %v4547_v46 = vld [vmem:[#allocation55_spill] sm:$0xff] }
 0x1f1   :  { %v3359_v44 = vpop.permute.xlu1 %946  ;;  %v945_v62 = vpop.permute.xlu0 %944  ;;  %v3369_v24 = vadd.f32 %v1073_v61, %v934_v13  ;;  %v520_v48 = vadd.f32 %v2904_v22, %v367_v10  ;;  %v3385_v52 = vmul.f32 %v3163_v21, %v3328_v43  ;;  %v382_v15 = vsel %vm317_vm4, %v2848_v34, %v2974_v26 }
 0x1f2   :  { %v950_v31 = vsel %vm929_vm8, %v945_v62, %v3359_v44  ;;  %v666_v41 = vsel %vm623_vm6, %v3040_v49, %v3052_v20  ;;  %v3396_v61 = vmul.f32 %v3328_v43, %v3036_v9  ;;  %v518_v53 = vadd.f32 %v513_v59, %v365_v45  ;;  %v4548_v49 = vld [vmem:[#allocation50_spill] sm:$0xff]  ;;  %v4550_v62 = vld [vmem:[#allocation71_spill] sm:$0xff] }
 0x1f3   :  { %4545 = vst [vmem:[#allocation99_spill] sm:$0xff] %v3369_v24  ;;  %1397 = vrot.lane.b32.xlu1 %v1389_v30, %s2527_s11  ;;  %v955_v14 = vadd.f32 %v950_v31, %v802_v40  ;;  %1395 = vrot.lane.b32.xlu0 %v1388_v1, %s2527_s11  ;;  %v804_v30 = vadd.f32 %v4546_v60, %v651_v25  ;;  %v4549_v25 = vld [vmem:[#allocation29_spill] sm:$0xff]  ;;  %v4551_v31 = vld [vmem:[#allocation72_spill] sm:$0xff]  ;;  %v4552_v59 = vld [vmem:[#allocation74_spill] sm:$0xff]  ;;  %v3421_v45 = vstv %s3353_s21  ;;  %s2413_s21 = sld [smem:[#allocation7 + $0x5b]] }
 0x1f4   :  { %v234_v1 = vadd.f32 %v229_v23, %v3244_v37  ;;  %v673_v10 = vadd.f32 %v4547_v46, %v520_v48  ;;  %v535_v40 = vsel %vm470_vm5, %v4549_v25, %v4548_v49  ;;  %v819_v26 = vsel %vm776_vm7, %v4551_v31, %v4550_v62  ;;  %4553 = vst [vmem:[#allocation70_spill] sm:$0xff] %v3421_v45  ;;  %v4555_v25 = vld [vmem:[#allocation13_spill] sm:$0xff]  ;;  %v4556_v31 = vld [vmem:[#allocation56_spill] sm:$0xff] }
 0x1f5   :  { %v967_v13 = vpop.permute.xlu1 %966  ;;  %v3403_v34 = vadd.f32 %v3293_v2, %v955_v14  ;;  %v3405_v54 = vpop.permute.xlu0 %948  ;;  %v1081_v37 = vmul.f32 %v3280_v6, %v3046_v29  ;;  %v671_v2 = vadd.f32 %v666_v41, %v518_v53  ;;  %v4554_v14 = vld [vmem:[#allocation86_spill] sm:$0xff]  ;;  %v4557_v24 = vld [vmem:[#allocation57_spill] sm:$0xff] }
 0x1f6   :  { %v957_v35 = vadd.f32 %v3405_v54, %v804_v30  ;;  %v387_v23 = vadd.f32 %v382_v15, %v234_v1  ;;  %v826_v48 = vadd.f32 %v4552_v59, %v673_v10  ;;  %v236_v49 = vadd.f32 %v4555_v25, %v4554_v14  ;;  %v4558_v14 = vld [vmem:[#allocation23_spill] sm:$0xff] }
 0x1f7   :  { %1525 = vrot.lane.b32.xlu1 %v1518_v32, %s2528_s17  ;;  %1523 = vrot.lane.b32.xlu0 %v3311_v11, %s2528_s17  ;;  %v688_v30 = vsel %vm623_vm6, %v4557_v24, %v4556_v31  ;;  %v1087_v15 = vmul.f32 %v3421_v45, %v3036_v9  ;;  %v824_v1 = vadd.f32 %v819_v26, %v671_v2  ;;  %v4559_v24 = vld [vmem:[#allocation39_spill] sm:$0xff] }
 0x1f8   :  { %v3430_v33 = vadd.f32 %v1081_v37, %v957_v35  ;;  %v540_v41 = vadd.f32 %v535_v40, %v387_v23  ;;  %v1089_v10 = vmul.f32 %v3421_v45, %v3046_v29  ;;  %v389_v25 = vadd.f32 %v4558_v14, %v236_v49  ;;  %v4560_v31 = vld [vmem:[#allocation15_spill] sm:$0xff]  ;;  %v4561_v37 = vld [vmem:[#allocation76_spill] sm:$0xff]  ;;  %v4563_v40 = vld [vmem:[#allocation17_spill] sm:$0xff] }
 0x1f9   :  { %v3428_v32 = vpop.permute.xlu1 %970  ;;  %v3435_v53 = vpop.permute.xlu0 %968  ;;  %v251_v35 = vsel %vm164_vm3, %v4560_v31, %v4559_v24  ;;  %v841_v62 = vsel %vm776_vm7, %v4562_v51, %v4561_v37  ;;  %v258_v23 = vadd.f32 %v4563_v40, %v3215_v5  ;;  %v4565_v31 = vld [vmem:[#allocation30_spill] sm:$0xff]  ;;  %v4567_v14 = vld [vmem:[#allocation21_spill] sm:$0xff]  ;;  %v1757_v5 = vmul.f32 %v3328_v43, %v3046_v29  ;;  %v4574_v40 = vld [vmem:[#allocation59_spill] sm:$0xff] }
 0x1fa   :  { %v979_v11 = vadd.f32 %v3428_v32, %v826_v48  ;;  %v972_v26 = vsel %vm929_vm8, %v967_v13, %v3435_v53  ;;  %v693_v2 = vadd.f32 %v688_v30, %v540_v41  ;;  %v542_v51 = vadd.f32 %v4565_v31, %v389_v25  ;;  %v4566_v37 = vld [vmem:[#allocation46_spill] sm:$0xff] }
 0x1fb   :  { %1631 = vrot.lane.b32.xlu1 %v3315_v50, %s2529_s1  ;;  %v977_v48 = vadd.f32 %v972_v26, %v824_v1  ;;  %1527 = vrot.lane.b32.xlu0 %v3325_v4, %s2528_s17  ;;  %v404_v13 = vsel %vm317_vm4, %v4567_v14, %v4566_v37  ;;  %v3465_v50 = vstv %s3398_s10  ;;  %v4569_v30 = vld [vmem:[#allocation22_spill] sm:$0xff]  ;;  %v256_v4 = vadd.f32 %v251_v35, %v3241_v7  ;;  %v4572_v14 = vld [vmem:[#allocation49_spill] sm:$0xff]  ;;  %s2532_s10 = smov 127  }
 0x1fc   :  { %v3454_v49 = vadd.f32 %v1089_v10, %v979_v11  ;;  %v411_v41 = vadd.f32 %v4569_v30, %v258_v23  ;;  %v846_v1 = vadd.f32 %v841_v62, %v693_v2  ;;  %v4570_v25 = vld [vmem:[#allocation42_spill] sm:$0xff]  ;;  %v695_v45 = vadd.f32 %v4574_v40, %v542_v51  ;;  %v4576_v2 = vld [vmem:[#allocation45_spill] sm:$0xff] }
 0x1fd   :  { %v3462_v24 = vpop.permute.xlu1 %990  ;;  %v989_v11 = vpop.permute.xlu0 %988  ;;  %v3471_v10 = vadd.f32 %v1087_v15, %v977_v48  ;;  %v4571_v26 = vld [vmem:[#allocation14_spill] sm:$0xff]  ;;  %v409_v15 = vadd.f32 %v404_v13, %v256_v4  ;;  %v1409_v23 = vmul.f32 %v3465_v50, %v3036_v9  ;;  %v4577_v48 = vld [vmem:[#allocation25_spill] sm:$0xff]  ;;  %v1411_v13 = vmul.f32 %v3465_v50, %v3046_v29  ;;  %v4581_v4 = vld [vmem:[#allocation60_spill] sm:$0xff] }
 0x1fe   :  { %4564 = vst [vmem:[#allocation55_spill] sm:$0xff] %v3454_v49  ;;  %4568 = vst [vmem:[#allocation29_spill] sm:$0xff] %v3462_v24  ;;  %v273_v31 = vsel %vm164_vm3, %v4571_v26, %v4570_v25  ;;  %v4573_v49 = vld [vmem:[#allocation32_spill] sm:$0xff]  ;;  %v994_v43 = vsel %vm929_vm8, %v989_v11, %v3462_v24  ;;  %v4575_v7 = vld [vmem:[#allocation34_spill] sm:$0xff] }
 0x1ff   :  { %v557_v37 = vsel %vm470_vm5, %v4573_v49, %v4572_v14  ;;  %1635 = vrot.lane.b32.xlu1 %v3362_v12, %s2529_s1  ;;  %v564_v62 = vadd.f32 %v4575_v7, %v411_v41  ;;  %v999_v35 = vadd.f32 %v994_v43, %v846_v1  ;;  %1633 = vrot.lane.b32.xlu0 %v3365_v58, %s2529_s1  ;;  %v4578_v51 = vld [vmem:[#allocation61_spill] sm:$0xff]  ;;  %v4579_v26 = vld [vmem:[#allocation58_spill] sm:$0xff]  ;;  %v4580_v24 = vld [vmem:[#allocation75_spill] sm:$0xff] }
 0x200   :  { %v426_v49 = vsel %vm317_vm4, %v4577_v48, %v4576_v2  ;;  %v710_v11 = vsel %vm623_vm6, %v4579_v26, %v4578_v51  ;;  %v848_v12 = vadd.f32 %v4580_v24, %v695_v45  ;;  %v278_v58 = vadd.f32 %v273_v31, %v3251_v57  ;;  %v4584_v26 = vld [vmem:[#allocation52_spill] sm:$0xff]  ;;  %v4585_v2 = vld [vmem:[#allocation31_spill] sm:$0xff]  ;;  %v4586_v24 = vld [vmem:[#allocation77_spill] sm:$0xff] }
 0x201   :  { %v1011_v40 = vpop.permute.xlu1 %1010  ;;  %v562_v41 = vadd.f32 %v557_v37, %v409_v15  ;;  %v717_v1 = vadd.f32 %v4581_v4, %v564_v62  ;;  %v3503_v43 = vadd.f32 %v3334_v63, %v999_v35  ;;  %v3505_v48 = vpop.permute.xlu0 %992  ;;  %v579_v45 = vsel %vm470_vm5, %v4585_v2, %v4584_v26  ;;  %v4587_v25 = vld [vmem:[#allocation78_spill] sm:$0xff]  ;;  %v4591_v35 = vld [vmem:[#allocation16_spill] sm:$0xff] }
 0x202   :  { %4583 = vst [vmem:[#allocation74_spill] sm:$0xff] %v3505_v48  ;;  %v863_v51 = vsel %vm776_vm7, %v4587_v25, %v4586_v24  ;;  %v1001_v14 = vadd.f32 %v3505_v48, %v848_v12  ;;  %v1097_v57 = vmul.f32 %v3300_v18, %v3046_v29  ;;  %v431_v63 = vadd.f32 %v426_v49, %v278_v58  ;;  %v4588_v31 = vld [vmem:[#allocation82_spill] sm:$0xff]  ;;  %v4590_v25 = vld [vmem:[#allocation88_spill] sm:$0xff] }
 0x203   :  { %4582 = vst [vmem:[#allocation72_spill] sm:$0xff] %v3503_v43  ;;  %1763 = vrot.lane.b32.xlu1 %v3385_v52, %s2530_s30  ;;  %v715_v37 = vadd.f32 %v710_v11, %v562_v41  ;;  %v870_v62 = vadd.f32 %v4588_v31, %v717_v1  ;;  %1761 = vrot.lane.b32.xlu0 %v3396_v61, %s2530_s30  ;;  %v3524_v15 = vstv %s3456_s22  ;;  %v4592_v12 = vld [vmem:[#allocation62_spill] sm:$0xff]  ;;  %v4593_v43 = vld [vmem:[#allocation63_spill] sm:$0xff]  ;;  %s2533_s22 = smov 126  }
 0x204   :  { %4589 = vst [vmem:[#allocation86_spill] sm:$0xff] %v3524_v15  ;;  %v280_v2 = vadd.f32 %v4591_v35, %v4590_v25  ;;  %v732_v52 = vsel %vm623_vm6, %v4593_v43, %v4592_v12  ;;  %v3533_v18 = vadd.f32 %v1097_v57, %v1001_v14  ;;  %v1103_v49 = vmul.f32 %v3524_v15, %v3036_v9  ;;  %v4597_v25 = vld [vmem:[#allocation27_spill] sm:$0xff]  ;;  %v4598_v43 = vld [vmem:[#allocation41_spill] sm:$0xff]  ;;  %v4599_v12 = vld [vmem:[#allocation18_spill] sm:$0xff] }
 0x205   :  { %v3531_v48 = vpop.permute.xlu1 %1014  ;;  %v584_v11 = vadd.f32 %v579_v45, %v431_v63  ;;  %v868_v58 = vadd.f32 %v863_v51, %v715_v37  ;;  %v3538_v41 = vpop.permute.xlu0 %1012  ;;  %v1105_v1 = vmul.f32 %v3524_v15, %v3046_v29  ;;  %v295_v14 = vsel %vm164_vm3, %v4599_v12, %v4598_v43  ;;  %v4600_v57 = vld [vmem:[#allocation81_spill] sm:$0xff]  ;;  %v4602_v63 = vld [vmem:[#allocation20_spill] sm:$0xff] }
 0x206   :  { %4594 = vst [vmem:[#allocation57_spill] sm:$0xff] %v3531_v48  ;;  %4595 = vst [vmem:[#allocation15_spill] sm:$0xff] %v3533_v18  ;;  %v1023_v61 = vadd.f32 %v3531_v48, %v870_v62  ;;  %v433_v26 = vadd.f32 %v4597_v25, %v280_v2  ;;  %v885_v18 = vsel %vm776_vm7, %v4600_v57, %v3224_v56  ;;  %v4601_v45 = vld [vmem:[#allocation89_spill] sm:$0xff]  ;;  %v4605_v57 = vld [vmem:[#allocation48_spill] sm:$0xff]  ;;  %v3582_v43 = vstv %s3518_s24  ;;  %s2535_s24 = smov 123  }
 0x207   :  { %4596 = vst [vmem:[#allocation73_spill] sm:$0xff] %v3538_v41  ;;  %v1016_v51 = vsel %vm929_vm8, %v1011_v40, %v3538_v41  ;;  %1415 = vrot.lane.b32.xlu1 %v1409_v23, %s2527_s11  ;;  %v302_v37 = vadd.f32 %v4602_v63, %v4601_v45  ;;  %v737_v62 = vadd.f32 %v732_v52, %v584_v11  ;;  %v4604_v12 = vld [vmem:[#allocation33_spill] sm:$0xff]  ;;  %v4606_v56 = vld [vmem:[#allocation24_spill] sm:$0xff]  ;;  %v1538_v52 = vstv %s3498_s23  ;;  %s2534_s23 = smov 124  }
 0x208   :  { %v1021_v15 = vadd.f32 %v1016_v51, %v868_v58  ;;  %1765 = vrot.lane.b32.xlu0 %v1757_v5, %s2530_s30  ;;  %v3557_v2 = vadd.f32 %v1105_v1, %v1023_v61  ;;  %v586_v25 = vadd.f32 %v4604_v12, %v433_v26  ;;  %v448_v40 = vsel %vm317_vm4, %v4606_v56, %v4605_v57  ;;  %v4608_v5 = vld [vmem:[#allocation26_spill] sm:$0xff]  ;;  %v4609_v58 = vld [vmem:[#allocation92_spill] sm:$0xff]  ;;  %v4611_v26 = vld [vmem:[#allocation51_spill] sm:$0xff] }
 0x209   :  { %v3563_v35 = vpop.permute.xlu1 %1034  ;;  %v1410_v23 = vmul.f32 %v3163_v21, %v3465_v50  ;;  %v455_v11 = vadd.f32 %v4608_v5, %v302_v37  ;;  %v300_v61 = vadd.f32 %v295_v14, %v4609_v58  ;;  %v890_v1 = vadd.f32 %v885_v18, %v737_v62  ;;  %v1033_v51 = vpop.permute.xlu0 %1032  ;;  %v4613_v12 = vld [vmem:[#allocation65_spill] sm:$0xff]  ;;  %4614 = vst [vmem:[#allocation25_spill] sm:$0xff] %v3582_v43  ;;  %v4617_v62 = vld [vmem:[#allocation64_spill] sm:$0xff] }
 0x20a   :  { %4603 = vst [vmem:[#allocation21_spill] sm:$0xff] %v3557_v2  ;;  %4607 = vst [vmem:[#allocation14_spill] sm:$0xff] %v3563_v35  ;;  %v3572_v45 = vadd.f32 %v1103_v49, %v1021_v15  ;;  %v4612_v2 = vld [vmem:[#allocation35_spill] sm:$0xff]  ;;  %v739_v57 = vadd.f32 %v4613_v12, %v586_v25  ;;  %v1038_v50 = vsel %vm929_vm8, %v1033_v51, %v3563_v35  ;;  %v4615_v37 = vld [vmem:[#allocation37_spill] sm:$0xff]  ;;  %v1278_v48 = vstv %s2385_s15 }
 0x20b   :  { %v601_v56 = vsel %vm470_vm5, %v4612_v2, %v4611_v26  ;;  %1419 = vrot.lane.b32.xlu1 %v1411_v13, %s2527_s11  ;;  %v608_v5 = vadd.f32 %v4615_v37, %v455_v11  ;;  %v453_v14 = vadd.f32 %v448_v40, %v300_v61  ;;  %v1043_v18 = vadd.f32 %v1038_v50, %v890_v1  ;;  %v4616_v49 = vld [vmem:[#allocation67_spill] sm:$0xff]  ;;  %v4618_v2 = vld [vmem:[#allocation90_spill] sm:$0xff]  ;;  %v4622_v1 = vld [vmem:[#allocation93_spill] sm:$0xff] }
 0x20c   :  { %4610 = vst [vmem:[#allocation32_spill] sm:$0xff] %v3572_v45  ;;  %1417 = vrot.lane.b32.xlu0 %v1410_v23, %s2527_s11  ;;  %v1111_v15 = vmul.f32 %v3582_v43, %v3036_v9  ;;  %v754_v25 = vsel %vm623_vm6, %v4617_v62, %v4616_v49  ;;  %v892_v58 = vadd.f32 %v4618_v2, %v739_v57  ;;  %v4619_v12 = vld [vmem:[#allocation66_spill] sm:$0xff]  ;;  %v1668_v49 = vstv %s3555_s0  ;;  %s2388_s0 = sld [smem:[#allocation7 + $0x42]] }
 0x20d   :  { %v1055_v51 = vpop.permute.xlu1 %1054  ;;  %v1540_v13 = vmul.f32 %v3163_v21, %v1538_v52  ;;  %v606_v35 = vadd.f32 %v601_v56, %v453_v14  ;;  %v761_v11 = vadd.f32 %v4619_v12, %v608_v5  ;;  %v3594_v40 = vpop.permute.xlu0 %1036  ;;  %v1539_v23 = vmul.f32 %v1538_v52, %v3036_v9  ;;  %v4623_v50 = vld [vmem:[#allocation94_spill] sm:$0xff] }
 0x20e   :  { %4620 = vst [vmem:[#allocation58_spill] sm:$0xff] %v3594_v40  ;;  %v3597_v61 = vadd.f32 %v1111_v15, %v1043_v18  ;;  %v907_v62 = vsel %vm776_vm7, %v4623_v50, %v4622_v1  ;;  %v1045_v57 = vadd.f32 %v3594_v40, %v892_v58  ;;  %v1113_v56 = vmul.f32 %v3582_v43, %v3046_v29 }
 0x20f   :  { %1547 = vrot.lane.b32.xlu1 %v1540_v13, %s2528_s17  ;;  %v759_v5 = vadd.f32 %v754_v25, %v606_v35  ;;  %v914_v14 = vadd.f32 %v3296_v17, %v761_v11  ;;  %v1669_v18 = vmul.f32 %v1668_v49, %v3036_v9  ;;  %v3615_v50 = vstv %s3568_s25  ;;  %s2395_s25 = sld [smem:[#allocation7 + $0x49]] }
 0x210   :  { %4621 = vst [vmem:[#allocation31_spill] sm:$0xff] %v3597_v61  ;;  %1545 = vrot.lane.b32.xlu0 %v1539_v23, %s2528_s17  ;;  %v3612_v15 = vadd.f32 %v1113_v56, %v1045_v57  ;;  %4626 = vst [vmem:[#allocation63_spill] sm:$0xff] %v3615_v50  ;;  %v1541_v35 = vmul.f32 %v1538_v52, %v3046_v29  ;;  %v1121_v25 = vmul.f32 %v3615_v50, %v3046_v29 }
 0x211   :  { %v3609_v12 = vpop.permute.xlu1 %1058  ;;  %v912_v58 = vadd.f32 %v907_v62, %v759_v5  ;;  %v3618_v61 = vpop.permute.xlu0 %1056  ;;  %v1119_v62 = vmul.f32 %v3615_v50, %v3036_v9  ;;  %v1671_v52 = vmul.f32 %v1668_v49, %v3046_v29  ;;  %v1928_v50 = vstv %s2415_s4 }
 0x212   :  { %4624 = vst [vmem:[#allocation78_spill] sm:$0xff] %v3609_v12  ;;  %4625 = vst [vmem:[#allocation88_spill] sm:$0xff] %v3612_v15  ;;  %v1067_v13 = vadd.f32 %v3609_v12, %v914_v14  ;;  %v1060_v11 = vsel %vm929_vm8, %v1055_v51, %v3618_v61  ;;  %v1670_v14 = vmul.f32 %v3163_v21, %v1668_v49  ;;  %v1776_v51 = vstv %s2408_s26  ;;  %s2536_s26 = smov 122  }
 0x213   :  { %4627 = vst [vmem:[#allocation18_spill] sm:$0xff] %v3618_v61  ;;  %1675 = vrot.lane.b32.xlu1 %v1669_v18, %s2529_s1  ;;  %v1065_v23 = vadd.f32 %v1060_v11, %v912_v58  ;;  %v1778_v58 = vmul.f32 %v3163_v21, %v1776_v51  ;;  %v1906_v49 = vstv %s2414_s27  ;;  %v1712_v1 = vstv %s2405_s5  ;;  %s2402_s27 = sld [smem:[#allocation7 + $0x50]] }
 0x214   :  { %1549 = vrot.lane.b32.xlu0 %v1541_v35, %s2528_s17  ;;  %v3629_v57 = vadd.f32 %v1121_v25, %v1067_v13  ;;  %v1777_v35 = vmul.f32 %v1776_v51, %v3036_v9  ;;  %v1907_v11 = vmul.f32 %v1906_v49, %v3036_v9  ;;  %v1842_v40 = vstv %s2411_s6 }
 0x215   :  { %v3631_v56 = vpop.permute.xlu1 %1135  ;;  %v3634_v5 = vpop.permute.xlu0 %1133  ;;  %v3637_v15 = vadd.f32 %v1119_v62, %v1065_v23  ;;  %v1779_v62 = vmul.f32 %v1776_v51, %v3046_v29 }
 0x216   :  { %4628 = vst [vmem:[#allocation81_spill] sm:$0xff] %v3629_v57  ;;  %4629 = vst [vmem:[#allocation89_spill] sm:$0xff] %v3631_v56  ;;  %v1690_v56 = vstv %s2404_s29 }
 0x217   :  { %4630 = vst [vmem:[#allocation24_spill] sm:$0xff] %v3634_v5  ;;  %4631 = vst [vmem:[#allocation92_spill] sm:$0xff] %v3637_v15  ;;  %1679 = vrot.lane.b32.xlu1 %v1671_v52, %s2529_s1 }
 0x218   :  { %1677 = vrot.lane.b32.xlu0 %v1670_v14, %s2529_s1  ;;  %v1909_v14 = vmul.f32 %v1906_v49, %v3046_v29 }
 0x219   :  { %v3641_v18 = vpop.permute.xlu1 %1153  ;;  %v3644_v13 = vpop.permute.xlu0 %1137 }
 0x21a   :  { %4632 = vst [vmem:[#allocation35_spill] sm:$0xff] %v3644_v13  ;;  %v1560_v13 = vstv %s2398_s28 }
 0x21b   :  { %1785 = vrot.lane.b32.xlu1 %v1778_v58, %s2530_s30  ;;  %v1562_v51 = vmul.f32 %v3163_v21, %v1560_v13 }
 0x21c   :  { %1783 = vrot.lane.b32.xlu0 %v1777_v35, %s2530_s30  ;;  %v1908_v35 = vmul.f32 %v3163_v21, %v1906_v49 }
 0x21d   :  { %v3649_v25 = vpop.permute.xlu1 %1157  ;;  %v3652_v23 = vpop.permute.xlu0 %1155 }
 0x21f   :  { %1913 = vrot.lane.b32.xlu1 %v1907_v11, %s2531_s9 }
 0x220   :  { %1787 = vrot.lane.b32.xlu0 %v1779_v62, %s2530_s30  ;;  %v1561_v62 = vmul.f32 %v1560_v13, %v3036_v9 }
 0x221   :  { %v3657_v52 = vpop.permute.xlu1 %1177  ;;  %v3660_v58 = vpop.permute.xlu0 %1175 }
 0x223   :  { %1917 = vrot.lane.b32.xlu1 %v1909_v14, %s2531_s9  ;;  %v1691_v14 = vmul.f32 %v1690_v56, %v3036_v9 }
 0x224   :  { %1915 = vrot.lane.b32.xlu0 %v1908_v35, %s2531_s9  ;;  %v1563_v35 = vmul.f32 %v1560_v13, %v3046_v29 }
 0x225   :  { %v3665_v5 = vpop.permute.xlu1 %1197  ;;  %v3668_v11 = vpop.permute.xlu0 %1179 }
 0x226   :  { %4633 = vst [vmem:[#allocation64_spill] sm:$0xff] %v3665_v5 }
 0x227   :  { %1569 = vrot.lane.b32.xlu1 %v1562_v51, %s2528_s17  ;;  %v1693_v51 = vmul.f32 %v1690_v56, %v3046_v29 }
 0x228   :  { %1567 = vrot.lane.b32.xlu0 %v1561_v62, %s2528_s17  ;;  %v1692_v62 = vmul.f32 %v3163_v21, %v1690_v56 }
 0x229   :  { %v3673_v49 = vpop.permute.xlu1 %1201  ;;  %v3676_v57 = vpop.permute.xlu0 %1199 }
 0x22a   :  { %4634 = vst [vmem:[#allocation94_spill] sm:$0xff] %v3673_v49  ;;  %4635 = vst [vmem:[#allocation100_spill] sm:$0xff] %v3676_v57  ;;  %v1820_v49 = vstv %s2410_s3 }
 0x22b   :  { %1697 = vrot.lane.b32.xlu1 %v1691_v14, %s2529_s1  ;;  %v1822_v13 = vmul.f32 %v3163_v21, %v1820_v49 }
 0x22c   :  { %1571 = vrot.lane.b32.xlu0 %v1563_v35, %s2528_s17  ;;  %v1821_v35 = vmul.f32 %v1820_v49, %v3036_v9 }
 0x22d   :  { %v3681_v5 = vpop.permute.xlu1 %1221  ;;  %v3684_v15 = vpop.permute.xlu0 %1219 }
 0x22e   :  { %4636 = vst [vmem:[#allocation101_spill] sm:$0xff] %v3681_v5  ;;  %4637 = vst [vmem:[#allocation102_spill] sm:$0xff] %v3684_v15  ;;  %v1994_v15 = vstv %s2418_s13 }
 0x22f   :  { %1701 = vrot.lane.b32.xlu1 %v1693_v51, %s2529_s1  ;;  %v1929_v51 = vmul.f32 %v1928_v50, %v3036_v9 }
 0x230   :  { %1699 = vrot.lane.b32.xlu0 %v1692_v62, %s2529_s1  ;;  %v1823_v62 = vmul.f32 %v1820_v49, %v3046_v29  ;;  %v1714_v49 = vmul.f32 %v3163_v21, %v1712_v1 }
 0x231   :  { %v3689_v57 = vpop.permute.xlu1 %1307  ;;  %v3692_v14 = vpop.permute.xlu0 %1305 }
 0x233   :  { %1829 = vrot.lane.b32.xlu1 %v1822_v13, %s2530_s30  ;;  %v1931_v13 = vmul.f32 %v1928_v50, %v3046_v29 }
 0x234   :  { %1827 = vrot.lane.b32.xlu0 %v1821_v35, %s2530_s30  ;;  %v1930_v35 = vmul.f32 %v3163_v21, %v1928_v50 }
 0x235   :  { %v3697_v56 = vpop.permute.xlu1 %1223  ;;  %v3700_v43 = vpop.permute.xlu0 %1309 }
 0x236   :  { %4638 = vst [vmem:[#allocation103_spill] sm:$0xff] %v3697_v56  ;;  %v1972_v56 = vstv %s2417_s8 }
 0x237   :  { %1935 = vrot.lane.b32.xlu1 %v1929_v51, %s2531_s9 }
 0x238   :  { %1831 = vrot.lane.b32.xlu0 %v1823_v62, %s2530_s30  ;;  %v1713_v62 = vmul.f32 %v1712_v1, %v3036_v9 }
 0x239   :  { %v3705_v61 = vpop.permute.xlu1 %1329  ;;  %v3708_v12 = vpop.permute.xlu0 %1327 }
 0x23b   :  { %1939 = vrot.lane.b32.xlu1 %v1931_v13, %s2531_s9  ;;  %v1843_v13 = vmul.f32 %v1842_v40, %v3036_v9 }
 0x23c   :  { %1937 = vrot.lane.b32.xlu0 %v1930_v35, %s2531_s9  ;;  %v1715_v35 = vmul.f32 %v1712_v1, %v3046_v29  ;;  %v1974_v1 = vmul.f32 %v3163_v21, %v1972_v56 }
 0x23d   :  { %v3713_v17 = vpop.permute.xlu1 %1457  ;;  %v3716_v51 = vpop.permute.xlu0 %1331 }
 0x23f   :  { %1721 = vrot.lane.b32.xlu1 %v1714_v49, %s2529_s1  ;;  %v1845_v49 = vmul.f32 %v1842_v40, %v3046_v29 }
 0x240   :  { %1719 = vrot.lane.b32.xlu0 %v1713_v62, %s2529_s1  ;;  %v1844_v62 = vmul.f32 %v3163_v21, %v1842_v40 }
 0x241   :  { %v3721_v50 = vpop.permute.xlu1 %1461  ;;  %v3724_v2 = vpop.permute.xlu0 %1459 }
 0x243   :  { %1849 = vrot.lane.b32.xlu1 %v1843_v13, %s2530_s30 }
 0x244   :  { %1723 = vrot.lane.b32.xlu0 %v1715_v35, %s2529_s1  ;;  %v1973_v35 = vmul.f32 %v1972_v56, %v3036_v9 }
 0x245   :  { %v3729_v26 = vpop.permute.xlu1 %1243  ;;  %v3732_v37 = vpop.permute.xlu0 %1241 }
 0x246   :  { %4639 = vst [vmem:[#allocation104_spill] sm:$0xff] %v3729_v26  ;;  %4640 = vst [vmem:[#allocation105_spill] sm:$0xff] %v3732_v37  ;;  %v1864_v37 = vstv %s2412_s12  ;;  %v3747_v26 = vld [vmem:[#allocation2 + $0x18] sm:$0xff] }
 0x247   :  { %1853 = vrot.lane.b32.xlu1 %v1845_v49, %s2530_s30  ;;  %4644 = vst [vmem:[#allocation109_spill] sm:$0xff] %v3747_v26  ;;  %v1865_v49 = vmul.f32 %v3747_v26, %v1864_v37 }
 0x248   :  { %1851 = vrot.lane.b32.xlu0 %v1844_v62, %s2530_s30 }
 0x249   :  { %v3737_v45 = vpop.permute.xlu1 %1371  ;;  %v3740_v13 = vpop.permute.xlu0 %1245 }
 0x24a   :  { %4641 = vst [vmem:[#allocation106_spill] sm:$0xff] %v3737_v45  ;;  %4642 = vst [vmem:[#allocation107_spill] sm:$0xff] %v3740_v13  ;;  %v1975_v45 = vmul.f32 %v1972_v56, %v3046_v29 }
 0x24b   :  { %1981 = vrot.lane.b32.xlu1 %v1974_v1, %s2531_s9  ;;  %v3757_v1 = vld [vmem:[#allocation2 + $0x28] sm:$0xff] }
 0x24c   :  { %1979 = vrot.lane.b32.xlu0 %v1973_v35, %s2531_s9  ;;  %v1867_v35 = vmul.f32 %v3757_v1, %v1864_v37 }
 0x24d   :  { %v3745_v40 = vpop.permute.xlu1 %1375  ;;  %v3750_v62 = vpop.permute.xlu0 %1373 }
 0x24e   :  { %4643 = vst [vmem:[#allocation108_spill] sm:$0xff] %v3745_v40  ;;  %4645 = vst [vmem:[#allocation110_spill] sm:$0xff] %v3750_v62  ;;  %v1866_v40 = vmul.f32 %v3163_v21, %v1864_v37  ;;  %v2016_v62 = vstv %s2419_s14 }
 0x24f   :  { %1871 = vrot.lane.b32.xlu1 %v1865_v49, %s2530_s30  ;;  %v1995_v49 = vmul.f32 %v3747_v26, %v1994_v15 }
 0x250   :  { %1983 = vrot.lane.b32.xlu0 %v1975_v45, %s2531_s9  ;;  %v1996_v45 = vmul.f32 %v3163_v21, %v1994_v15 }
 0x251   :  { %v3755_v9 = vpop.permute.xlu1 %1481  ;;  %v3760_v13 = vpop.permute.xlu0 %1479 }
 0x253   :  { %1875 = vrot.lane.b32.xlu1 %v1867_v35, %s2530_s30  ;;  %v2017_v35 = vmul.f32 %v3747_v26, %v2016_v62 }
 0x254   :  { %1873 = vrot.lane.b32.xlu0 %v1866_v40, %s2530_s30  ;;  %v1997_v40 = vmul.f32 %v3757_v1, %v1994_v15  ;;  %v1280_v15 = vmul.f32 %v3163_v21, %v1278_v48 }
 0x255   :  { %v3765_v29 = vpop.permute.xlu1 %1609  ;;  %v3768_v56 = vpop.permute.xlu0 %1483 }
 0x257   :  { %2003 = vrot.lane.b32.xlu1 %v1996_v45, %s2531_s9  ;;  %v2019_v45 = vmul.f32 %v3757_v1, %v2016_v62 }
 0x258   :  { %2001 = vrot.lane.b32.xlu0 %v1995_v49, %s2531_s9  ;;  %v2018_v49 = vmul.f32 %v3163_v21, %v2016_v62 }
 0x259   :  { %v3773_v37 = vpop.permute.xlu1 %1613  ;;  %v3776_v5 = vpop.permute.xlu0 %1611 }
 0x25b   :  { %2023 = vrot.lane.b32.xlu1 %v2017_v35, %s2531_s9 }
 0x25c   :  { %2005 = vrot.lane.b32.xlu0 %v1997_v40, %s2531_s9  ;;  %v1279_v40 = vmul.f32 %v3747_v26, %v1278_v48 }
 0x25d   :  { %v3781_v63 = vpop.permute.xlu1 %1265  ;;  %v3784_v41 = vpop.permute.xlu0 %1263 }
 0x25e   :  { %4646 = vst [vmem:[#allocation111_spill] sm:$0xff] %v3781_v63  ;;  %4647 = vst [vmem:[#allocation112_spill] sm:$0xff] %v3784_v41  ;;  %v1430_v41 = vstv %s2392_s16 }
 0x25f   :  { %2027 = vrot.lane.b32.xlu1 %v2019_v45, %s2531_s9  ;;  %v1431_v45 = vmul.f32 %v3747_v26, %v1430_v41 }
 0x260   :  { %2025 = vrot.lane.b32.xlu0 %v2018_v49, %s2531_s9  ;;  %v1281_v49 = vmul.f32 %v3757_v1, %v1278_v48 }
 0x261   :  { %v3789_v24 = vpop.permute.xlu1 %1393  ;;  %v3792_v35 = vpop.permute.xlu0 %1267 }
 0x262   :  { %4648 = vst [vmem:[#allocation113_spill] sm:$0xff] %v3789_v24  ;;  %4649 = vst [vmem:[#allocation114_spill] sm:$0xff] %v3792_v35 }
 0x263   :  { %1287 = vrot.lane.b32.xlu1 %v1280_v15, %s2527_s11  ;;  %v1433_v15 = vmul.f32 %v3757_v1, %v1430_v41 }
 0x264   :  { %1285 = vrot.lane.b32.xlu0 %v1279_v40, %s2527_s11  ;;  %v1432_v40 = vmul.f32 %v3163_v21, %v1430_v41 }
 0x265   :  { %v3797_v62 = vpop.permute.xlu1 %1397  ;;  %v3800_v63 = vpop.permute.xlu0 %1395 }
 0x266   :  { %4650 = vst [vmem:[#allocation115_spill] sm:$0xff] %v3797_v62  ;;  %4651 = vst [vmem:[#allocation116_spill] sm:$0xff] %v3800_v63  ;;  %v1582_v62 = vstv %s2399_s18 }
 0x267   :  { %1437 = vrot.lane.b32.xlu1 %v1431_v45, %s2528_s17  ;;  %v1584_v48 = vmul.f32 %v3163_v21, %v1582_v62 }
 0x268   :  { %1289 = vrot.lane.b32.xlu0 %v1281_v49, %s2527_s11  ;;  %v1583_v49 = vmul.f32 %v3747_v26, %v1582_v62 }
 0x269   :  { %v3805_v35 = vpop.permute.xlu1 %1525  ;;  %v3808_v24 = vpop.permute.xlu0 %1523 }
 0x26a   :  { %4652 = vst [vmem:[#allocation117_spill] sm:$0xff] %v3805_v35  ;;  %4653 = vst [vmem:[#allocation118_spill] sm:$0xff] %v3808_v24  ;;  %v1734_v24 = vstv %s2406_s19 }
 0x26b   :  { %1441 = vrot.lane.b32.xlu1 %v1433_v15, %s2528_s17  ;;  %v1735_v15 = vmul.f32 %v3747_v26, %v1734_v24  ;;  %v1737_v31 = vmul.f32 %v3757_v1, %v1734_v24 }
 0x26c   :  { %1439 = vrot.lane.b32.xlu0 %v1432_v40, %s2528_s17  ;;  %v1585_v40 = vmul.f32 %v3757_v1, %v1582_v62 }
 0x26d   :  { %v3813_v63 = vpop.permute.xlu1 %1631  ;;  %v3816_v45 = vpop.permute.xlu0 %1527 }
 0x26e   :  { %4654 = vst [vmem:[#allocation119_spill] sm:$0xff] %v3813_v63  ;;  %4655 = vst [vmem:[#allocation120_spill] sm:$0xff] %v3816_v45 }
 0x26f   :  { %1591 = vrot.lane.b32.xlu1 %v1584_v48, %s2529_s1  ;;  %v1736_v48 = vmul.f32 %v3163_v21, %v1734_v24  ;;  %v3843_v24 = vld [vmem:[#allocation2 + $0x8] sm:$0xff] }
 0x270   :  { %1589 = vrot.lane.b32.xlu0 %v1583_v49, %s2529_s1  ;;  %v1886_v49 = vstv %s2413_s21 }
 0x271   :  { %v3821_v41 = vpop.permute.xlu1 %1635  ;;  %v3824_v35 = vpop.permute.xlu0 %1633 }
 0x272   :  { %4656 = vst [vmem:[#allocation121_spill] sm:$0xff] %v3821_v41  ;;  %4657 = vst [vmem:[#allocation122_spill] sm:$0xff] %v3824_v35  ;;  %v1888_v41 = vmul.f32 %v3163_v21, %v1886_v49  ;;  %v4660_v35 = vld [vmem:[#allocation79_spill] sm:$0xff] }
 0x273   :  { %1741 = vrot.lane.b32.xlu1 %v1735_v15, %s2530_s30  ;;  %v1887_v15 = vmul.f32 %v3747_v26, %v1886_v49 }
 0x274   :  { %1593 = vrot.lane.b32.xlu0 %v1585_v40, %s2529_s1  ;;  %v4659_v40 = vld [vmem:[#allocation38_spill] sm:$0xff] }
 0x275   :  { %v1764_v45 = vpop.permute.xlu1 %1763  ;;  %v1762_v4 = vpop.permute.xlu0 %1761  ;;  %v186_v63 = vsel %vm164_vm3, %v4659_v40, %v2774_v47  ;;  %v1889_v47 = vmul.f32 %v3757_v1, %v1886_v49 }
 0x277   :  { %1745 = vrot.lane.b32.xlu1 %v1737_v31, %s2530_s30  ;;  %v105_v31 = vmul.f32 %v3843_v24, %v4660_v35  ;;  %v645_v35 = vsel %vm623_vm6, %v3030_v19, %v3042_v38 }
 0x278   :  { %1743 = vrot.lane.b32.xlu0 %v1736_v48, %s2530_s30  ;;  %v339_v48 = vsel %vm317_vm4, %v2966_v8, %v2840_v28 }
 0x279   :  { %v3833_v7 = vpop.permute.xlu1 %1415  ;;  %v191_v26 = vadd.f32 %v186_v63, %v105_v31  ;;  %v798_v63 = vsel %vm776_vm7, %v3124_v39, %v4546_v60  ;;  %v1159_v39 = vsel %vm164_vm3, %v3641_v18, %v3652_v23  ;;  %v1463_v18 = vsel %vm470_vm5, %v3713_v17, %v3724_v2 }
 0x27a   :  { %4658 = vst [vmem:[#allocation123_spill] sm:$0xff] %v3833_v7  ;;  %v3836_v62 = vpop.permute.xlu0 %1765 }
 0x27b   :  { %1895 = vrot.lane.b32.xlu1 %v1888_v41, %s2531_s9  ;;  %v492_v41 = vsel %vm470_vm5, %v3000_v42, %v2886_v3  ;;  %v344_v40 = vadd.f32 %v339_v48, %v191_v26  ;;  %v951_v42 = vsel %vm929_vm8, %v3359_v44, %v3405_v54  ;;  %v1080_v48 = vmul.f32 %v3163_v21, %v3280_v6 }
 0x27c   :  { %1893 = vrot.lane.b32.xlu0 %v1887_v15, %s2531_s9  ;;  %v1160_v44 = vsel %vm164_vm3, %v3652_v23, %v3649_v25  ;;  %v1311_v54 = vsel %vm317_vm4, %v3692_v14, %v3689_v57  ;;  %v1164_v6 = vadd.f32 %v1159_v39, %v3403_v34  ;;  %v1464_v23 = vsel %vm470_vm5, %v3724_v2, %v3721_v50 }
 0x27d   :  { %v3851_v7 = vpop.permute.xlu1 %1419  ;;  %v497_v28 = vadd.f32 %v492_v41, %v344_v40  ;;  %v1312_v41 = vsel %vm317_vm4, %v3689_v57, %v3700_v43  ;;  %v1615_v57 = vsel %vm623_vm6, %v3765_v29, %v3776_v5  ;;  %v1616_v34 = vsel %vm623_vm6, %v3776_v5, %v3773_v37 }
 0x27e   :  { %v3853_v30 = vpop.permute.xlu0 %1417  ;;  %v1316_v14 = vadd.f32 %v1311_v54, %v1164_v6  ;;  %v208_v2 = vsel %vm164_vm3, %v2942_v16, %v2792_v0  ;;  %v1768_v29 = vsel %vm776_vm7, %v1764_v45, %v3836_v62 }
 0x27f   :  { %v650_v49 = vadd.f32 %v645_v35, %v497_v28 }
 0x280   :  { %1897 = vrot.lane.b32.xlu0 %v1889_v47, %s2531_s9 }
 0x281   :  { %v3863_v15 = vpop.permute.xlu1 %1547  ;;  %v803_v26 = vadd.f32 %v798_v63, %v650_v49  ;;  %v1166_v49 = vadd.f32 %v3649_v25, %v3430_v33  ;;  %v361_v25 = vsel %vm317_vm4, %v2976_v55, %v2838_v27  ;;  %v667_v55 = vsel %vm623_vm6, %v3052_v20, %v4547_v46 }
 0x282   :  { %v3865_v8 = vpop.permute.xlu0 %1545  ;;  %v973_v20 = vsel %vm929_vm8, %v3435_v53, %v3428_v32  ;;  %v1181_v32 = vsel %vm164_vm3, %v3660_v58, %v3657_v52  ;;  %v1182_v53 = vsel %vm164_vm3, %v3657_v52, %v3668_v11  ;;  %v4664_v58 = vld [vmem:[#allocation17_spill] sm:$0xff] }
 0x283   :  { %v956_v19 = vadd.f32 %v951_v42, %v803_v26  ;;  %v1468_v42 = vadd.f32 %v1463_v18, %v1316_v14  ;;  %v1318_v39 = vadd.f32 %v3700_v43, %v1166_v49 }
 0x285   :  { %v3873_v3 = vpop.permute.xlu1 %1675  ;;  %v1083_v60 = vadd.f32 %v1080_v48, %v956_v19  ;;  %v1767_v19 = vsel %vm776_vm7, %v1762_v4, %v1764_v45  ;;  %v4661_v48 = vld [vmem:[#allocation83_spill] sm:$0xff]  ;;  %v1470_v0 = vadd.f32 %v3721_v50, %v1318_v39  ;;  %v514_v45 = vsel %vm470_vm5, %v2998_v36, %v2904_v22 }
 0x286   :  { %v3875_v31 = vpop.permute.xlu0 %1549  ;;  %v113_v5 = vmul.f32 %v3843_v24, %v4661_v48  ;;  %v4662_v36 = vld [vmem:[#allocation71_spill] sm:$0xff]  ;;  %v1333_v48 = vsel %vm317_vm4, %v3708_v12, %v3705_v61  ;;  %v1486_v12 = vsel %vm470_vm5, %v3755_v9, %v3768_v56 }
 0x287   :  { %v1165_v40 = vadd.f32 %v1160_v44, %v1083_v60  ;;  %v1620_v44 = vadd.f32 %v1615_v57, %v1468_v42  ;;  %v1622_v18 = vadd.f32 %v3773_v37, %v1470_v0  ;;  %v820_v37 = vsel %vm776_vm7, %v4662_v36, %v4552_v59 }
 0x288   :  { %v213_v54 = vadd.f32 %v208_v2, %v113_v5  ;;  %v4663_v2 = vld [vmem:[#allocation70_spill] sm:$0xff]  ;;  %v1334_v5 = vsel %vm317_vm4, %v3705_v61, %v3716_v51  ;;  %v4666_v61 = vld [vmem:[#allocation85_spill] sm:$0xff] }
 0x289   :  { %v3877_v38 = vpop.permute.xlu1 %1679  ;;  %v1317_v28 = vadd.f32 %v1312_v41, %v1165_v40  ;;  %v1772_v16 = vadd.f32 %v1767_v19, %v1620_v44  ;;  %v1186_v44 = vadd.f32 %v1181_v32, %v3471_v10  ;;  %v129_v0 = vmul.f32 %v3843_v24, %v4666_v61  ;;  %v4675_v32 = vld [vmem:[#allocation60_spill] sm:$0xff] }
 0x28a   :  { %v3881_v47 = vpop.permute.xlu0 %1677  ;;  %v366_v40 = vadd.f32 %v361_v25, %v213_v54  ;;  %v1485_v54 = vsel %vm470_vm5, %v3760_v13, %v3755_v9  ;;  %v4672_v9 = vld [vmem:[#allocation55_spill] sm:$0xff] }
 0x28b   :  { %v1469_v17 = vadd.f32 %v1464_v23, %v1317_v28  ;;  %v1774_v28 = vadd.f32 %v3836_v62, %v1622_v18  ;;  %v4671_v18 = vld [vmem:[#allocation121_spill] sm:$0xff] }
 0x28c   :  { %v519_v14 = vadd.f32 %v514_v45, %v366_v40 }
 0x28d   :  { %v3895_v21 = vpop.permute.xlu1 %1785  ;;  %v1621_v33 = vadd.f32 %v1616_v34, %v1469_v17  ;;  %v3955_v17 = vld [vmem:[#allocation2 + $0x20] sm:$0xff] }
 0x28e   :  { %v3898_v35 = vpop.permute.xlu0 %1783  ;;  %v672_v57 = vadd.f32 %v667_v55, %v519_v14  ;;  %v1088_v59 = vmul.f32 %v3955_v17, %v4663_v2  ;;  %v1188_v55 = vadd.f32 %v3668_v11, %v4672_v9 }
 0x28f   :  { %v1773_v4 = vadd.f32 %v1768_v29, %v1621_v33 }
 0x290   :  { %v1340_v2 = vadd.f32 %v3716_v51, %v1188_v55  ;;  %v4685_v55 = vld [vmem:[#allocation101_spill] sm:$0xff] }
 0x291   :  { %v1914_v63 = vpop.permute.xlu1 %1913 }
 0x292   :  { %v3914_v26 = vpop.permute.xlu0 %1787 }
 0x295   :  { %v1918_v60 = vpop.permute.xlu1 %1917 }
 0x296   :  { %v1916_v41 = vpop.permute.xlu0 %1915  ;;  %v1926_v34 = vadd.f32 %v1918_v60, %v1774_v28 }
 0x297   :  { %v1919_v6 = vsel %vm929_vm8, %v1914_v63, %v1916_v41  ;;  %v1920_v43 = vsel %vm929_vm8, %v1916_v41, %v1918_v60  ;;  %v825_v63 = vadd.f32 %v820_v37, %v672_v57  ;;  %v4665_v60 = vld [vmem:[#allocation39_spill] sm:$0xff]  ;;  %v4668_v41 = vld [vmem:[#allocation46_spill] sm:$0xff]  ;;  %v4674_v57 = vld [vmem:[#allocation49_spill] sm:$0xff] }
 0x298   :  { %v1924_v23 = vadd.f32 %v1919_v6, %v1772_v16  ;;  %v1925_v27 = vadd.f32 %v1920_v43, %v1773_v4  ;;  %v252_v52 = vsel %vm164_vm3, %v4665_v60, %v4664_v58  ;;  %v1338_v16 = vadd.f32 %v1333_v48, %v1186_v44  ;;  %v4667_v4 = vld [vmem:[#allocation22_spill] sm:$0xff]  ;;  %v4670_v43 = vld [vmem:[#allocation119_spill] sm:$0xff] }
 0x299   :  { %v3938_v50 = vpop.permute.xlu1 %1569  ;;  %v978_v49 = vadd.f32 %v973_v20, %v825_v63  ;;  %v405_v45 = vsel %vm317_vm4, %v4668_v41, %v4667_v4  ;;  %v4669_v6 = vld [vmem:[#allocation122_spill] sm:$0xff]  ;;  %v1789_v20 = vsel %vm776_vm7, %v3898_v35, %v3895_v21  ;;  %v1790_v63 = vsel %vm776_vm7, %v3895_v21, %v3914_v26  ;;  %v4680_v4 = vld [vmem:[#allocation73_spill] sm:$0xff] }
 0x29a   :  { %2101 = vrot.lane.b32.xlu0 %v1925_v27, %s2532_s10  ;;  %2099 = vrot.lane.b32.xlu1 %v1924_v23, %s2532_s10  ;;  %v3941_v22 = vpop.permute.xlu0 %1567  ;;  %v1637_v40 = vsel %vm623_vm6, %v4670_v43, %v4669_v6  ;;  %v1638_v13 = vsel %vm623_vm6, %v4669_v6, %v4671_v18  ;;  %v257_v27 = vadd.f32 %v252_v52, %v129_v0  ;;  %v4673_v37 = vld [vmem:[#allocation34_spill] sm:$0xff]  ;;  %v4678_v52 = vld [vmem:[#allocation77_spill] sm:$0xff] }
 0x29b   :  { %v1091_v29 = vadd.f32 %v1088_v59, %v978_v49  ;;  %v1490_v14 = vadd.f32 %v1485_v54, %v1338_v16  ;;  %v1492_v44 = vadd.f32 %v3768_v56, %v1340_v2  ;;  %v4677_v60 = vld [vmem:[#allocation82_spill] sm:$0xff]  ;;  %v4690_v2 = vld [vmem:[#allocation45_spill] sm:$0xff] }
 0x29c   :  { %v410_v49 = vadd.f32 %v405_v45, %v257_v27  ;;  %v864_v21 = vsel %vm776_vm7, %v4678_v52, %v4677_v60  ;;  %v4684_v27 = vld [vmem:[#allocation42_spill] sm:$0xff] }
 0x29d   :  { %v3949_v46 = vpop.permute.xlu1 %1697  ;;  %v1187_v33 = vadd.f32 %v1182_v53, %v1091_v29  ;;  %v1642_v11 = vadd.f32 %v1637_v40, %v1490_v14  ;;  %v4676_v53 = vld [vmem:[#allocation61_spill] sm:$0xff]  ;;  %v1644_v61 = vadd.f32 %v4671_v18, %v1492_v44  ;;  %v4681_v40 = vld [vmem:[#allocation20_spill] sm:$0xff]  ;;  %v4686_v14 = vld [vmem:[#allocation102_spill] sm:$0xff] }
 0x29e   :  { %2103 = vrot.lane.b32.xlu1 %v1926_v34, %s2532_s10  ;;  %v3951_v62 = vpop.permute.xlu0 %1571  ;;  %v558_v34 = vsel %vm470_vm5, %v4674_v57, %v4673_v37  ;;  %v711_v29 = vsel %vm623_vm6, %v4676_v53, %v4675_v32  ;;  %v4687_v37 = vld [vmem:[#allocation87_spill] sm:$0xff]  ;;  %v4688_v57 = vld [vmem:[#allocation84_spill] sm:$0xff]  ;;  %v4692_v32 = vld [vmem:[#allocation106_spill] sm:$0xff] }
 0x29f   :  { %v1339_v10 = vadd.f32 %v1334_v5, %v1187_v33  ;;  %v563_v5 = vadd.f32 %v558_v34, %v410_v49  ;;  %v1794_v33 = vadd.f32 %v1789_v20, %v1642_v11  ;;  %v1796_v6 = vadd.f32 %v3914_v26, %v1644_v61  ;;  %v4689_v49 = vld [vmem:[#allocation27_spill] sm:$0xff] }
 0x2a0   :  { %v145_v26 = vmul.f32 %v3843_v24, %v4687_v37  ;;  %v137_v34 = vmul.f32 %v3843_v24, %v4688_v57  ;;  %v427_v11 = vsel %vm317_vm4, %v4690_v2, %v4689_v49  ;;  %v1681_v57 = vsel %vm623_vm6, %v3873_v3, %v3881_v47 }
 0x2a1   :  { %v3953_v42 = vpop.permute.xlu1 %1701  ;;  %v1491_v28 = vadd.f32 %v1486_v12, %v1339_v10  ;;  %v716_v12 = vadd.f32 %v711_v29, %v563_v5  ;;  %v4679_v10 = vld [vmem:[#allocation57_spill] sm:$0xff] }
 0x2a2   :  { %v3959_v19 = vpop.permute.xlu0 %1699  ;;  %v1017_v56 = vsel %vm929_vm8, %v4680_v4, %v4679_v10  ;;  %v4700_v10 = vld [vmem:[#allocation117_spill] sm:$0xff]  ;;  %v4701_v4 = vld [vmem:[#allocation118_spill] sm:$0xff] }
 0x2a3   :  { %v1643_v59 = vadd.f32 %v1638_v13, %v1491_v28  ;;  %v869_v45 = vadd.f32 %v864_v21, %v716_v12  ;;  %v4682_v13 = vld [vmem:[#allocation41_spill] sm:$0xff]  ;;  %v1225_v28 = vsel %vm164_vm3, %v4686_v14, %v4685_v55  ;;  %v4696_v21 = vld [vmem:[#allocation48_spill] sm:$0xff] }
 0x2a4   :  { %v296_v18 = vsel %vm164_vm3, %v4682_v13, %v4681_v40  ;;  %v4698_v12 = vld [vmem:[#allocation52_spill] sm:$0xff]  ;;  %v4703_v40 = vld [vmem:[#allocation51_spill] sm:$0xff] }
 0x2a5   :  { %v3973_v39 = vpop.permute.xlu1 %1829  ;;  %v1795_v58 = vadd.f32 %v1790_v63, %v1643_v59  ;;  %v1022_v20 = vadd.f32 %v1017_v56, %v869_v45  ;;  %v4691_v59 = vld [vmem:[#allocation110_spill] sm:$0xff]  ;;  %v301_v5 = vadd.f32 %v296_v18, %v145_v26  ;;  %v1529_v56 = vsel %vm470_vm5, %v4701_v4, %v4700_v10  ;;  %v4707_v26 = vld [vmem:[#allocation108_spill] sm:$0xff] }
 0x2a6   :  { %v3976_v25 = vpop.permute.xlu0 %1827  ;;  %v1377_v53 = vsel %vm317_vm4, %v4692_v32, %v4691_v59  ;;  %v4708_v32 = vld [vmem:[#allocation90_spill] sm:$0xff] }
 0x2a7   :  { %v1833_v3 = vsel %vm776_vm7, %v3976_v25, %v3973_v39 }
 0x2a9   :  { %v1936_v23 = vpop.permute.xlu1 %1935 }
 0x2aa   :  { %v4000_v36 = vpop.permute.xlu0 %1831 }
 0x2ad   :  { %v1940_v48 = vpop.permute.xlu1 %1939 }
 0x2ae   :  { %v1938_v35 = vpop.permute.xlu0 %1937  ;;  %v1948_v63 = vadd.f32 %v1940_v48, %v1796_v6  ;;  %v4702_v6 = vld [vmem:[#allocation37_spill] sm:$0xff] }
 0x2af   :  { %v1941_v54 = vsel %vm929_vm8, %v1936_v23, %v1938_v35  ;;  %v1942_v51 = vsel %vm929_vm8, %v1938_v35, %v1940_v48  ;;  %v4683_v23 = vld [vmem:[#allocation16_spill] sm:$0xff]  ;;  %v4694_v35 = vld [vmem:[#allocation86_spill] sm:$0xff]  ;;  %v602_v13 = vsel %vm470_vm5, %v4703_v40, %v4702_v6 }
 0x2b0   :  { %v1946_v0 = vadd.f32 %v1941_v54, %v1794_v33  ;;  %v1947_v16 = vadd.f32 %v1942_v51, %v1795_v58  ;;  %v274_v9 = vsel %vm164_vm3, %v4684_v27, %v4683_v23  ;;  %v4693_v33 = vld [vmem:[#allocation32_spill] sm:$0xff]  ;;  %v1104_v60 = vmul.f32 %v3955_v17, %v4694_v35  ;;  %v4695_v48 = vld [vmem:[#allocation26_spill] sm:$0xff]  ;;  %v4697_v51 = vld [vmem:[#allocation33_spill] sm:$0xff] }
 0x2b1   :  { %v4025_v41 = vpop.permute.xlu1 %1721  ;;  %v279_v44 = vadd.f32 %v274_v9, %v137_v34  ;;  %v1230_v58 = vadd.f32 %v1225_v28, %v4693_v33  ;;  %v449_v54 = vsel %vm317_vm4, %v4696_v21, %v4695_v48  ;;  %v580_v61 = vsel %vm470_vm5, %v4698_v12, %v4697_v51  ;;  %v4704_v27 = vld [vmem:[#allocation65_spill] sm:$0xff]  ;;  %v4705_v9 = vld [vmem:[#allocation62_spill] sm:$0xff] }
 0x2b2   :  { %2138 = vrot.lane.b32.xlu1 %v1947_v16, %s2533_s22  ;;  %2136 = vrot.lane.b32.xlu0 %v1946_v0, %s2533_s22  ;;  %v4028_v43 = vpop.permute.xlu0 %1719  ;;  %v4699_v0 = vld [vmem:[#allocation103_spill] sm:$0xff]  ;;  %v1107_v18 = vadd.f32 %v1104_v60, %v1022_v20  ;;  %v733_v14 = vsel %vm623_vm6, %v4705_v9, %v4704_v27  ;;  %v4706_v28 = vld [vmem:[#allocation21_spill] sm:$0xff]  ;;  %v4711_v21 = vld [vmem:[#allocation66_spill] sm:$0xff] }
 0x2b3   :  { %v1226_v16 = vsel %vm164_vm3, %v4685_v55, %v4699_v0  ;;  %v432_v45 = vadd.f32 %v427_v11, %v279_v44  ;;  %v1382_v23 = vadd.f32 %v1377_v53, %v1230_v58  ;;  %v1232_v37 = vadd.f32 %v4699_v0, %v4706_v28  ;;  %v4709_v53 = vld [vmem:[#allocation91_spill] sm:$0xff]  ;;  %v4710_v58 = vld [vmem:[#allocation120_spill] sm:$0xff]  ;;  %v4713_v12 = vld [vmem:[#allocation58_spill] sm:$0xff] }
 0x2b4   :  { %v1378_v55 = vsel %vm317_vm4, %v4691_v59, %v4707_v26  ;;  %v1231_v49 = vadd.f32 %v1226_v16, %v1107_v18  ;;  %v886_v44 = vsel %vm776_vm7, %v4709_v53, %v4708_v32  ;;  %v1530_v59 = vsel %vm470_vm5, %v4700_v10, %v4710_v58  ;;  %v4718_v27 = vld [vmem:[#allocation105_spill] sm:$0xff] }
 0x2b5   :  { %v4049_v29 = vpop.permute.xlu1 %1849  ;;  %v585_v20 = vadd.f32 %v580_v61, %v432_v45  ;;  %v1534_v2 = vadd.f32 %v1529_v56, %v1382_v23  ;;  %v1384_v33 = vadd.f32 %v4707_v26, %v1232_v37  ;;  %v4714_v61 = vld [vmem:[#allocation14_spill] sm:$0xff]  ;;  %v1682_v10 = vsel %vm623_vm6, %v3881_v47, %v3877_v38  ;;  %v4715_v56 = vld [vmem:[#allocation95_spill] sm:$0xff]  ;;  %v4716_v45 = vld [vmem:[#allocation93_spill] sm:$0xff] }
 0x2b6   :  { %2140 = vrot.lane.b32.xlu0 %v1948_v63, %s2533_s22  ;;  %v4054_v52 = vpop.permute.xlu0 %1723  ;;  %v454_v63 = vadd.f32 %v449_v54, %v301_v5  ;;  %v1383_v60 = vadd.f32 %v1378_v55, %v1231_v49  ;;  %v4712_v54 = vld [vmem:[#allocation67_spill] sm:$0xff]  ;;  %v1039_v0 = vsel %vm929_vm8, %v4714_v61, %v4713_v12  ;;  %v908_v6 = vsel %vm776_vm7, %v4716_v45, %v4715_v56  ;;  %v4717_v23 = vld [vmem:[#allocation104_spill] sm:$0xff]  ;;  %v4722_v32 = vld [vmem:[#allocation113_spill] sm:$0xff] }
 0x2b7   :  { %v738_v35 = vadd.f32 %v733_v14, %v585_v20  ;;  %v1686_v48 = vadd.f32 %v1681_v57, %v1534_v2  ;;  %v755_v51 = vsel %vm623_vm6, %v4712_v54, %v4711_v21  ;;  %v1536_v16 = vadd.f32 %v4710_v58, %v1384_v33  ;;  %v4720_v20 = vld [vmem:[#allocation18_spill] sm:$0xff]  ;;  %v4721_v2 = vld [vmem:[#allocation116_spill] sm:$0xff] }
 0x2b8   :  { %v607_v5 = vadd.f32 %v602_v13, %v454_v63  ;;  %v1535_v40 = vadd.f32 %v1530_v59, %v1383_v60  ;;  %v1247_v9 = vsel %vm164_vm3, %v4718_v27, %v4717_v23  ;;  %v1834_v28 = vsel %vm776_vm7, %v3973_v39, %v4000_v36  ;;  %v4719_v63 = vld [vmem:[#allocation78_spill] sm:$0xff]  ;;  %v4723_v39 = vld [vmem:[#allocation31_spill] sm:$0xff]  ;;  %v4724_v59 = vld [vmem:[#allocation25_spill] sm:$0xff] }
 0x2b9   :  { %v4082_v34 = vpop.permute.xlu1 %1853  ;;  %v891_v25 = vadd.f32 %v886_v44, %v738_v35  ;;  %v1838_v13 = vadd.f32 %v1833_v3, %v1686_v48  ;;  %v1688_v14 = vadd.f32 %v3877_v38, %v1536_v16  ;;  %v1061_v49 = vsel %vm929_vm8, %v4720_v20, %v4719_v63  ;;  %v4725_v60 = vld [vmem:[#allocation107_spill] sm:$0xff]  ;;  %v4726_v16 = vld [vmem:[#allocation88_spill] sm:$0xff] }
 0x2ba   :  { %v4084_v11 = vpop.permute.xlu0 %1851  ;;  %v760_v37 = vadd.f32 %v755_v51, %v607_v5  ;;  %v1687_v55 = vadd.f32 %v1682_v10, %v1535_v40  ;;  %v1399_v53 = vsel %vm317_vm4, %v4722_v32, %v4721_v2  ;;  %v1252_v58 = vadd.f32 %v1247_v9, %v4723_v39  ;;  %v4728_v56 = vld [vmem:[#allocation112_spill] sm:$0xff] }
 0x2bb   :  { %v1044_v26 = vadd.f32 %v1039_v0, %v891_v25  ;;  %v1840_v38 = vadd.f32 %v4000_v36, %v1688_v14  ;;  %v1112_v3 = vmul.f32 %v3955_v17, %v4724_v59  ;;  %v1248_v48 = vsel %vm164_vm3, %v4717_v23, %v4725_v60  ;;  %v4727_v25 = vld [vmem:[#allocation111_spill] sm:$0xff]  ;;  %v4731_v14 = vld [vmem:[#allocation114_spill] sm:$0xff] }
 0x2bc   :  { %v913_v33 = vadd.f32 %v908_v6, %v760_v37  ;;  %v1839_v5 = vadd.f32 %v1834_v28, %v1687_v55  ;;  %v1551_v36 = vsel %vm470_vm5, %v3865_v8, %v3863_v15  ;;  %v1404_v61 = vadd.f32 %v1399_v53, %v1252_v58  ;;  %v4729_v6 = vld [vmem:[#allocation115_spill] sm:$0xff] }
 0x2bd   :  { %v1982_v4 = vpop.permute.xlu1 %1981  ;;  %v1115_v12 = vadd.f32 %v1112_v3, %v1044_v26  ;;  %v1254_v10 = vadd.f32 %v4725_v60, %v4726_v16  ;;  %v1269_v45 = vsel %vm164_vm3, %v4728_v56, %v4727_v25  ;;  %v1400_v40 = vsel %vm317_vm4, %v4721_v2, %v4729_v6  ;;  %v4732_v26 = vld [vmem:[#allocation92_spill] sm:$0xff] }
 0x2be   :  { %v1980_v18 = vpop.permute.xlu0 %1979  ;;  %v1066_v51 = vadd.f32 %v1061_v49, %v913_v33  ;;  %v1703_v8 = vsel %vm623_vm6, %v3949_v46, %v3959_v19  ;;  %v1556_v27 = vadd.f32 %v1551_v36, %v1404_v61  ;;  %v1270_v28 = vsel %vm164_vm3, %v4727_v25, %v4731_v14  ;;  %v4733_v49 = vld [vmem:[#allocation123_spill] sm:$0xff] }
 0x2bf   :  { %v1985_v47 = vsel %vm929_vm8, %v1980_v18, %v1982_v4  ;;  %v4730_v18 = vld [vmem:[#allocation63_spill] sm:$0xff]  ;;  %v1552_v46 = vsel %vm470_vm5, %v3863_v15, %v3875_v31  ;;  %v1855_v37 = vsel %vm776_vm7, %v4049_v29, %v4084_v11  ;;  %v1274_v55 = vadd.f32 %v1269_v45, %v4732_v26 }
 0x2c0   :  { %v1990_v57 = vadd.f32 %v1985_v47, %v1838_v13  ;;  %v1253_v13 = vadd.f32 %v1248_v48, %v1115_v12  ;;  %v1120_v23 = vmul.f32 %v3955_v17, %v4730_v18  ;;  %v1406_v47 = vadd.f32 %v4729_v6, %v1254_v10 }
 0x2c1   :  { %v4124_v44 = vpop.permute.xlu1 %1871  ;;  %v1708_v20 = vadd.f32 %v1703_v8, %v1556_v27  ;;  %v1421_v2 = vsel %vm317_vm4, %v4733_v49, %v3853_v30  ;;  %v1422_v32 = vsel %vm317_vm4, %v3853_v30, %v3851_v7  ;;  %v1704_v15 = vsel %vm623_vm6, %v3959_v19, %v3953_v42  ;;  %v4739_v49 = vld [vmem:[#allocation19_spill] sm:$0xff] }
 0x2c2   :  { %2173 = vrot.lane.b32.xlu1 %v1990_v57, %s2534_s23  ;;  %v1984_v35 = vpop.permute.xlu0 %1983  ;;  %v1123_v57 = vadd.f32 %v1120_v23, %v1066_v51  ;;  %v1405_v63 = vadd.f32 %v1400_v40, %v1253_v13  ;;  %v1558_v53 = vadd.f32 %v3875_v31, %v1406_v47  ;;  %v1573_v39 = vsel %vm470_vm5, %v3941_v22, %v3938_v50  ;;  %v4735_v47 = vld [vmem:[#allocation12_spill] sm:$0xff] }
 0x2c3   :  { %v1986_v21 = vsel %vm929_vm8, %v1982_v4, %v1984_v35  ;;  %v1992_v54 = vadd.f32 %v1984_v35, %v1840_v38  ;;  %v1860_v58 = vadd.f32 %v1855_v37, %v1708_v20  ;;  %v1574_v3 = vsel %vm470_vm5, %v3938_v50, %v3951_v62 }
 0x2c4   :  { %v1991_v0 = vadd.f32 %v1986_v21, %v1839_v5  ;;  %v1275_v38 = vadd.f32 %v1270_v28, %v1123_v57  ;;  %v1557_v33 = vadd.f32 %v1552_v46, %v1405_v63  ;;  %v1710_v30 = vadd.f32 %v3953_v42, %v1558_v53  ;;  %v4734_v21 = vld [vmem:[#allocation81_spill] sm:$0xff]  ;;  %v4736_v46 = vld [vmem:[#allocation36_spill] sm:$0xff] }
 0x2c5   :  { %v4147_v4 = vpop.permute.xlu1 %1875  ;;  %v1856_v31 = vsel %vm776_vm7, %v4084_v11, %v4082_v34  ;;  %v1426_v5 = vadd.f32 %v1421_v2, %v1274_v55  ;;  %v1725_v22 = vsel %vm623_vm6, %v4028_v43, %v4025_v41  ;;  %v1726_v50 = vsel %vm623_vm6, %v4025_v41, %v4054_v52  ;;  %v4737_v55 = vld [vmem:[#allocation109_spill] sm:$0xff]  ;;  %v4740_v2 = vld [vmem:[#allocation43_spill] sm:$0xff] }
 0x2c6   :  { %2177 = vrot.lane.b32.xlu1 %v1992_v54, %s2534_s23  ;;  %2175 = vrot.lane.b32.xlu0 %v1991_v0, %s2534_s23  ;;  %v1874_v9 = vpop.permute.xlu0 %1873  ;;  %v1427_v35 = vadd.f32 %v1422_v32, %v1275_v38  ;;  %v1709_v60 = vadd.f32 %v1704_v15, %v1557_v33  ;;  %v1862_v42 = vadd.f32 %v4082_v34, %v1710_v30  ;;  %v1342_v28 = vstv %s2388_s0  ;;  %v4741_v15 = vld [vmem:[#allocation28_spill] sm:$0xff]  ;;  %v4743_v30 = vld [vmem:[#allocation53_spill] sm:$0xff] }
 0x2c7   :  { %v1276_v11 = vadd.f32 %v4731_v14, %v4734_v21  ;;  %v1578_v54 = vadd.f32 %v1573_v39, %v1426_v5  ;;  %v1877_v0 = vsel %vm776_vm7, %v4124_v44, %v1874_v9  ;;  %v1878_v43 = vsel %vm776_vm7, %v1874_v9, %v4147_v4 }
 0x2c8   :  { %v1579_v51 = vadd.f32 %v1574_v3, %v1427_v35  ;;  %v1861_v12 = vadd.f32 %v1856_v31, %v1709_v60  ;;  %v166_v37 = vsel %vm164_vm3, %v4736_v46, %v4735_v47  ;;  %v1343_v57 = vmul.f32 %v4737_v55, %v1342_v28  ;;  %v4744_v31 = vld [vmem:[#allocation54_spill] sm:$0xff]  ;;  %v4745_v60 = vld [vmem:[#allocation69_spill] sm:$0xff] }
 0x2c9   :  { %v2004_v29 = vpop.permute.xlu1 %2003  ;;  %v1428_v34 = vadd.f32 %v3851_v7, %v1276_v11  ;;  %v1730_v10 = vadd.f32 %v1725_v22, %v1578_v54  ;;  %v4738_v63 = vstv %s3152_s7  ;;  %v1345_v33 = vmul.f32 %v3757_v1, %v1342_v28  ;;  %s2409_s7 = sld [smem:[#allocation7 + $0x57]]  ;;  %v4747_v11 = vld [vmem:[#allocation97_spill] sm:$0xff]  ;;  %v4748_v54 = vld [vmem:[#allocation98_spill] sm:$0xff] }
 0x2ca   :  { %v2002_v59 = vpop.permute.xlu0 %2001  ;;  %v1731_v25 = vadd.f32 %v1726_v50, %v1579_v51  ;;  %v1344_v39 = vmul.f32 %v3955_v17, %v1342_v28  ;;  %v1494_v3 = vstv %s2395_s25  ;;  %v931_v51 = vsel %vm929_vm8, %v4748_v54, %v4747_v11 }
 0x2cb   :  { %v2007_v19 = vsel %vm929_vm8, %v2002_v59, %v2004_v29  ;;  %v1580_v6 = vadd.f32 %v3951_v62, %v1428_v34  ;;  %v1882_v40 = vadd.f32 %v1877_v0, %v1730_v10  ;;  %v1496_v50 = vmul.f32 %v3955_v17, %v1494_v3 }
 0x2cc   :  { %v2012_v48 = vadd.f32 %v2007_v19, %v1860_v58  ;;  %v1883_v8 = vadd.f32 %v1878_v43, %v1731_v25  ;;  %v625_v19 = vsel %vm623_vm6, %v4744_v31, %v4743_v30  ;;  %v1646_v0 = vstv %s2402_s27 }
 0x2cd   :  { %v2024_v36 = vpop.permute.xlu1 %2023  ;;  %v1732_v23 = vadd.f32 %v4054_v52, %v1580_v6  ;;  %v99_v52 = vmul.f32 %v3843_v24, %v4738_v63  ;;  %v1647_v43 = vmul.f32 %v4737_v55, %v1646_v0  ;;  %v1649_v6 = vmul.f32 %v3757_v1, %v1646_v0 }
 0x2ce   :  { %2210 = vrot.lane.b32.xlu0 %v2012_v48, %s2535_s24  ;;  %v2006_v61 = vpop.permute.xlu0 %2005  ;;  %v4746_v48 = vld [vmem:[#allocation68_spill] sm:$0xff] }
 0x2cf   :  { %v2008_v41 = vsel %vm929_vm8, %v2004_v29, %v2006_v61  ;;  %v2014_v16 = vadd.f32 %v2006_v61, %v1862_v42  ;;  %v1884_v14 = vadd.f32 %v4147_v4, %v1732_v23  ;;  %v319_v4 = vsel %vm317_vm4, %v4740_v2, %v4739_v49  ;;  %v4742_v29 = vld [vmem:[#allocation47_spill] sm:$0xff] }
 0x2d0   :  { %v2013_v56 = vadd.f32 %v2008_v41, %v1861_v12  ;;  %v170_v53 = vadd.f32 %v166_v37, %v99_v52  ;;  %v472_v38 = vsel %vm470_vm5, %v4742_v29, %v4741_v15  ;;  %v778_v22 = vsel %vm776_vm7, %v4746_v48, %v4745_v60 }
 0x2d1   :  { %v2028_v45 = vpop.permute.xlu1 %2027  ;;  %v1495_v42 = vmul.f32 %v4737_v55, %v1494_v3  ;;  %v1497_v41 = vmul.f32 %v3757_v1, %v1494_v3  ;;  %v1648_v23 = vmul.f32 %v3955_v17, %v1646_v0  ;;  %v1798_v28 = vstv %s2409_s7 }
 0x2d2   :  { %2214 = vrot.lane.b32.xlu0 %v2014_v16, %s2535_s24  ;;  %2212 = vrot.lane.b32.xlu1 %v2013_v56, %s2535_s24  ;;  %v2026_v44 = vpop.permute.xlu0 %2025  ;;  %v2036_v26 = vadd.f32 %v2028_v45, %v1884_v14  ;;  %v323_v58 = vadd.f32 %v319_v4, %v170_v53  ;;  %v2037_v16 = vlaneseq  ;;  %v4749_v56 = vstv %s3269_s20 }
 0x2d3   :  { %v2029_v13 = vsel %vm929_vm8, %v2024_v36, %v2026_v44  ;;  %v2030_v18 = vsel %vm929_vm8, %v2026_v44, %v2028_v45  ;;  %v1074_v45 = vmul.f32 %v3955_v17, %v4749_v56  ;;  %v1800_v4 = vmul.f32 %v3955_v17, %v1798_v28 }
 0x2d4   :  { %v2034_v27 = vadd.f32 %v2029_v13, %v1882_v40  ;;  %v2035_v7 = vadd.f32 %v2030_v18, %v1883_v8  ;;  %v476_v35 = vadd.f32 %v472_v38, %v323_v58  ;;  %v4750_v40 = vld [vmem:[#allocation89_spill] sm:$0xff]  ;;  %v4751_v8 = vld [vmem:[#allocation24_spill] sm:$0xff]  ;;  %v4752_v13 = vld [vmem:[#allocation35_spill] sm:$0xff] }
 0x2d5   :  { %v1288_v9 = vpop.permute.xlu1 %1287  ;;  %v1139_v44 = vsel %vm164_vm3, %v4751_v8, %v4750_v40  ;;  %v1140_v18 = vsel %vm164_vm3, %v4750_v40, %v4752_v13 }
 0x2d6   :  { %2249 = vrot.lane.b32.xlu0 %v2035_v7, %s2536_s26  ;;  %2247 = vrot.lane.b32.xlu1 %v2034_v27, %s2536_s26  ;;  %v1286_v62 = vpop.permute.xlu0 %1285  ;;  %v629_v36 = vadd.f32 %v625_v19, %v476_v35  ;;  %v2038_v27 = vand.u32 127, %v2037_v16  ;;  %v1801_v19 = vmul.f32 %v3757_v1, %v1798_v28 }
 0x2d7   :  { %v1291_v47 = vsel %vm317_vm4, %v1286_v62, %v1288_v9  ;;  %v1799_v62 = vmul.f32 %v4737_v55, %v1798_v28 }
 0x2d8   :  { %v782_v61 = vadd.f32 %v778_v22, %v629_v36  ;;  %v4264_v38 = vand.u32 15, %v2038_v27 }
 0x2d9   :  { %v1438_v20 = vpop.permute.xlu1 %1437 }
 0x2da   :  { %1349 = vrot.lane.b32.xlu0 %v1343_v57, %s2527_s11  ;;  %2251 = vrot.lane.b32.xlu1 %v2036_v26, %s2536_s26  ;;  %v1290_v32 = vpop.permute.xlu0 %1289  ;;  %v935_v34 = vadd.f32 %v931_v51, %v782_v61  ;;  %v2039_v26 = vadd.s32 128, %v2038_v27  ;;  %v4753_v57 = vld [vmem:[#allocation99_spill] sm:$0xff]  ;;  %v2064_v22 = vadd.s32 4294967293, %v4264_v38  ;;  %v2088_v0 = vadd.s32 4294967294, %v4264_v38 }
 0x2db   :  { %v1292_v46 = vsel %vm317_vm4, %v1288_v9, %v1290_v32  ;;  %v1143_v63 = vadd.f32 %v1139_v44, %v4753_v57 }
 0x2dc   :  { %v1076_v7 = vadd.f32 %v1074_v45, %v935_v34  ;;  %vm2066_vm9 = vcmp.ge.s32.totalorder %v2064_v22, 0  ;;  %vm2090_vm12 = vcmp.ge.s32.totalorder %v2088_v0, 0  ;;  %v2125_v45 = vadd.s32 4294967295, %v4264_v38  ;;  %v4758_v0 = vld [vmem:[#allocation44_spill] sm:$0xff] }
 0x2dd   :  { %v1442_v59 = vpop.permute.xlu1 %1441  ;;  %v1295_v53 = vadd.f32 %v1291_v47, %v1143_v63 }
 0x2de   :  { %1353 = vrot.lane.b32.xlu0 %v1345_v33, %s2527_s11  ;;  %1351 = vrot.lane.b32.xlu1 %v1344_v39, %s2527_s11  ;;  %v1440_v5 = vpop.permute.xlu0 %1439  ;;  %s4242_s11 = sld [smem:[#allocation7 + $0x5e]]  ;;  %v1144_v52 = vadd.f32 %v1140_v18, %v1076_v7  ;;  %vm2127_vm15 = vcmp.ge.s32.totalorder %v2125_v45, 0  ;;  %v2162_v7 = vadd.s32 1, %v4264_v38  ;;  %v4761_v45 = vld [vmem:[#allocation59_spill] sm:$0xff] }
 0x2df   :  { %v1443_v49 = vsel %vm470_vm5, %v1438_v20, %v1440_v5  ;;  %v1444_v2 = vsel %vm470_vm5, %v1440_v5, %v1442_v59  ;;  %v4266_v20 = vand.u32 15, %v2039_v26 }
 0x2e0   :  { %v1296_v9 = vadd.f32 %v1292_v46, %v1144_v52  ;;  %v1447_v33 = vadd.f32 %v1443_v49, %v1295_v53  ;;  %vm2166_vm2 = vcmp.lt.s32.totalorder %v2162_v7, 16  ;;  %v2199_v52 = vadd.s32 2, %v4264_v38 }
 0x2e1   :  { %v1592_v21 = vpop.permute.xlu1 %1591  ;;  %v2200_v49 = vadd.s32 2, %v4266_v20 }
 0x2e2   :  { %1503 = vrot.lane.b32.xlu0 %v1496_v50, %s2528_s17  ;;  %1501 = vrot.lane.b32.xlu1 %v1495_v42, %s2528_s17  ;;  %v1590_v12 = vpop.permute.xlu0 %1589  ;;  %v1448_v39 = vadd.f32 %v1444_v2, %v1296_v9  ;;  %v2065_v50 = vadd.s32 4294967293, %v4266_v20 }
 0x2e3   :  { %v1595_v32 = vsel %vm623_vm6, %v1590_v12, %v1592_v21 }
 0x2e4   :  { %v1950_v59 = vstv %s4242_s11  ;;  %v1599_v5 = vadd.f32 %v1595_v32, %v1447_v33  ;;  %vm2067_vm10 = vcmp.ge.s32.totalorder %v2065_v50, 0  ;;  %v2237_v33 = vadd.s32 3, %v4266_v20 }
 0x2e5   :  { %v1742_v10 = vpop.permute.xlu1 %1741  ;;  %v1951_v31 = vmul.f32 %v4737_v55, %v1950_v59  ;;  %v1953_v55 = vmul.f32 %v3757_v1, %v1950_v59  ;;  %v1952_v11 = vmul.f32 %v3955_v17, %v1950_v59  ;;  %v2089_v1 = vadd.s32 4294967294, %v4266_v20 }
 0x2e6   :  { %1653 = vrot.lane.b32.xlu0 %v1647_v43, %s2529_s1  ;;  %1505 = vrot.lane.b32.xlu1 %v1497_v41, %s2528_s17  ;;  %v1594_v25 = vpop.permute.xlu0 %1593  ;;  %s2537_s17 = smov 3  }
 0x2e7   :  { %v1596_v15 = vsel %vm623_vm6, %v1592_v21, %v1594_v25  ;;  %vm2091_vm13 = vcmp.ge.s32.totalorder %v2089_v1, 0 }
 0x2e8   :  { %v1600_v35 = vadd.f32 %v1596_v15, %v1448_v39 }
 0x2e9   :  { %v1746_v14 = vpop.permute.xlu1 %1745 }
 0x2ea   :  { %1657 = vrot.lane.b32.xlu0 %v1649_v6, %s2529_s1  ;;  %1655 = vrot.lane.b32.xlu1 %v1648_v23, %s2529_s1  ;;  %v1744_v37 = vpop.permute.xlu0 %1743  ;;  %v2126_v6 = vadd.s32 4294967295, %v4266_v20  ;;  %s2538_s1 = smov 125  }
 0x2eb   :  { %v1747_v3 = vsel %vm776_vm7, %v1742_v10, %v1744_v37  ;;  %v1748_v30 = vsel %vm776_vm7, %v1744_v37, %v1746_v14  ;;  %v2163_v14 = vadd.s32 1, %v4266_v20 }
 0x2ec   :  { %v1751_v42 = vadd.f32 %v1747_v3, %v1599_v5  ;;  %v1752_v36 = vadd.f32 %v1748_v30, %v1600_v35  ;;  %vm2128_vm0 = vcmp.ge.s32.totalorder %v2126_v6, 0  ;;  %v4762_v6 = vld [vmem:[#allocation56_spill] sm:$0xff] }
 0x2ed   :  { %v1896_v58 = vpop.permute.xlu1 %1895 }
 0x2ee   :  { %1807 = vrot.lane.b32.xlu0 %v1800_v4, %s2530_s30  ;;  %1805 = vrot.lane.b32.xlu1 %v1799_v62, %s2530_s30  ;;  %v1894_v29 = vpop.permute.xlu0 %1893  ;;  %v2236_v4 = vadd.s32 3, %v4264_v38 }
 0x2ef   :  { %v1899_v60 = vsel %vm929_vm8, %v1894_v29, %v1896_v58 }
 0x2f0   :  { %v1903_v54 = vadd.f32 %v1899_v60, %v1751_v42 }
 0x2f2   :  { %1957 = vrot.lane.b32.xlu0 %v1951_v31, %s2531_s9  ;;  %1809 = vrot.lane.b32.xlu1 %v1801_v19, %s2530_s30  ;;  %v1898_v48 = vpop.permute.xlu0 %1897  ;;  %v2072_v12 = vsel %vm2066_vm9, %v1903_v54, 0.0  ;;  %vm2167_vm9 = vcmp.lt.s32.totalorder %v2163_v14, 16  ;;  %s2539_s30 = smov [#allocation8]  }
 0x2f3   :  { %v1900_v21 = vsel %vm929_vm8, %v1896_v58, %v1898_v48 }
 0x2f4   :  { %v1904_v51 = vadd.f32 %v1900_v21, %v1752_v36 }
 0x2f6   :  { %1961 = vrot.lane.b32.xlu0 %v1953_v55, %s2531_s9  ;;  %1959 = vrot.lane.b32.xlu1 %v1952_v11, %s2531_s9  ;;  %v2073_v61 = vsel %vm2067_vm10, %v1904_v51, 0.0  ;;  %vm2216_vm10 = vcmask 1006592   ;;  %v4754_v55 = vld [vmem:[#allocation13_spill] sm:$0xff]  ;;  %v4755_v11 = vld [vmem:[#allocation40_spill] sm:$0xff]  ;;  %s2313_s9 = sshll.u32 %s2539_s30, 4  ;;  %s2314_s9 = int_to_ptr.vmem [resolvable:$true] %s2313_s9 }
 0x2f7   :  { %v230_v54 = vsel %vm164_vm3, %v4755_v11, %v4754_v55  ;;  %v4756_v51 = vld [vmem:[#allocation80_spill] sm:$0xff]  ;;  %s2494_s20 = scalar_lea.vmem %s2314_s9, 256  ;;  %p2499_p0 = scmp.lt.s32.totalorder %s2314_s9, %s2314_s9 }
 0x2f8   :  { %p2495_p13 = scmp.ne.s32.totalorder %s2314_s9, %s2494_s20  ;;  %p2500_p1 = scmp.lt.s32.totalorder %s2494_s20, %s2494_s20 }
 0x2fa   :  { %2076 = vrot.lane.b32.xlu1 %v2072_v12, %s2537_s17  ;;  %2078 = vrot.lane.b32.xlu0 %v2073_v61, %s2537_s17  ;;  %v121_v12 = vmul.f32 %v3843_v24, %v4756_v51  ;;  %v4757_v61 = vld [vmem:[#allocation23_spill] sm:$0xff]  ;;  %p2501_p2 = por %p2500_p1, %p2499_p0 }
 0x2fb   :  { %v383_v1 = vsel %vm317_vm4, %v4758_v0, %v4757_v61 }
 0x2fc   :  { %p2502_p3 = pnand %p2501_p2, %p2495_p13 }
 0x30c   :  { %v2100_v43 = vpop.permute.xlu1 %2099  ;;  %v2102_v41 = vpop.permute.xlu0 %2101 }
 0x30d   :  { %v2106_v16 = vsel %vm2105_vm11, %v2100_v43, %v2102_v41  ;;  %v235_v43 = vadd.f32 %v230_v54, %v121_v12 }
 0x30e   :  { %v2110_v34 = vsel %vm2090_vm12, %v2106_v16, 0.0  ;;  %vm2204_vm12 = vcmp.lt.s32.totalorder %v2200_v49, 16  ;;  %v4759_v16 = vld [vmem:[#allocation30_spill] sm:$0xff] }
 0x30f   :  { %2114 = vrot.lane.b32.xlu1 %v2110_v34, %s2537_s17  ;;  %v4760_v34 = vld [vmem:[#allocation50_spill] sm:$0xff] }
 0x310   :  { %v2104_v10 = vpop.permute.xlu1 %2103 }
 0x311   :  { %v2107_v25 = vsel %vm2105_vm11, %v2102_v41, %v2104_v10  ;;  %vm2203_vm11 = vcmp.lt.s32.totalorder %v2199_v52, 16  ;;  %v536_v10 = vsel %vm470_vm5, %v4760_v34, %v4759_v16 }
 0x312   :  { %v2111_v56 = vsel %vm2091_vm13, %v2107_v25, 0.0  ;;  %vm2253_vm13 = vcmask 998400   ;;  %v388_v25 = vadd.f32 %v383_v1, %v235_v43 }
 0x313   :  { %2116 = vrot.lane.b32.xlu0 %v2111_v56, %s2537_s17 }
 0x324   :  { %v2139_v40 = vpop.permute.xlu1 %2138  ;;  %v2137_v8 = vpop.permute.xlu0 %2136 }
 0x325   :  { %v2143_v44 = vsel %vm2142_vm14, %v2137_v8, %v2139_v40  ;;  %v541_v8 = vadd.f32 %v536_v10, %v388_v25 }
 0x326   :  { %v2147_v13 = vsel %vm2127_vm15, %v2143_v44, 0.0  ;;  %vm2241_vm15 = vcmp.lt.s32.totalorder %v2237_v33, 16  ;;  %v4763_v44 = vld [vmem:[#allocation75_spill] sm:$0xff] }
 0x327   :  { %2151 = vrot.lane.b32.xlu1 %v2147_v13, %s2537_s17  ;;  %v4764_v13 = vld [vmem:[#allocation76_spill] sm:$0xff] }
 0x328   :  { %v2141_v18 = vpop.permute.xlu0 %2140  ;;  %v842_v24 = vsel %vm776_vm7, %v4764_v13, %v4763_v44 }
 0x329   :  { %v2144_v23 = vsel %vm2142_vm14, %v2139_v40, %v2141_v18  ;;  %vm2240_vm14 = vcmp.lt.s32.totalorder %v2236_v4, 16  ;;  %v689_v40 = vsel %vm623_vm6, %v4762_v6, %v4761_v45 }
 0x32a   :  { %v2148_v27 = vsel %vm2128_vm0, %v2144_v23, 0.0  ;;  %v694_v18 = vadd.f32 %v689_v40, %v541_v8  ;;  %v4765_v23 = vld [vmem:[#allocation100_spill] sm:$0xff] }
 0x32b   :  { %2153 = vrot.lane.b32.xlu0 %v2148_v27, %s2537_s17  ;;  %v4766_v27 = vld [vmem:[#allocation64_spill] sm:$0xff] }
 0x32c   :  { %v1203_v7 = vsel %vm164_vm3, %v4766_v27, %v4765_v23 }
 0x334   :  { %v2174_v28 = vpop.permute.xlu1 %2173 }
 0x338   :  { %v2178_v47 = vpop.permute.xlu1 %2177  ;;  %v2176_v46 = vpop.permute.xlu0 %2175 }
 0x339   :  { %v2180_v37 = vsel %vm2179_vm1, %v2174_v28, %v2176_v46  ;;  %v2181_v26 = vsel %vm2179_vm1, %v2176_v46, %v2178_v47  ;;  %v4767_v28 = vld [vmem:[#allocation74_spill] sm:$0xff]  ;;  %v4768_v47 = vld [vmem:[#allocation29_spill] sm:$0xff] }
 0x33a   :  { %v2184_v57 = vsel %vm2166_vm2, %v2180_v37, 0.0  ;;  %v2185_v63 = vsel %vm2167_vm9, %v2181_v26, 0.0  ;;  %v995_v46 = vsel %vm929_vm8, %v4768_v47, %v4767_v28  ;;  %v847_v37 = vadd.f32 %v842_v24, %v694_v18 }
 0x33b   :  { %2190 = vrot.lane.b32.xlu0 %v2185_v63, %s2537_s17  ;;  %2188 = vrot.lane.b32.xlu1 %v2184_v57, %s2537_s17  ;;  %v4769_v63 = vld [vmem:[#allocation72_spill] sm:$0xff] }
 0x33c   :  { %v1208_v52 = vadd.f32 %v1203_v7, %v4769_v63  ;;  %v1000_v49 = vadd.f32 %v995_v46, %v847_v37 }
 0x340   :  { %v2211_v2 = vpop.permute.xlu0 %2210 }
 0x344   :  { %v2213_v62 = vpop.permute.xlu1 %2212  ;;  %v2215_v53 = vpop.permute.xlu0 %2214 }
 0x345   :  { %v2217_v9 = vsel %vm2216_vm10, %v2211_v2, %v2213_v62  ;;  %v2218_v32 = vsel %vm2216_vm10, %v2213_v62, %v2215_v53  ;;  %v4770_v62 = vld [vmem:[#allocation96_spill] sm:$0xff] }
 0x346   :  { %v2221_v15 = vsel %vm2203_vm11, %v2217_v9, 0.0  ;;  %v2222_v29 = vsel %vm2204_vm12, %v2218_v32, 0.0  ;;  %v1096_v53 = vmul.f32 %v3955_v17, %v4770_v62 }
 0x347   :  { %2225 = vrot.lane.b32.xlu1 %v2221_v15, %s2537_s17  ;;  %2227 = vrot.lane.b32.xlu0 %v2222_v29, %s2537_s17  ;;  %v4771_v15 = vld [vmem:[#allocation94_spill] sm:$0xff] }
 0x348   :  { %v2248_v39 = vpop.permute.xlu1 %2247  ;;  %v2250_v58 = vpop.permute.xlu0 %2249  ;;  %v1204_v29 = vsel %vm164_vm3, %v4765_v23, %v4771_v15  ;;  %vm2080_vm3 = vcmask 23552  }
 0x349   :  { %v2254_v59 = vsel %vm2253_vm13, %v2248_v39, %v2250_v58  ;;  %v1099_v39 = vadd.f32 %v1096_v53, %v1000_v49 }
 0x34a   :  { %v2258_v3 = vsel %vm2240_vm14, %v2254_v59, 0.0 }
 0x34b   :  { %2262 = vrot.lane.b32.xlu1 %v2258_v3, %s2537_s17  ;;  %v4772_v3 = vld [vmem:[#allocation15_spill] sm:$0xff] }
 0x34c   :  { %v2252_v38 = vpop.permute.xlu1 %2251  ;;  %v1350_v19 = vpop.permute.xlu0 %1349 }
 0x34d   :  { %v2255_v30 = vsel %vm2253_vm13, %v2250_v58, %v2252_v38  ;;  %v1210_v38 = vadd.f32 %v4771_v15, %v4772_v3 }
 0x34e   :  { %v2259_v31 = vsel %vm2241_vm15, %v2255_v30, 0.0 }
 0x34f   :  { %2264 = vrot.lane.b32.xlu0 %v2259_v31, %s2537_s17 }
 0x350   :  { %v1352_v5 = vpop.permute.xlu1 %1351  ;;  %v1354_v35 = vpop.permute.xlu0 %1353 }
 0x351   :  { %v1355_v26 = vsel %vm317_vm4, %v1350_v19, %v1352_v5  ;;  %v1356_v30 = vsel %vm317_vm4, %v1352_v5, %v1354_v35  ;;  %v1209_v19 = vadd.f32 %v1204_v29, %v1099_v39  ;;  %vm2300_vm4 = vcmask 1022976  }
 0x352   :  { %v1360_v4 = vadd.f32 %v1355_v26, %v1208_v52 }
 0x353   :  { %v1361_v54 = vadd.f32 %v1356_v30, %v1209_v19 }
 0x354   :  { %v1502_v60 = vpop.permute.xlu1 %1501  ;;  %v1504_v48 = vpop.permute.xlu0 %1503 }
 0x355   :  { %v1507_v2 = vsel %vm470_vm5, %v1502_v60, %v1504_v48 }
 0x356   :  { %v1512_v33 = vadd.f32 %v1507_v2, %v1360_v4 }
 0x358   :  { %v1506_v22 = vpop.permute.xlu1 %1505  ;;  %v1654_v50 = vpop.permute.xlu0 %1653 }
 0x359   :  { %v1508_v55 = vsel %vm470_vm5, %v1504_v48, %v1506_v22 }
 0x35a   :  { %v1513_v0 = vadd.f32 %v1508_v55, %v1361_v54 }
 0x35c   :  { %v1656_v20 = vpop.permute.xlu1 %1655  ;;  %v1658_v42 = vpop.permute.xlu0 %1657 }
 0x35d   :  { %v1659_v9 = vsel %vm623_vm6, %v1654_v50, %v1656_v20  ;;  %v1362_v50 = vadd.f32 %v1354_v35, %v1210_v38 }
 0x35e   :  { %v1664_v31 = vadd.f32 %v1659_v9, %v1512_v33 }
 0x35f   :  { %v1514_v12 = vadd.f32 %v1506_v22, %v1362_v50 }
 0x360   :  { %v1806_v36 = vpop.permute.xlu1 %1805  ;;  %v1808_v21 = vpop.permute.xlu0 %1807 }
 0x361   :  { %v1811_v58 = vsel %vm776_vm7, %v1806_v36, %v1808_v21  ;;  %v1660_v36 = vsel %vm623_vm6, %v1656_v20, %v1658_v42  ;;  %v1666_v43 = vadd.f32 %v1658_v42, %v1514_v12 }
 0x362   :  { %v1816_v11 = vadd.f32 %v1811_v58, %v1664_v31  ;;  %v1665_v16 = vadd.f32 %v1660_v36, %v1513_v0 }
 0x364   :  { %v1810_v41 = vpop.permute.xlu1 %1809  ;;  %v1958_v56 = vpop.permute.xlu0 %1957 }
 0x365   :  { %v1812_v5 = vsel %vm776_vm7, %v1808_v21, %v1810_v41  ;;  %v1818_v10 = vadd.f32 %v1810_v41, %v1666_v43 }
 0x366   :  { %v1817_v48 = vadd.f32 %v1812_v5, %v1665_v16 }
 0x368   :  { %v1960_v14 = vpop.permute.xlu1 %1959  ;;  %v1962_v57 = vpop.permute.xlu0 %1961 }
 0x369   :  { %v1963_v17 = vsel %vm929_vm8, %v1958_v56, %v1960_v14  ;;  %v1964_v35 = vsel %vm929_vm8, %v1960_v14, %v1962_v57  ;;  %v1970_v45 = vadd.f32 %v1962_v57, %v1818_v10 }
 0x36a   :  { %v1968_v61 = vadd.f32 %v1963_v17, %v1816_v11  ;;  %v1969_v20 = vadd.f32 %v1964_v35, %v1817_v48 }
 0x36c   :  { %v2077_v32 = vpop.permute.xlu1 %2076  ;;  %v2079_v59 = vpop.permute.xlu0 %2078 }
 0x36d   :  { %v2085_v25 = vadd.f32 %v2077_v32, %v1968_v61  ;;  %v2081_v22 = vsel %vm2080_vm3, %v2077_v32, %v2079_v59  ;;  %v2087_v8 = vadd.f32 %v2079_v59, %v1970_v45 }
 0x36e   :  { %v2086_v21 = vadd.f32 %v2081_v22, %v1969_v20 }
 0x381   :  { %v2115_v60 = vpop.permute.xlu1 %2114 }
 0x382   :  { %v2122_v6 = vadd.f32 %v2115_v60, %v2085_v25 }
 0x385   :  { %v2117_v51 = vpop.permute.xlu0 %2116 }
 0x386   :  { %v2118_v42 = vsel %vm2080_vm3, %v2115_v60, %v2117_v51  ;;  %v2124_v24 = vadd.f32 %v2117_v51, %v2087_v8 }
 0x387   :  { %v2123_v23 = vadd.f32 %v2118_v42, %v2086_v21 }
 0x399   :  { %v2152_v1 = vpop.permute.xlu1 %2151 }
 0x39a   :  { %v2159_v44 = vadd.f32 %v2152_v1, %v2122_v6 }
 0x39d   :  { %v2154_v34 = vpop.permute.xlu0 %2153 }
 0x39e   :  { %v2155_v41 = vsel %vm2080_vm3, %v2152_v1, %v2154_v34  ;;  %v2161_v7 = vadd.f32 %v2154_v34, %v2124_v24 }
 0x39f   :  { %v2160_v47 = vadd.f32 %v2155_v41, %v2123_v23 }
 0x3ad   :  { %v2189_v56 = vpop.permute.xlu1 %2188  ;;  %v2191_v40 = vpop.permute.xlu0 %2190 }
 0x3ae   :  { %v2196_v18 = vadd.f32 %v2189_v56, %v2159_v44  ;;  %v2192_v14 = vsel %vm2080_vm3, %v2189_v56, %v2191_v40  ;;  %v2198_v37 = vadd.f32 %v2191_v40, %v2161_v7 }
 0x3af   :  { %v2197_v63 = vadd.f32 %v2192_v14, %v2160_v47 }
 0x3b9   :  { %v2226_v13 = vpop.permute.xlu1 %2225  ;;  %v2228_v27 = vpop.permute.xlu0 %2227 }
 0x3ba   :  { %v2233_v28 = vadd.f32 %v2226_v13, %v2196_v18  ;;  %v2229_v26 = vsel %vm2080_vm3, %v2226_v13, %v2228_v27  ;;  %v2235_v52 = vadd.f32 %v2228_v27, %v2198_v37 }
 0x3bb   :  { %v2234_v2 = vadd.f32 %v2229_v26, %v2197_v63 }
 0x3bd   :  { %v2263_v46 = vpop.permute.xlu1 %2262 }
 0x3be   :  { %v2270_v57 = vadd.f32 %v2263_v46, %v2233_v28 }
 0x3c0   :  { %v2420_v49 = vmul.f32 -1.442695, %v2270_v57 }
 0x3c1   :  { %v2265_v4 = vpop.permute.xlu0 %2264 }
 0x3c2   :  { %2441 = vpow2.f32 %v2420_v49  ;;  %v2266_v62 = vsel %vm2080_vm3, %v2263_v46, %v2265_v4  ;;  %v2272_v53 = vadd.f32 %v2265_v4, %v2235_v52 }
 0x3c3   :  { %v2271_v9 = vadd.f32 %v2266_v62, %v2234_v2 }
 0x3c4   :  { %v2422_v32 = vmul.f32 -1.442695, %v2272_v53 }
 0x3c5   :  { %v2421_v15 = vmul.f32 -1.442695, %v2271_v9 }
 0x3c6   :  { %2443 = vpow2.f32 %v2422_v32 }
 0x3c7   :  { %2445 = vpow2.f32 %v2421_v15 }
 0x3cc   :  { %v2442_v29 = vpop.eup %2441 }
 0x3cd   :  { %v2282_v33 = vadd.f32 1.0, %v2442_v29 }
 0x3cf   :  { %2447 = vrcp.f32 %v2282_v33 }
 0x3d0   :  { %v2444_v39 = vpop.eup %2443 }
 0x3d1   :  { %v2446_v58 = vpop.eup %2445  ;;  %v2284_v59 = vadd.f32 1.0, %v2444_v39 }
 0x3d2   :  { %v2283_v3 = vadd.f32 1.0, %v2446_v58 }
 0x3d3   :  { %2449 = vrcp.f32 %v2284_v59 }
 0x3d4   :  { %2451 = vrcp.f32 %v2283_v3 }
 0x3d9   :  { %v2448_v38 = vpop.eup %2447 }
 0x3da   :  { %2294 = vrot.lane.b32.xlu1 %v2448_v38, %s2538_s1 }
 0x3dd   :  { %v2450_v30 = vpop.eup %2449 }
 0x3de   :  { %v2452_v31 = vpop.eup %2451  ;;  %2298 = vrot.lane.b32.xlu1 %v2450_v30, %s2538_s1 }
 0x3df   :  { %2296 = vrot.lane.b32.xlu0 %v2452_v31, %s2538_s1 }
 0x44c   :  { %v2295_v19 = vpop.permute.xlu1 %2294 }
 0x450   :  { %v2299_v17 = vpop.permute.xlu1 %2298 }
 0x451   :  { %v2297_v60 = vpop.permute.xlu0 %2296 }
 0x452   :  { %v2301_v50 = vsel %vm2300_vm4, %v2295_v19, %v2297_v60  ;;  %v2302_v55 = vsel %vm2300_vm4, %v2297_v60, %v2299_v17 }
 0x453   :  { %2305 = vst [vmem:[#allocation8] sm:$0xff] %v2301_v50  ;;  %2306 = vst [vmem:[#allocation8 + $0x8] sm:$0xff] %v2302_v55 }
 0x454   :  { %2505 = shalt.err (!%p2502_p3)
}
 0x455   :  { %s2506_s3 = scalar_lea.hbm %s4366_s2, 256 }
 0x456   :  { %p2507_p4 = scmp.ne.s32.totalorder %s4366_s2, %s2506_s3  ;;  %p2510_p5 = scmp.lt.u32.totalorder %s2506_s3, %s4366_s2 }
 0x458   :  { %p2512_p6 = pnand %p2510_p5, %p2507_p4 }
 0x45a   :  { %2515 = shalt.err (!%p2512_p6)
}
 0x45b   :  { %2316 = dma.vmem_to_hbm [thread:$0]  %s2314_s9, 256, %s4366_s2, [#allocation5]  }
 0x45c   :  { %2520 = dma.done.wait [#allocation5], 256  }
 0x45d   :  { %2521 = vsyncadd [#allocation5], 4294967040 }
 0x45e   :  { %2320 = vsyncpa [#allocation4], 1 }
 0x45f   :  { %2321 = vsyncpa [#allocation5], 1 }
 0x460   :  { %2322 = vsyncpa [#allocation6], 1 }

</bundles_post_ra>
